<compile_context>
chip_gen: v7x
topology: tpu7x:2x2x1
jax: 0.10.0
libtpu: 0.0.40
codegen_flags: <defaults>
</compile_context>

<pallas_src>
import jax
import jax.numpy as jnp
from jax.experimental import pallas as pl
from jax.experimental.pallas import tpu as pltpu


TM_MAX = 384          # max samples per grid step (obs tile 6 MiB f32, x2 buffers)
LSTM_H = 128
CONV1_OC = 16
CONV2_OC = 32
PP = 16               # conv1 output spatial positions (4 x 4)


def _round_up(x, m):
    return (x + m - 1) // m * m


def _cdiv(a, b):
    return -(-a // b)


# ----------------------------------------------------------------------------
# Fused Pallas kernel: conv1 -> conv2 -> fc1 -> fc2 -> LSTMCell -> policy head
# ----------------------------------------------------------------------------
def acb_fused_kernel(x_ref, w1_ref, b1_ref, w2_ref, b2_ref,
                     wf1_ref, bf1_ref, wf2_ref, bf2_ref,
                     wih_ref, whh_ref, blstm_ref, wp_ref, bp_ref,
                     h_in_ref, c_in_ref,
                     logits_ref, h_out_ref, c_out_ref):
    # conv1 as flat-obs @ row-permuted block-diagonal weight -> lane-dense
    # (TM, 256) activation in (h, w, c) order, + ReLU.  The bf16 cast of the
    # obs tile runs on the VPU (slack) so the kernel can stream f32 obs from
    # HBM without a separate XLA relayout/cast pass.
    x = x_ref[...].astype(jnp.bfloat16)
    a1 = jnp.dot(x, w1_ref[...], preferred_element_type=jnp.float32)
    a1 = jnp.maximum(a1 + b1_ref[...], 0.0)

    # conv2 over the whole 4x4 receptive field == single (256, 32) matmul, + ReLU
    a2 = jnp.dot(a1.astype(jnp.bfloat16), w2_ref[...],
                 preferred_element_type=jnp.float32)
    a2 = jnp.maximum(a2 + b2_ref[...], 0.0)

    # mlp_fc1 + ReLU -> (TM, 64)
    f1 = jnp.dot(a2.astype(jnp.bfloat16), wf1_ref[...],
                 preferred_element_type=jnp.float32)
    f1 = jnp.maximum(f1 + bf1_ref[...], 0.0)

    # mlp_fc2 + ReLU -> (TM, 64)  (unpadded; it only feeds the wih matmul)
    f2 = jnp.dot(f1.astype(jnp.bfloat16), wf2_ref[...],
                 preferred_element_type=jnp.float32)
    f2 = jnp.maximum(f2 + bf2_ref[...], 0.0)

    # LSTM gates as two accumulating dots (no VMEM xh scratch, no dead K rows)
    gates = (jnp.dot(f2.astype(jnp.bfloat16), wih_ref[...],
                     preferred_element_type=jnp.float32)
             + jnp.dot(h_in_ref[...], whh_ref[...],
                       preferred_element_type=jnp.float32)
             + blstm_ref[...])

    # PyTorch LSTMCell gate order (i, f, g, o); gating math stays in f32
    i_g = jax.nn.sigmoid(gates[:, 0 * LSTM_H:1 * LSTM_H])
    f_g = jax.nn.sigmoid(gates[:, 1 * LSTM_H:2 * LSTM_H])
    g_g = jnp.tanh(gates[:, 2 * LSTM_H:3 * LSTM_H])
    o_g = jax.nn.sigmoid(gates[:, 3 * LSTM_H:4 * LSTM_H])
    c_new = f_g * c_in_ref[...] + i_g * g_g
    h_new = o_g * jnp.tanh(c_new)
    c_out_ref[...] = c_new
    h_out_ref[...] = h_new

    # policy head, zero-padded to a lane-dense 128-wide output
    logits_ref[...] = (jnp.dot(h_new.astype(jnp.bfloat16), wp_ref[...],
                               preferred_element_type=jnp.float32) + bp_ref[...])


# ----------------------------------------------------------------------------
# One-time weight preparation (hoisted out of the per-step forward)
# ----------------------------------------------------------------------------
def prepare_acb_params(params):
    """Re-layout parameters once per parameter update; returns device arrays."""
    f32, bf16 = jnp.float32, jnp.bfloat16
    C = params["w1"].shape[1]
    CK = C * 64
    n_actions = params["wp"].shape[0]
    NP = _round_up(n_actions, 128)

    # conv1 -> block-diagonal (PP*CK, 256) in patch-major row order, then
    # permute the K rows into flat (c, h, w) obs order so the kernel can
    # consume obs.reshape(N, C*32*32) directly (no im2col transpose at all).
    w1_2d = params["w1"].reshape(CONV1_OC, CK).T.astype(f32)          # (CK, 16)
    w1_bd = jnp.kron(jnp.eye(PP, dtype=f32), w1_2d)                   # (PP*CK, 256)
    w1_perm = (w1_bd.reshape(4, 4, C, 8, 8, PP * CONV1_OC)            # (ph,pw,c,kh,kw,o)
                     .transpose(2, 0, 3, 1, 4, 5)                     # (c,ph,kh,pw,kw,o)
                     .reshape(C * 1024, PP * CONV1_OC)
                     .astype(bf16))                                   # (C*1024, 256)
    b1_r = jnp.tile(params["b1"].astype(f32), PP).reshape(1, PP * CONV1_OC)

    # conv2 weight (O, I, KH, KW) -> (KH, KW, I)-major to match the (h, w, c) layout
    w2_t = (params["w2"].transpose(0, 2, 3, 1)
            .reshape(CONV2_OC, PP * CONV1_OC).T.astype(bf16))         # (256, 32)
    b2_r = params["b2"].astype(f32).reshape(1, CONV2_OC)

    wf1_t = params["wfc1"].T.astype(bf16)                             # (32, 64)
    bf1_r = params["bfc1"].astype(f32).reshape(1, -1)
    wf2_t = params["wfc2"].T.astype(bf16)                             # (64, 64)
    bf2_r = params["bfc2"].astype(f32).reshape(1, -1)

    wih_t = params["wih"].T.astype(bf16)                              # (64, 512)
    whh_t = params["whh"].T.astype(bf16)                              # (128, 512)
    blstm = (params["bih"] + params["bhh"]).astype(f32).reshape(1, 4 * LSTM_H)

    # policy head padded to NP output lanes (pad weights/bias zero)
    wp_t = jnp.zeros((LSTM_H, NP), bf16).at[:, :n_actions].set(
        params["wp"].T.astype(bf16))
    bp_r = jnp.zeros((1, NP), f32).at[:, :n_actions].set(
        params["bp"].astype(f32).reshape(1, -1))

    return dict(w1=w1_perm, b1=b1_r, w2=w2_t, b2=b2_r,
                wf1=wf1_t, bf1=bf1_r, wf2=wf2_t, bf2=bf2_r,
                wih=wih_t, whh=whh_t, blstm=blstm, wp=wp_t, bp=bp_r)


# ----------------------------------------------------------------------------
# Per-step wrapper: obs flatten, row tiling, pallas_call, output slicing
# ----------------------------------------------------------------------------
def acb_agent_forward(obs, hidden_state, prepared, n_agents, n_actions):
    """obs: (N, C, 32, 32) float32; hidden_state: (h, c), each flattening to (N, 128)."""
    h_in, c_in = hidden_state
    h_in = h_in.reshape(-1, h_in.shape[-1]).astype(jnp.bfloat16)   # bf16: matmul input only
    c_in = c_in.reshape(-1, c_in.shape[-1]).astype(jnp.float32)    # f32: cell-state accuracy

    N, C, H, W = obs.shape
    assert H == 32 and W == 32, (
        "conv2 (k=4, s=1) collapses to a single matmul only for a 4x4 conv1 map "
        "(i.e. 32x32 inputs); other spatial sizes are not supported here.")
    assert h_in.shape == (N, LSTM_H) and c_in.shape == (N, LSTM_H), (
        "hidden_state must flatten to (batch*n_agents, 128) in the same row order as obs")
    assert N % n_agents == 0

    D = C * H * W                      # flat obs feature dim (multiple of 128)
    NP = prepared["wp"].shape[1]
    assert n_actions <= NP

    # Free, row-major reshape — no im2col transpose, no extra HBM pass.
    x_flat = obs.reshape(N, D).astype(jnp.float32)

    # ---- row tiling: minimal zero-row padding; >= 2 steps when there is
    # enough work so the "parallel" axis feeds both v7x TensorCores. ----------
    n_steps = max(1, _cdiv(N, TM_MAX))
    if n_steps == 1 and N >= 32:
        n_steps = 2
    tm = _round_up(_cdiv(N, n_steps), 16)
    n_pad = tm * n_steps
    if n_pad != N:
        pad = n_pad - N
        x_flat = jnp.pad(x_flat, ((0, pad), (0, 0)))
        h_in = jnp.pad(h_in, ((0, pad), (0, 0)))
        c_in = jnp.pad(c_in, ((0, pad), (0, 0)))

    def row(cols):
        return pl.BlockSpec((tm, cols), lambda i: (i, 0))

    def full(a):
        # grid-invariant block (constant index_map): DMA'd once, reused per step
        return pl.BlockSpec(a.shape, lambda i: (0,) * a.ndim)

    p = prepared
    logits_p, h_out, c_out = pl.pallas_call(
        acb_fused_kernel,
        out_shape=(jax.ShapeDtypeStruct((n_pad, NP), jnp.float32),
                   jax.ShapeDtypeStruct((n_pad, LSTM_H), jnp.float32),
                   jax.ShapeDtypeStruct((n_pad, LSTM_H), jnp.float32)),
        grid=(n_steps,),
        in_specs=[row(D),
                  full(p["w1"]), full(p["b1"]), full(p["w2"]), full(p["b2"]),
                  full(p["wf1"]), full(p["bf1"]), full(p["wf2"]), full(p["bf2"]),
                  full(p["wih"]), full(p["whh"]), full(p["blstm"]),
                  full(p["wp"]), full(p["bp"]),
                  row(LSTM_H), row(LSTM_H)],
        out_specs=(row(NP), row(LSTM_H), row(LSTM_H)),
        compiler_params=pltpu.CompilerParams(
            dimension_semantics=("parallel",),
            vmem_limit_bytes=48 * 1024 * 1024),
    )(x_flat, p["w1"], p["b1"], p["w2"], p["b2"], p["wf1"], p["bf1"],
      p["wf2"], p["bf2"], p["wih"], p["whh"], p["blstm"], p["wp"], p["bp"],
      h_in, c_in)

    # Padded rows carry junk h/c (sigmoid/tanh of bias) — slice before reshaping.
    logits = logits_p[:N, :n_actions]
    batch_size = N // n_agents
    h_out = h_out[:N].reshape(batch_size, n_agents, LSTM_H)
    c_out = c_out[:N].reshape(batch_size, n_agents, LSTM_H)
    return logits, (h_out, c_out)


# ----------------------------------------------------------------------------
# Pure-JAX f32 reference (mirrors the PyTorch forward exactly)
# ----------------------------------------------------------------------------
def reference_forward(obs, h_in, c_in, params):
    dn = ("NCHW", "OIHW", "NCHW")
    y = jax.lax.conv_general_dilated(obs, params["w1"], (8, 8), "VALID",
                                     dimension_numbers=dn)
    y = jnp.maximum(y + params["b1"][None, :, None, None], 0.0)
    y = jax.lax.conv_general_dilated(y, params["w2"], (1, 1), "VALID",
                                     dimension_numbers=dn)
    y = jnp.maximum(y + params["b2"][None, :, None, None], 0.0)
    x = y.reshape(y.shape[0], -1)
    x = jnp.maximum(x @ params["wfc1"].T + params["bfc1"], 0.0)
    x = jnp.maximum(x @ params["wfc2"].T + params["bfc2"], 0.0)
    gates = (x @ params["wih"].T + params["bih"]
             + h_in @ params["whh"].T + params["bhh"])
    i, f, g, o = jnp.split(gates, 4, axis=1)
    i, f, g, o = jax.nn.sigmoid(i), jax.nn.sigmoid(f), jnp.tanh(g), jax.nn.sigmoid(o)
    c = f * c_in + i * g
    h = o * jnp.tanh(c)
    logits = h @ params["wp"].T + params["bp"]
    return logits, h, c


# ----------------------------------------------------------------------------
# Deterministic parameter construction (synthetic; small nonzero biases so the
# kernel's bias routing is actually exercised — forward semantics unaffected).
# ----------------------------------------------------------------------------
def make_params(key, in_channels, n_actions):
    ks = jax.random.split(key, 14)
    s, b = 0.1, 0.05
    return {
        "w1":   s * jax.random.normal(ks[0], (16, in_channels, 8, 8), jnp.float32),
        "b1":   b * jax.random.normal(ks[1], (16,), jnp.float32),
        "w2":   s * jax.random.normal(ks[2], (32, 16, 4, 4), jnp.float32),
        "b2":   b * jax.random.normal(ks[3], (32,), jnp.float32),
        "wfc1": s * jax.random.normal(ks[4], (64, 32), jnp.float32),   # conv_out_dim = 32
        "bfc1": b * jax.random.normal(ks[5], (64,), jnp.float32),
        "wfc2": s * jax.random.normal(ks[6], (64, 64), jnp.float32),
        "bfc2": b * jax.random.normal(ks[7], (64,), jnp.float32),
        "wih":  s * jax.random.normal(ks[8], (4 * 128, 64), jnp.float32),
        "bih":  b * jax.random.normal(ks[9], (4 * 128,), jnp.float32),
        "whh":  s * jax.random.normal(ks[10], (4 * 128, 128), jnp.float32),
        "bhh":  b * jax.random.normal(ks[11], (4 * 128,), jnp.float32),
        "wp":   s * jax.random.normal(ks[12], (n_actions, 128), jnp.float32),
        "bp":   b * jax.random.normal(ks[13], (n_actions,), jnp.float32),
    }
    # TODO(synk): orthogonal init with relu gain is not reproduced bit-for-bit;
    # deterministic Gaussian init is used instead (forward semantics unaffected).


if __name__ == "__main__":
    key = jax.random.PRNGKey(0)
    batch_size, n_agents = 2, 3
    C, H, W = 4, 32, 32          # 32x32 so conv1(k8,s8)->4x4, conv2(k4,s1)->1x1
    n_actions = 5
    N = batch_size * n_agents

    k_obs, k_h, k_c, k_p = jax.random.split(key, 4)
    obs = jax.random.normal(k_obs, (N, C, H, W), jnp.float32)
    h0 = jax.random.normal(k_h, (N, 128), jnp.float32) * 0.1
    c0 = jax.random.normal(k_c, (N, 128), jnp.float32) * 0.1
    params = make_params(k_p, C, n_actions)

    # Weight re-layout runs ONCE per parameter update; the per-step path is
    # just the jitted forward (free reshape + pad + one pallas_call).
    prepared = prepare_acb_params(params)
    forward = jax.jit(acb_agent_forward, static_argnames=("n_agents", "n_actions"))

    logits, (h_out, c_out) = forward(obs, (h0, c0), prepared,
                                     n_agents=n_agents, n_actions=n_actions)
    jax.block_until_ready((logits, h_out, c_out))

    ref_logits, ref_h, ref_c = reference_forward(obs, h0, c0, params)
    assert logits.shape == (N, n_actions)
    assert h_out.shape == (batch_size, n_agents, 128)
    assert c_out.shape == (batch_size, n_agents, 128)
    # bf16 matmuls in the kernel -> compare to the f32 reference at bf16-level tolerance
    tol = dict(atol=2.5e-2, rtol=2.5e-2)
    assert jnp.allclose(logits, ref_logits, **tol), \
        float(jnp.max(jnp.abs(logits - ref_logits)))
    assert jnp.allclose(h_out.reshape(N, 128), ref_h, **tol), \
        float(jnp.max(jnp.abs(h_out.reshape(N, 128) - ref_h)))
    assert jnp.allclose(c_out.reshape(N, 128), ref_c, **tol), \
        float(jnp.max(jnp.abs(c_out.reshape(N, 128) - ref_c)))

    print("KERNEL_OK")
</pallas_src>

<mosaic_0001>
module attributes {stable_mosaic.version = 11 : i64} {
  func.func @acb_fused_kernel(%arg0: i32, %arg1: memref<16x4096xf32, #tpu.memory_space<vmem>>, %arg2: memref<4096x256xbf16, #tpu.memory_space<vmem>>, %arg3: memref<1x256xf32, #tpu.memory_space<vmem>>, %arg4: memref<256x32xbf16, #tpu.memory_space<vmem>>, %arg5: memref<1x32xf32, #tpu.memory_space<vmem>>, %arg6: memref<32x64xbf16, #tpu.memory_space<vmem>>, %arg7: memref<1x64xf32, #tpu.memory_space<vmem>>, %arg8: memref<64x64xbf16, #tpu.memory_space<vmem>>, %arg9: memref<1x64xf32, #tpu.memory_space<vmem>>, %arg10: memref<64x512xbf16, #tpu.memory_space<vmem>>, %arg11: memref<128x512xbf16, #tpu.memory_space<vmem>>, %arg12: memref<1x512xf32, #tpu.memory_space<vmem>>, %arg13: memref<128x128xbf16, #tpu.memory_space<vmem>>, %arg14: memref<1x128xf32, #tpu.memory_space<vmem>>, %arg15: memref<16x128xbf16, #tpu.memory_space<vmem>>, %arg16: memref<16x128xf32, #tpu.memory_space<vmem>>, %arg17: memref<16x128xf32, #tpu.memory_space<vmem>>, %arg18: memref<16x128xf32, #tpu.memory_space<vmem>>, %arg19: memref<16x128xf32, #tpu.memory_space<vmem>>) attributes {dimension_semantics = [#tpu.dimension_semantics<parallel>], iteration_bounds = array<i64: 1>, scalar_prefetch = 0 : i64, scratch_operands = 0 : i64, tpu.core_type = #tpu.core_type<tc>, window_params = [{transform_indices = @transform_0, window_bounds = array<i64: 16, 4096>}, {pipeline_mode = #tpu.pipeline_mode<synchronous>, transform_indices = @transform_1, window_bounds = array<i64: 4096, 256>}, {pipeline_mode = #tpu.pipeline_mode<synchronous>, transform_indices = @transform_2, window_bounds = array<i64: 1, 256>}, {pipeline_mode = #tpu.pipeline_mode<synchronous>, transform_indices = @transform_3, window_bounds = array<i64: 256, 32>}, {pipeline_mode = #tpu.pipeline_mode<synchronous>, transform_indices = @transform_4, window_bounds = array<i64: 1, 32>}, {pipeline_mode = #tpu.pipeline_mode<synchronous>, transform_indices = @transform_5, window_bounds = array<i64: 32, 64>}, {pipeline_mode = #tpu.pipeline_mode<synchronous>, transform_indices = @transform_6, window_bounds = array<i64: 1, 64>}, {pipeline_mode = #tpu.pipeline_mode<synchronous>, transform_indices = @transform_7, window_bounds = array<i64: 64, 64>}, {pipeline_mode = #tpu.pipeline_mode<synchronous>, transform_indices = @transform_8, window_bounds = array<i64: 1, 64>}, {pipeline_mode = #tpu.pipeline_mode<synchronous>, transform_indices = @transform_9, window_bounds = array<i64: 64, 512>}, {pipeline_mode = #tpu.pipeline_mode<synchronous>, transform_indices = @transform_10, window_bounds = array<i64: 128, 512>}, {pipeline_mode = #tpu.pipeline_mode<synchronous>, transform_indices = @transform_11, window_bounds = array<i64: 1, 512>}, {pipeline_mode = #tpu.pipeline_mode<synchronous>, transform_indices = @transform_12, window_bounds = array<i64: 128, 128>}, {pipeline_mode = #tpu.pipeline_mode<synchronous>, transform_indices = @transform_13, window_bounds = array<i64: 1, 128>}, {transform_indices = @transform_14, window_bounds = array<i64: 16, 128>}, {transform_indices = @transform_15, window_bounds = array<i64: 16, 128>}, {transform_indices = @transform_16, window_bounds = array<i64: 16, 128>}, {transform_indices = @transform_17, window_bounds = array<i64: 16, 128>}, {transform_indices = @transform_18, window_bounds = array<i64: 16, 128>}]} {
    %c0 = arith.constant 0 : index
    %c0_0 = arith.constant 0 : index
    %0 = vector.load %arg1[%c0, %c0_0] : memref<16x4096xf32, #tpu.memory_space<vmem>>, vector<16x4096xf32>
    %1 = arith.truncf %0 : vector<16x4096xf32> to vector<16x4096xbf16>
    %c0_1 = arith.constant 0 : index
    %c0_2 = arith.constant 0 : index
    %2 = vector.load %arg2[%c0_1, %c0_2] : memref<4096x256xbf16, #tpu.memory_space<vmem>>, vector<4096x256xbf16>
    %cst = arith.constant dense<0.000000e+00> : vector<16x256xf32>
    %3 = tpu.matmul %1, %2, %cst {dimension_numbers = #tpu.dot_dimension_numbers<[1], [0], [0], [1], [0, 0, 1, 1], [], []>} : vector<16x4096xbf16>, vector<4096x256xbf16>, vector<16x256xf32> -> vector<16x256xf32>
    %c0_3 = arith.constant 0 : index
    %c0_4 = arith.constant 0 : index
    %4 = vector.load %arg3[%c0_3, %c0_4] : memref<1x256xf32, #tpu.memory_space<vmem>>, vector<1x256xf32>
    %5 = vector.broadcast %4 : vector<1x256xf32> to vector<16x256xf32>
    %6 = arith.addf %3, %5 : vector<16x256xf32>
    %cst_5 = arith.constant 0.000000e+00 : f32
    %7 = vector.broadcast %cst_5 : f32 to vector<16x256xf32>
    %8 = arith.maximumf %6, %7 : vector<16x256xf32>
    %9 = arith.truncf %8 : vector<16x256xf32> to vector<16x256xbf16>
    %c0_6 = arith.constant 0 : index
    %c0_7 = arith.constant 0 : index
    %10 = vector.load %arg4[%c0_6, %c0_7] : memref<256x32xbf16, #tpu.memory_space<vmem>>, vector<256x32xbf16>
    %cst_8 = arith.constant dense<0.000000e+00> : vector<16x32xf32>
    %11 = tpu.matmul %9, %10, %cst_8 {dimension_numbers = #tpu.dot_dimension_numbers<[1], [0], [0], [1], [0, 0, 1, 1], [], []>} : vector<16x256xbf16>, vector<256x32xbf16>, vector<16x32xf32> -> vector<16x32xf32>
    %c0_9 = arith.constant 0 : index
    %c0_10 = arith.constant 0 : index
    %12 = vector.load %arg5[%c0_9, %c0_10] : memref<1x32xf32, #tpu.memory_space<vmem>>, vector<1x32xf32>
    %13 = vector.broadcast %12 : vector<1x32xf32> to vector<16x32xf32>
    %14 = arith.addf %11, %13 : vector<16x32xf32>
    %cst_11 = arith.constant 0.000000e+00 : f32
    %15 = vector.broadcast %cst_11 : f32 to vector<16x32xf32>
    %16 = arith.maximumf %14, %15 : vector<16x32xf32>
    %17 = arith.truncf %16 : vector<16x32xf32> to vector<16x32xbf16>
    %c0_12 = arith.constant 0 : index
    %c0_13 = arith.constant 0 : index
    %18 = vector.load %arg6[%c0_12, %c0_13] : memref<32x64xbf16, #tpu.memory_space<vmem>>, vector<32x64xbf16>
    %cst_14 = arith.constant dense<0.000000e+00> : vector<16x64xf32>
    %19 = tpu.matmul %17, %18, %cst_14 {dimension_numbers = #tpu.dot_dimension_numbers<[1], [0], [0], [1], [0, 0, 1, 1], [], []>} : vector<16x32xbf16>, vector<32x64xbf16>, vector<16x64xf32> -> vector<16x64xf32>
    %c0_15 = arith.constant 0 : index
    %c0_16 = arith.constant 0 : index
    %20 = vector.load %arg7[%c0_15, %c0_16] : memref<1x64xf32, #tpu.memory_space<vmem>>, vector<1x64xf32>
    %21 = vector.broadcast %20 : vector<1x64xf32> to vector<16x64xf32>
    %22 = arith.addf %19, %21 : vector<16x64xf32>
    %cst_17 = arith.constant 0.000000e+00 : f32
    %23 = vector.broadcast %cst_17 : f32 to vector<16x64xf32>
    %24 = arith.maximumf %22, %23 : vector<16x64xf32>
    %25 = arith.truncf %24 : vector<16x64xf32> to vector<16x64xbf16>
    %c0_18 = arith.constant 0 : index
    %c0_19 = arith.constant 0 : index
    %26 = vector.load %arg8[%c0_18, %c0_19] : memref<64x64xbf16, #tpu.memory_space<vmem>>, vector<64x64xbf16>
    %cst_20 = arith.constant dense<0.000000e+00> : vector<16x64xf32>
    %27 = tpu.matmul %25, %26, %cst_20 {dimension_numbers = #tpu.dot_dimension_numbers<[1], [0], [0], [1], [0, 0, 1, 1], [], []>} : vector<16x64xbf16>, vector<64x64xbf16>, vector<16x64xf32> -> vector<16x64xf32>
    %c0_21 = arith.constant 0 : index
    %c0_22 = arith.constant 0 : index
    %28 = vector.load %arg9[%c0_21, %c0_22] : memref<1x64xf32, #tpu.memory_space<vmem>>, vector<1x64xf32>
    %29 = vector.broadcast %28 : vector<1x64xf32> to vector<16x64xf32>
    %30 = arith.addf %27, %29 : vector<16x64xf32>
    %cst_23 = arith.constant 0.000000e+00 : f32
    %31 = vector.broadcast %cst_23 : f32 to vector<16x64xf32>
    %32 = arith.maximumf %30, %31 : vector<16x64xf32>
    %33 = arith.truncf %32 : vector<16x64xf32> to vector<16x64xbf16>
    %c0_24 = arith.constant 0 : index
    %c0_25 = arith.constant 0 : index
    %34 = vector.load %arg10[%c0_24, %c0_25] : memref<64x512xbf16, #tpu.memory_space<vmem>>, vector<64x512xbf16>
    %cst_26 = arith.constant dense<0.000000e+00> : vector<16x512xf32>
    %35 = tpu.matmul %33, %34, %cst_26 {dimension_numbers = #tpu.dot_dimension_numbers<[1], [0], [0], [1], [0, 0, 1, 1], [], []>} : vector<16x64xbf16>, vector<64x512xbf16>, vector<16x512xf32> -> vector<16x512xf32>
    %c0_27 = arith.constant 0 : index
    %c0_28 = arith.constant 0 : index
    %36 = vector.load %arg15[%c0_27, %c0_28] : memref<16x128xbf16, #tpu.memory_space<vmem>>, vector<16x128xbf16>
    %c0_29 = arith.constant 0 : index
    %c0_30 = arith.constant 0 : index
    %37 = vector.load %arg11[%c0_29, %c0_30] : memref<128x512xbf16, #tpu.memory_space<vmem>>, vector<128x512xbf16>
    %cst_31 = arith.constant dense<0.000000e+00> : vector<16x512xf32>
    %38 = tpu.matmul %36, %37, %cst_31 {dimension_numbers = #tpu.dot_dimension_numbers<[1], [0], [0], [1], [0, 0, 1, 1], [], []>} : vector<16x128xbf16>, vector<128x512xbf16>, vector<16x512xf32> -> vector<16x512xf32>
    %39 = arith.addf %35, %38 : vector<16x512xf32>
    %c0_32 = arith.constant 0 : index
    %c0_33 = arith.constant 0 : index
    %40 = vector.load %arg12[%c0_32, %c0_33] : memref<1x512xf32, #tpu.memory_space<vmem>>, vector<1x512xf32>
    %41 = vector.broadcast %40 : vector<1x512xf32> to vector<16x512xf32>
    %42 = arith.addf %39, %41 : vector<16x512xf32>
    %43 = vector.extract_strided_slice %42 {offsets = [0, 0], sizes = [16, 128], strides = [1, 1]} : vector<16x512xf32> to vector<16x128xf32>
    %44 = arith.negf %43 : vector<16x128xf32>
    %45 = math.exp %44 : vector<16x128xf32>
    %cst_34 = arith.constant 1.000000e+00 : f32
    %46 = vector.broadcast %cst_34 : f32 to vector<16x128xf32>
    %47 = arith.addf %46, %45 : vector<16x128xf32>
    %48 = arith.divf %46, %47 : vector<16x128xf32>
    %49 = vector.extract_strided_slice %42 {offsets = [0, 128], sizes = [16, 128], strides = [1, 1]} : vector<16x512xf32> to vector<16x128xf32>
    %50 = arith.negf %49 : vector<16x128xf32>
    %51 = math.exp %50 : vector<16x128xf32>
    %cst_35 = arith.constant 1.000000e+00 : f32
    %52 = vector.broadcast %cst_35 : f32 to vector<16x128xf32>
    %53 = arith.addf %52, %51 : vector<16x128xf32>
    %54 = arith.divf %52, %53 : vector<16x128xf32>
    %55 = vector.extract_strided_slice %42 {offsets = [0, 256], sizes = [16, 128], strides = [1, 1]} : vector<16x512xf32> to vector<16x128xf32>
    %56 = math.tanh %55 : vector<16x128xf32>
    %57 = vector.extract_strided_slice %42 {offsets = [0, 384], sizes = [16, 128], strides = [1, 1]} : vector<16x512xf32> to vector<16x128xf32>
    %58 = arith.negf %57 : vector<16x128xf32>
    %59 = math.exp %58 : vector<16x128xf32>
    %cst_36 = arith.constant 1.000000e+00 : f32
    %60 = vector.broadcast %cst_36 : f32 to vector<16x128xf32>
    %61 = arith.addf %60, %59 : vector<16x128xf32>
    %62 = arith.divf %60, %61 : vector<16x128xf32>
    %c0_37 = arith.constant 0 : index
    %c0_38 = arith.constant 0 : index
    %63 = vector.load %arg16[%c0_37, %c0_38] : memref<16x128xf32, #tpu.memory_space<vmem>>, vector<16x128xf32>
    %64 = arith.mulf %54, %63 : vector<16x128xf32>
    %65 = arith.mulf %48, %56 : vector<16x128xf32>
    %66 = arith.addf %64, %65 : vector<16x128xf32>
    %67 = math.tanh %66 : vector<16x128xf32>
    %68 = arith.mulf %62, %67 : vector<16x128xf32>
    %c0_39 = arith.constant 0 : index
    %c0_40 = arith.constant 0 : index
    %69 = vector.load %arg19[%c0_39, %c0_40] : memref<16x128xf32, #tpu.memory_space<vmem>>, vector<16x128xf32>
    tpu.vector_store %arg19[%c0_39, %c0_40], %66 {strides = array<i32>} : memref<16x128xf32, #tpu.memory_space<vmem>>, vector<16x128xf32>,
    %c0_41 = arith.constant 0 : index
    %c0_42 = arith.constant 0 : index
    %70 = vector.load %arg18[%c0_41, %c0_42] : memref<16x128xf32, #tpu.memory_space<vmem>>, vector<16x128xf32>
    tpu.vector_store %arg18[%c0_41, %c0_42], %68 {strides = array<i32>} : memref<16x128xf32, #tpu.memory_space<vmem>>, vector<16x128xf32>,
    %71 = arith.truncf %68 : vector<16x128xf32> to vector<16x128xbf16>
    %c0_43 = arith.constant 0 : index
    %c0_44 = arith.constant 0 : index
    %72 = vector.load %arg13[%c0_43, %c0_44] : memref<128x128xbf16, #tpu.memory_space<vmem>>, vector<128x128xbf16>
    %cst_45 = arith.constant dense<0.000000e+00> : vector<16x128xf32>
    %73 = tpu.matmul %71, %72, %cst_45 {dimension_numbers = #tpu.dot_dimension_numbers<[1], [0], [0], [1], [0, 0, 1, 1], [], []>} : vector<16x128xbf16>, vector<128x128xbf16>, vector<16x128xf32> -> vector<16x128xf32>
    %c0_46 = arith.constant 0 : index
    %c0_47 = arith.constant 0 : index
    %74 = vector.load %arg14[%c0_46, %c0_47] : memref<1x128xf32, #tpu.memory_space<vmem>>, vector<1x128xf32>
    %75 = vector.broadcast %74 : vector<1x128xf32> to vector<16x128xf32>
    %76 = arith.addf %73, %75 : vector<16x128xf32>
    %c0_48 = arith.constant 0 : index
    %c0_49 = arith.constant 0 : index
    %77 = vector.load %arg17[%c0_48, %c0_49] : memref<16x128xf32, #tpu.memory_space<vmem>>, vector<16x128xf32>
    tpu.vector_store %arg17[%c0_48, %c0_49], %76 {strides = array<i32>} : memref<16x128xf32, #tpu.memory_space<vmem>>, vector<16x128xf32>,
    return
  }
  func.func @transform_0(%arg0: i32) -> (i32, i32) {
    %c0_i32 = arith.constant 0 : i32
    %c0_i32_0 = arith.constant 0 : i32
    return %arg0, %c0_i32 : i32, i32
  }
  func.func @transform_1(%arg0: i32) -> (i32, i32) {
    %c0_i32 = arith.constant 0 : i32
    %c0_i32_0 = arith.constant 0 : i32
    %c0_i32_1 = arith.constant 0 : i32
    return %c0_i32, %c0_i32_0 : i32, i32
  }
  func.func @transform_2(%arg0: i32) -> (i32, i32) {
    %c0_i32 = arith.constant 0 : i32
    %c0_i32_0 = arith.constant 0 : i32
    %c0_i32_1 = arith.constant 0 : i32
    return %c0_i32, %c0_i32_0 : i32, i32
  }
  func.func @transform_3(%arg0: i32) -> (i32, i32) {
    %c0_i32 = arith.constant 0 : i32
    %c0_i32_0 = arith.constant 0 : i32
    %c0_i32_1 = arith.constant 0 : i32
    return %c0_i32, %c0_i32_0 : i32, i32
  }
  func.func @transform_4(%arg0: i32) -> (i32, i32) {
    %c0_i32 = arith.constant 0 : i32
    %c0_i32_0 = arith.constant 0 : i32
    %c0_i32_1 = arith.constant 0 : i32
    return %c0_i32, %c0_i32_0 : i32, i32
  }
  func.func @transform_5(%arg0: i32) -> (i32, i32) {
    %c0_i32 = arith.constant 0 : i32
    %c0_i32_0 = arith.constant 0 : i32
    %c0_i32_1 = arith.constant 0 : i32
    return %c0_i32, %c0_i32_0 : i32, i32
  }
  func.func @transform_6(%arg0: i32) -> (i32, i32) {
    %c0_i32 = arith.constant 0 : i32
    %c0_i32_0 = arith.constant 0 : i32
    %c0_i32_1 = arith.constant 0 : i32
    return %c0_i32, %c0_i32_0 : i32, i32
  }
  func.func @transform_7(%arg0: i32) -> (i32, i32) {
    %c0_i32 = arith.constant 0 : i32
    %c0_i32_0 = arith.constant 0 : i32
    %c0_i32_1 = arith.constant 0 : i32
    return %c0_i32, %c0_i32_0 : i32, i32
  }
  func.func @transform_8(%arg0: i32) -> (i32, i32) {
    %c0_i32 = arith.constant 0 : i32
    %c0_i32_0 = arith.constant 0 : i32
    %c0_i32_1 = arith.constant 0 : i32
    return %c0_i32, %c0_i32_0 : i32, i32
  }
  func.func @transform_9(%arg0: i32) -> (i32, i32) {
    %c0_i32 = arith.constant 0 : i32
    %c0_i32_0 = arith.constant 0 : i32
    %c0_i32_1 = arith.constant 0 : i32
    return %c0_i32, %c0_i32_0 : i32, i32
  }
  func.func @transform_10(%arg0: i32) -> (i32, i32) {
    %c0_i32 = arith.constant 0 : i32
    %c0_i32_0 = arith.constant 0 : i32
    %c0_i32_1 = arith.constant 0 : i32
    return %c0_i32, %c0_i32_0 : i32, i32
  }
  func.func @transform_11(%arg0: i32) -> (i32, i32) {
    %c0_i32 = arith.constant 0 : i32
    %c0_i32_0 = arith.constant 0 : i32
    %c0_i32_1 = arith.constant 0 : i32
    return %c0_i32, %c0_i32_0 : i32, i32
  }
  func.func @transform_12(%arg0: i32) -> (i32, i32) {
    %c0_i32 = arith.constant 0 : i32
    %c0_i32_0 = arith.constant 0 : i32
    %c0_i32_1 = arith.constant 0 : i32
    return %c0_i32, %c0_i32_0 : i32, i32
  }
  func.func @transform_13(%arg0: i32) -> (i32, i32) {
    %c0_i32 = arith.constant 0 : i32
    %c0_i32_0 = arith.constant 0 : i32
    %c0_i32_1 = arith.constant 0 : i32
    return %c0_i32, %c0_i32_0 : i32, i32
  }
  func.func @transform_14(%arg0: i32) -> (i32, i32) {
    %c0_i32 = arith.constant 0 : i32
    %c0_i32_0 = arith.constant 0 : i32
    return %arg0, %c0_i32 : i32, i32
  }
  func.func @transform_15(%arg0: i32) -> (i32, i32) {
    %c0_i32 = arith.constant 0 : i32
    %c0_i32_0 = arith.constant 0 : i32
    return %arg0, %c0_i32 : i32, i32
  }
  func.func @transform_16(%arg0: i32) -> (i32, i32) {
    %c0_i32 = arith.constant 0 : i32
    %c0_i32_0 = arith.constant 0 : i32
    return %arg0, %c0_i32 : i32, i32
  }
  func.func @transform_17(%arg0: i32) -> (i32, i32) {
    %c0_i32 = arith.constant 0 : i32
    %c0_i32_0 = arith.constant 0 : i32
    return %arg0, %c0_i32 : i32, i32
  }
  func.func @transform_18(%arg0: i32) -> (i32, i32) {
    %c0_i32 = arith.constant 0 : i32
    %c0_i32_0 = arith.constant 0 : i32
    return %arg0, %c0_i32 : i32, i32
  }
}

</mosaic_0001>

<bundles_post_ra>
// kernel: acb_agent_forward.1
= control target key start
LH: loop header
LB: loop body
LE: loop exit
PB: predicated region body
PF: predicated region fallthrough
CT: control target
= control target key end

     0   :  { %s7677_s0 = inlined_call_operand.vmem [shape: f32[16,4096], index: 0, kind: input, shape index: {}]   ;;  %s7678_s1 = inlined_call_operand.hbm [shape: bf16[4096,256], index: 1, kind: input, shape index: {}]   ;;  %s7679_s2 = inlined_call_operand.hbm [shape: f32[1,256], index: 2, kind: input, shape index: {}]   ;;  %s7680_s3 = inlined_call_operand.vmem [shape: bf16[256,32], index: 3, kind: input, shape index: {}]   ;;  %s7681_s4 = inlined_call_operand.hbm [shape: f32[1,32], index: 4, kind: input, shape index: {}]   ;;  %s7682_s5 = inlined_call_operand.hbm [shape: bf16[32,64], index: 5, kind: input, shape index: {}]   ;;  %s7683_s6 = inlined_call_operand.hbm [shape: f32[1,64], index: 6, kind: input, shape index: {}]   ;;  %s7684_s7 = inlined_call_operand.hbm [shape: bf16[64,64], index: 7, kind: input, shape index: {}]   ;;  %s7685_s8 = inlined_call_operand.hbm [shape: f32[1,64], index: 8, kind: input, shape index: {}]   ;;  %s7686_s9 = inlined_call_operand.hbm [shape: bf16[64,512], index: 9, kind: input, shape index: {}]   ;;  %s7687_s10 = inlined_call_operand.hbm [shape: bf16[128,512], index: 10, kind: input, shape index: {}]   ;;  %s7688_s11 = inlined_call_operand.hbm [shape: f32[1,512], index: 11, kind: input, shape index: {}]   ;;  %s7689_s12 = inlined_call_operand.hbm [shape: bf16[128,128], index: 12, kind: input, shape index: {}]   ;;  %s7690_s13 = inlined_call_operand.hbm [shape: f32[1,128], index: 13, kind: input, shape index: {}]   ;;  %s7691_s14 = inlined_call_operand.vmem [shape: bf16[16,128], index: 14, kind: input, shape index: {}]   ;;  %s7692_s15 = inlined_call_operand.vmem [shape: f32[16,128], index: 15, kind: input, shape index: {}]   ;;  %s7693_s16 = inlined_call_operand.vmem [shape: f32[16,128], index: 16, kind: output, shape index: {0}]   ;;  %s7694_s17 = inlined_call_operand.vmem [shape: f32[16,128], index: 17, kind: output, shape index: {1}]   ;;  %s7695_s18 = inlined_call_operand.vmem [shape: f32[16,128], index: 18, kind: output, shape index: {2}]  }
   0x1   :  { %7701 = sst [smem:[#allocation28_spill]] %s7677_s0 }
   0x2   :  { %7702 = sst [smem:[#allocation29_spill]] %s7678_s1 }
   0x3   :  { %7703 = sst [smem:[#allocation30_spill]] %s7679_s2 }
   0x4   :  { %7704 = sst [smem:[#allocation31_spill]] %s7693_s16 }
   0x5   :  { %24 = vsyncpa [#allocation3], 0 }
   0x6   :  { %25 = vsyncpa [#allocation5], 0 }
   0x7   :  { %26 = vsyncpa [#allocation8], 0 }
   0x8   :  { %27 = vsyncpa [#allocation11], 0 }
   0x9   :  { %28 = vsyncpa [#allocation14], 0 }
   0xa   :  { %29 = vsyncpa [#allocation17], 0 }
   0xb   :  { %30 = vsyncpa [#allocation20], 0  ;;  %s7066_s27 = smov [#allocation4]   ;;  %s7067_s29 = smov [#allocation7]  }
   0xc   :  { %s51_s28 = sshll.u32 %s7066_s27, 4  ;;  %s72_s30 = sshll.u32 %s7067_s29, 4  ;;  %s52_s28 = int_to_ptr.vmem [resolvable:$true] %s51_s28  ;;  %s7182_s30 = int_to_ptr.vmem [resolvable:$true] %s72_s30 }
   0xd   :  { %s7705_s1 = sld [smem:[#allocation30_spill]] }
  0x13   :  { %s6788_s20 = scalar_lea.hbm %s7705_s1, 32 }
  0x14   :  { %p6789_p0 = scmp.ne.s32.totalorder %s7705_s1, %s6788_s20  ;;  %p6792_p1 = scmp.lt.u32.totalorder %s6788_s20, %s7705_s1 }
  0x16   :  { %p6794_p2 = pnand %p6792_p1, %p6789_p0 }
  0x18   :  { %6797 = shalt.err (!%p6794_p2)
}
  0x19   :  { %s6798_s24 = scalar_lea.vmem %s52_s28, 32  ;;  %p6803_p4 = scmp.lt.s32.totalorder %s52_s28, %s52_s28 }
  0x1a   :  { %p6799_p3 = scmp.ne.s32.totalorder %s52_s28, %s6798_s24  ;;  %p6804_p5 = scmp.lt.s32.totalorder %s6798_s24, %s6798_s24 }
  0x1c   :  { %p6805_p6 = por %p6804_p5, %p6803_p4 }
  0x1e   :  { %p6806_p7 = pnand %p6805_p6, %p6799_p3 }
  0x20   :  { %6809 = shalt.err (!%p6806_p7)
}
  0x21   :  { %54 = dma.hbm_to_vmem [thread:$0]  %s7705_s1, 32, %s52_s28, [#allocation5]  }
  0x22   :  { %s6810_s0 = scalar_lea.hbm %s7682_s5, 256 }
  0x23   :  { %p6811_p8 = scmp.ne.s32.totalorder %s7682_s5, %s6810_s0  ;;  %p6814_p9 = scmp.lt.u32.totalorder %s6810_s0, %s7682_s5 }
  0x25   :  { %p6816_p10 = pnand %p6814_p9, %p6811_p8 }
  0x27   :  { %6819 = shalt.err (!%p6816_p10)
}
  0x28   :  { %s6820_s2 = scalar_lea.vmem %s7182_s30, 256  ;;  %p6825_p12 = scmp.lt.s32.totalorder %s7182_s30, %s7182_s30 }
  0x29   :  { %p6821_p11 = scmp.ne.s32.totalorder %s7182_s30, %s6820_s2  ;;  %p6826_p13 = scmp.lt.s32.totalorder %s6820_s2, %s6820_s2 }
  0x2b   :  { %p6827_p0 = por %p6826_p13, %p6825_p12 }
  0x2d   :  { %p6828_p1 = pnand %p6827_p0, %p6821_p11 }
  0x2f   :  { %6831 = shalt.err (!%p6828_p1)
}
  0x30   :  { %s7700_s28 = smov 64   ;;  %s7069_s1 = smov 4  }
  0x31   :  { %78 = dma.hbm_to_vmem [thread:$0]  %s7682_s5, 256, %s7182_s30, [#allocation8], %s7700_s28, %s7700_s28, %s7069_s1  }
  0x32   :  { %s7070_s25 = smov [#allocation10]   ;;  %s7071_s27 = smov [#allocation13]  }
  0x33   :  { %s94_s26 = sshll.u32 %s7070_s25, 4  ;;  %s116_s29 = sshll.u32 %s7071_s27, 4  ;;  %s95_s26 = int_to_ptr.vmem [resolvable:$true] %s94_s26  ;;  %s7216_s29 = int_to_ptr.vmem [resolvable:$true] %s116_s29 }
  0x34   :  { %s6832_s21 = scalar_lea.hbm %s7684_s7, 512 }
  0x35   :  { %p6833_p2 = scmp.ne.s32.totalorder %s7684_s7, %s6832_s21  ;;  %p6836_p3 = scmp.lt.u32.totalorder %s6832_s21, %s7684_s7 }
  0x37   :  { %p6838_p4 = pnand %p6836_p3, %p6833_p2 }
  0x39   :  { %6841 = shalt.err (!%p6838_p4)
}
  0x3a   :  { %s6842_s5 = scalar_lea.vmem %s95_s26, 512  ;;  %p6847_p6 = scmp.lt.s32.totalorder %s95_s26, %s95_s26 }
  0x3b   :  { %p6843_p5 = scmp.ne.s32.totalorder %s95_s26, %s6842_s5  ;;  %p6848_p7 = scmp.lt.s32.totalorder %s6842_s5, %s6842_s5 }
  0x3d   :  { %p6849_p8 = por %p6848_p7, %p6847_p6 }
  0x3f   :  { %p6850_p9 = pnand %p6849_p8, %p6843_p5 }
  0x41   :  { %6853 = shalt.err (!%p6850_p9)
}
  0x42   :  { %100 = dma.hbm_to_vmem [thread:$0]  %s7684_s7, 512, %s95_s26, [#allocation11], %s7700_s28, %s7700_s28, %s7069_s1  }
  0x43   :  { %s6854_s16 = scalar_lea.hbm %s7686_s9, 2048 }
  0x44   :  { %p6855_p10 = scmp.ne.s32.totalorder %s7686_s9, %s6854_s16  ;;  %p6858_p11 = scmp.lt.u32.totalorder %s6854_s16, %s7686_s9 }
  0x46   :  { %p6860_p12 = pnand %p6858_p11, %p6855_p10 }
  0x48   :  { %6863 = shalt.err (!%p6860_p12)
}
  0x49   :  { %s6864_s20 = scalar_lea.vmem %s7216_s29, 2048  ;;  %p6869_p0 = scmp.lt.s32.totalorder %s7216_s29, %s7216_s29 }
  0x4a   :  { %p6865_p13 = scmp.ne.s32.totalorder %s7216_s29, %s6864_s20  ;;  %p6870_p1 = scmp.lt.s32.totalorder %s6864_s20, %s6864_s20 }
  0x4c   :  { %p6871_p2 = por %p6870_p1, %p6869_p0 }
  0x4e   :  { %p6872_p3 = pnand %p6871_p2, %p6865_p13 }
  0x50   :  { %6875 = shalt.err (!%p6872_p3)
}
  0x51   :  { %s7072_s7 = smov 256   ;;  %s7073_s26 = smov 16  }
  0x52   :  { %122 = dma.hbm_to_vmem [thread:$0]  %s7686_s9, 2048, %s7216_s29, [#allocation14], %s7072_s7, %s7072_s7, %s7073_s26  }
  0x53   :  { %s7074_s5 = smov [#allocation16]   ;;  %s7075_s23 = smov [#allocation2]  }
  0x54   :  { %s141_s30 = sshll.u32 %s7074_s5, 4  ;;  %s38_s24 = sshll.u32 %s7075_s23, 4  ;;  %s142_s30 = int_to_ptr.vmem [resolvable:$true] %s141_s30  ;;  %s7253_s24 = int_to_ptr.vmem [resolvable:$true] %s38_s24 }
  0x55   :  { %s6876_s27 = scalar_lea.hbm %s7688_s11, 64 }
  0x56   :  { %p6877_p4 = scmp.ne.s32.totalorder %s7688_s11, %s6876_s27  ;;  %p6880_p5 = scmp.lt.u32.totalorder %s6876_s27, %s7688_s11 }
  0x58   :  { %p6882_p6 = pnand %p6880_p5, %p6877_p4 }
  0x5a   :  { %6885 = shalt.err (!%p6882_p6)
}
  0x5b   :  { %s6886_s9 = scalar_lea.vmem %s142_s30, 64  ;;  %p6891_p8 = scmp.lt.s32.totalorder %s142_s30, %s142_s30 }
  0x5c   :  { %p6887_p7 = scmp.ne.s32.totalorder %s142_s30, %s6886_s9  ;;  %p6892_p9 = scmp.lt.s32.totalorder %s6886_s9, %s6886_s9 }
  0x5e   :  { %p6893_p10 = por %p6892_p9, %p6891_p8 }
  0x60   :  { %p6894_p11 = pnand %p6893_p10, %p6887_p7 }
  0x62   :  { %6897 = shalt.err (!%p6894_p11)
}
  0x63   :  { %144 = dma.hbm_to_vmem [thread:$0]  %s7688_s11, 64, %s142_s30, [#allocation17]  }
  0x64   :  { %s7706_s23 = sld [smem:[#allocation29_spill]] }
  0x6a   :  { %s6898_s25 = scalar_lea.hbm %s7706_s23, 65536 }
  0x6b   :  { %p6899_p12 = scmp.ne.s32.totalorder %s7706_s23, %s6898_s25  ;;  %p6902_p13 = scmp.lt.u32.totalorder %s6898_s25, %s7706_s23 }
  0x6d   :  { %p6904_p0 = pnand %p6902_p13, %p6899_p12 }
  0x6f   :  { %6907 = shalt.err (!%p6904_p0)
}
  0x70   :  { %s6908_s21 = scalar_lea.vmem %s7253_s24, 65536  ;;  %p6913_p2 = scmp.lt.s32.totalorder %s7253_s24, %s7253_s24 }
  0x71   :  { %p6909_p1 = scmp.ne.s32.totalorder %s7253_s24, %s6908_s21  ;;  %p6914_p3 = scmp.lt.s32.totalorder %s6908_s21, %s6908_s21 }
  0x73   :  { %p6915_p4 = por %p6914_p3, %p6913_p2 }
  0x75   :  { %p6916_p5 = pnand %p6915_p4, %p6909_p1 }
  0x77   :  { %6919 = shalt.err (!%p6916_p5)
}
  0x78   :  { %s7076_s11 = smov 128   ;;  %s7077_s30 = smov 8  }
  0x79   :  { %44 = dma.hbm_to_vmem [thread:$0]  %s7706_s23, 65536, %s7253_s24, [#allocation3], %s7076_s11, %s7076_s11, %s7077_s30  }
  0x7a   :  { %s7078_s29 = smov [#allocation6]   ;;  %s7079_s2 = smov [#allocation9]  }
  0x7b   :  { %s63_s22 = sshll.u32 %s7078_s29, 4  ;;  %s85_s5 = sshll.u32 %s7079_s2, 4  ;;  %s64_s22 = int_to_ptr.vmem [resolvable:$true] %s63_s22  ;;  %s86_s5 = int_to_ptr.vmem [resolvable:$true] %s85_s5 }
  0x7c   :  { %s6920_s0 = scalar_lea.hbm %s7681_s4, 16 }
  0x7d   :  { %p6921_p6 = scmp.ne.s32.totalorder %s7681_s4, %s6920_s0  ;;  %p6924_p7 = scmp.lt.u32.totalorder %s6920_s0, %s7681_s4 }
  0x7f   :  { %p6926_p8 = pnand %p6924_p7, %p6921_p6 }
  0x81   :  { %6929 = shalt.err (!%p6926_p8)
}
  0x82   :  { %s6930_s24 = scalar_lea.vmem %s64_s22, 16  ;;  %s6934_s23 = scalar_lea.vmem %s64_s22, 32 }
  0x83   :  { %p6931_p9 = scmp.ne.s32.totalorder %s64_s22, %s6930_s24  ;;  %p6935_p10 = scmp.lt.s32.totalorder %s64_s22, %s64_s22 }
  0x84   :  { %p6936_p11 = scmp.lt.s32.totalorder %s6934_s23, %s6930_s24 }
  0x86   :  { %p6937_p12 = por %p6936_p11, %p6935_p10 }
  0x88   :  { %p6938_p13 = pnand %p6937_p12, %p6931_p9 }
  0x8a   :  { %6941 = shalt.err (!%p6938_p13)
}
  0x8b   :  { %66 = dma.hbm_to_vmem [thread:$0]  %s7681_s4, 16, %s64_s22, [#allocation5]  }
  0x8c   :  { %s6942_s29 = scalar_lea.hbm %s7683_s6, 16 }
  0x8d   :  { %p6943_p0 = scmp.ne.s32.totalorder %s7683_s6, %s6942_s29  ;;  %p6946_p1 = scmp.lt.u32.totalorder %s6942_s29, %s7683_s6 }
  0x8f   :  { %p6948_p2 = pnand %p6946_p1, %p6943_p0 }
  0x91   :  { %6951 = shalt.err (!%p6948_p2)
}
  0x92   :  { %s6952_s0 = scalar_lea.vmem %s86_s5, 16  ;;  %s6956_s27 = scalar_lea.vmem %s86_s5, 32 }
  0x93   :  { %p6953_p3 = scmp.ne.s32.totalorder %s86_s5, %s6952_s0  ;;  %p6957_p4 = scmp.lt.s32.totalorder %s86_s5, %s86_s5 }
  0x94   :  { %p6958_p5 = scmp.lt.s32.totalorder %s6956_s27, %s6952_s0 }
  0x96   :  { %p6959_p6 = por %p6958_p5, %p6957_p4 }
  0x98   :  { %p6960_p7 = pnand %p6959_p6, %p6953_p3 }
  0x9a   :  { %6963 = shalt.err (!%p6960_p7)
}
  0x9b   :  { %88 = dma.hbm_to_vmem [thread:$0]  %s7683_s6, 16, %s86_s5, [#allocation8]  }
  0x9c   :  { %s7080_s19 = smov [#allocation12]   ;;  %s7081_s24 = smov [#allocation15]  }
  0x9d   :  { %s107_s21 = sshll.u32 %s7080_s19, 4  ;;  %s128_s23 = sshll.u32 %s7081_s24, 4  ;;  %s108_s21 = int_to_ptr.vmem [resolvable:$true] %s107_s21  ;;  %s7308_s23 = int_to_ptr.vmem [resolvable:$true] %s128_s23 }
  0x9e   :  { %s6964_s20 = scalar_lea.hbm %s7685_s8, 16 }
  0x9f   :  { %p6965_p8 = scmp.ne.s32.totalorder %s7685_s8, %s6964_s20  ;;  %p6968_p9 = scmp.lt.u32.totalorder %s6964_s20, %s7685_s8 }
  0xa1   :  { %p6970_p10 = pnand %p6968_p9, %p6965_p8 }
  0xa3   :  { %6973 = shalt.err (!%p6970_p10)
}
  0xa4   :  { %s6974_s6 = scalar_lea.vmem %s108_s21, 16  ;;  %s6978_s5 = scalar_lea.vmem %s108_s21, 32 }
  0xa5   :  { %p6975_p11 = scmp.ne.s32.totalorder %s108_s21, %s6974_s6  ;;  %p6979_p12 = scmp.lt.s32.totalorder %s108_s21, %s108_s21 }
  0xa6   :  { %p6980_p13 = scmp.lt.s32.totalorder %s6978_s5, %s6974_s6 }
  0xa8   :  { %p6981_p0 = por %p6980_p13, %p6979_p12 }
  0xaa   :  { %p6982_p1 = pnand %p6981_p0, %p6975_p11 }
  0xac   :  { %6985 = shalt.err (!%p6982_p1)
}
  0xad   :  { %110 = dma.hbm_to_vmem [thread:$0]  %s7685_s8, 16, %s108_s21, [#allocation11]  }
  0xae   :  { %s6986_s4 = scalar_lea.hbm %s7687_s10, 4096 }
  0xaf   :  { %p6987_p2 = scmp.ne.s32.totalorder %s7687_s10, %s6986_s4  ;;  %p6990_p3 = scmp.lt.u32.totalorder %s6986_s4, %s7687_s10 }
  0xb1   :  { %p6992_p4 = pnand %p6990_p3, %p6987_p2 }
  0xb3   :  { %6995 = shalt.err (!%p6992_p4)
}
  0xb4   :  { %s6996_s30 = scalar_lea.vmem %s7308_s23, 4096  ;;  %p7001_p6 = scmp.lt.s32.totalorder %s7308_s23, %s7308_s23 }
  0xb5   :  { %p6997_p5 = scmp.ne.s32.totalorder %s7308_s23, %s6996_s30  ;;  %p7002_p7 = scmp.lt.s32.totalorder %s6996_s30, %s6996_s30 }
  0xb7   :  { %p7003_p8 = por %p7002_p7, %p7001_p6 }
  0xb9   :  { %p7004_p9 = pnand %p7003_p8, %p6997_p5 }
  0xbb   :  { %7007 = shalt.err (!%p7004_p9)
}
  0xbc   :  { %134 = dma.hbm_to_vmem [thread:$0]  %s7687_s10, 4096, %s7308_s23, [#allocation14], %s7072_s7, %s7072_s7, %s7073_s26  }
  0xbd   :  { %s7082_s20 = smov [#allocation18]   ;;  %s7083_s29 = smov [#allocation19]  }
  0xbe   :  { %s150_s9 = sshll.u32 %s7082_s20, 4  ;;  %s163_s28 = sshll.u32 %s7083_s29, 4  ;;  %s151_s9 = int_to_ptr.vmem [resolvable:$true] %s150_s9  ;;  %s164_s28 = int_to_ptr.vmem [resolvable:$true] %s163_s28 }
  0xbf   :  { %s7008_s5 = scalar_lea.hbm %s7689_s12, 1024 }
  0xc0   :  { %p7009_p10 = scmp.ne.s32.totalorder %s7689_s12, %s7008_s5  ;;  %p7012_p11 = scmp.lt.u32.totalorder %s7008_s5, %s7689_s12 }
  0xc2   :  { %p7014_p12 = pnand %p7012_p11, %p7009_p10 }
  0xc4   :  { %7017 = shalt.err (!%p7014_p12)
}
  0xc5   :  { %s7018_s10 = scalar_lea.vmem %s151_s9, 1024  ;;  %p7023_p0 = scmp.lt.s32.totalorder %s151_s9, %s151_s9 }
  0xc6   :  { %p7019_p13 = scmp.ne.s32.totalorder %s151_s9, %s7018_s10  ;;  %p7024_p1 = scmp.lt.s32.totalorder %s7018_s10, %s7018_s10 }
  0xc8   :  { %p7025_p2 = por %p7024_p1, %p7023_p0 }
  0xca   :  { %p7026_p3 = pnand %p7025_p2, %p7019_p13 }
  0xcc   :  { %7029 = shalt.err (!%p7026_p3)
}
  0xcd   :  { %s7707_s7 = smov 64   ;;  %s7030_s19 = scalar_lea.hbm %s7690_s13, 16 }
  0xce   :  { %156 = dma.hbm_to_vmem [thread:$0]  %s7689_s12, 1024, %s151_s9, [#allocation17], %s7707_s7, %s7707_s7, %s7069_s1  }
  0xcf   :  { %p7031_p4 = scmp.ne.s32.totalorder %s7690_s13, %s7030_s19  ;;  %p7034_p5 = scmp.lt.u32.totalorder %s7030_s19, %s7690_s13 }
  0xd1   :  { %p7036_p6 = pnand %p7034_p5, %p7031_p4 }
  0xd3   :  { %7039 = shalt.err (!%p7036_p6)
}
  0xd4   :  { %s7040_s21 = scalar_lea.vmem %s164_s28, 16  ;;  %s7044_s20 = scalar_lea.vmem %s164_s28, 32 }
  0xd5   :  { %p7041_p7 = scmp.ne.s32.totalorder %s164_s28, %s7040_s21  ;;  %p7045_p8 = scmp.lt.s32.totalorder %s164_s28, %s164_s28 }
  0xd6   :  { %p7046_p9 = scmp.lt.s32.totalorder %s7044_s20, %s7040_s21 }
  0xd8   :  { %p7047_p10 = por %p7046_p9, %p7045_p8 }
  0xda   :  { %p7048_p11 = pnand %p7047_p10, %p7041_p7 }
  0xdc   :  { %7051 = shalt.err (!%p7048_p11)
}
  0xdd   :  { %166 = dma.hbm_to_vmem [thread:$0]  %s7690_s13, 16, %s164_s28, [#allocation20]  }
  0xde   :  { %7052 = dma.done.wait [#allocation3], 65536  }
  0xdf   :  { %7053 = vsyncadd [#allocation3], 4294901760 }
  0xe0   :  { %7054 = dma.done.wait [#allocation5], 48  }
  0xe1   :  { %7055 = vsyncadd [#allocation5], 4294967248 }
  0xe2   :  { %7056 = dma.done.wait [#allocation8], 272  }
  0xe3   :  { %7057 = vsyncadd [#allocation8], 4294967024 }
  0xe4   :  { %7058 = dma.done.wait [#allocation11], 528  }
  0xe5   :  { %7059 = vsyncadd [#allocation11], 4294966768 }
  0xe6   :  { %7060 = dma.done.wait [#allocation14], 6144  }
  0xe7   :  { %7061 = vsyncadd [#allocation14], 4294961152 }
  0xe8   :  { %7062 = dma.done.wait [#allocation17], 1088  }
  0xe9   :  { %7063 = vsyncadd [#allocation17], 4294966208 }
  0xea   :  { %7064 = dma.done.wait [#allocation20], 16  }
  0xeb   :  { %7065 = vsyncadd [#allocation20], 4294967280  ;;  %v5885_v0 = vld [vmem:[#allocation2 + $0x4] ss:$8 sps:$4 sm:$0xff]   ;;  %v5889_v2 = vld [vmem:[#allocation2] ss:$8 sps:$4 sm:$0xff]  }
  0xec   :  { %v5887_v1 = vld [vmem:[#allocation2 + $0x704] ss:$8 sps:$4 sm:$0xff]   ;;  %3388 = vmatprep.subr.bf16.mxu1 %v5885_v0  ;;  %v5890_v3 = vld [vmem:[#allocation2 + $0x700] ss:$8 sps:$4 sm:$0xff]   ;;  %v5891_v4 = vld [vmem:[#allocation2 + $0x14] ss:$8 sps:$4 sm:$0xff]  }
  0xed   :  { %3689 = vmatprep.subr.bf16.mxu0 %v5887_v1  ;;  %3389 = vmatpush1.bf16.msra.mxu1 %v5889_v2  ;;  %v5893_v5 = vld [vmem:[#allocation2 + $0x714] ss:$8 sps:$4 sm:$0xff]   ;;  %v5895_v6 = vld [vmem:[#allocation2 + $0x10] ss:$8 sps:$4 sm:$0xff]   ;;  %v5897_v8 = vld [vmem:[#allocation2 + $0x24] ss:$8 sps:$4 sm:$0xff]  }
  0xee   :  { %3690 = vmatpush1.bf16.msra.mxu0 %v5890_v3  ;;  %3390 = vmatprep.subr.bf16.mxu1 %v5891_v4  ;;  %v5896_v7 = vld [vmem:[#allocation2 + $0x710] ss:$8 sps:$4 sm:$0xff]   ;;  %v5899_v9 = vld [vmem:[#allocation2 + $0x724] ss:$8 sps:$4 sm:$0xff]   ;;  %v5901_v10 = vld [vmem:[#allocation2 + $0x20] ss:$8 sps:$4 sm:$0xff]  }
  0xef   :  { %3691 = vmatprep.subr.bf16.mxu0 %v5893_v5  ;;  %v5902_v11 = vld [vmem:[#allocation2 + $0x720] ss:$8 sps:$4 sm:$0xff]   ;;  %v5903_v12 = vld [vmem:[#allocation2 + $0x34] ss:$8 sps:$4 sm:$0xff]   ;;  %v5907_v14 = vld [vmem:[#allocation2 + $0x30] ss:$8 sps:$4 sm:$0xff]  }
  0xf0   :  { %v5905_v13 = vld [vmem:[#allocation2 + $0x734] ss:$8 sps:$4 sm:$0xff]   ;;  %v5908_v15 = vld [vmem:[#allocation2 + $0x730] ss:$8 sps:$4 sm:$0xff]   ;;  %v5909_v16 = vld [vmem:[#allocation2 + $0x44] ss:$8 sps:$4 sm:$0xff]  }
  0xf1   :  { %3391 = vmatpush1.bf16.msra.mxu1 %v5895_v6  ;;  %v5911_v17 = vld [vmem:[#allocation2 + $0x744] ss:$8 sps:$4 sm:$0xff]   ;;  %v5913_v18 = vld [vmem:[#allocation2 + $0x40] ss:$8 sps:$4 sm:$0xff]   ;;  %v5915_v20 = vld [vmem:[#allocation2 + $0x54] ss:$8 sps:$4 sm:$0xff]  }
  0xf2   :  { %3692 = vmatpush1.bf16.msra.mxu0 %v5896_v7  ;;  %3392 = vmatprep.subr.bf16.mxu1 %v5897_v8  ;;  %v5914_v19 = vld [vmem:[#allocation2 + $0x740] ss:$8 sps:$4 sm:$0xff]   ;;  %v5917_v21 = vld [vmem:[#allocation2 + $0x754] ss:$8 sps:$4 sm:$0xff]   ;;  %v5919_v22 = vld [vmem:[#allocation2 + $0x50] ss:$8 sps:$4 sm:$0xff]  }
  0xf3   :  { %3693 = vmatprep.subr.bf16.mxu0 %v5899_v9  ;;  %v5920_v23 = vld [vmem:[#allocation2 + $0x750] ss:$8 sps:$4 sm:$0xff]   ;;  %v5921_v24 = vld [vmem:[#allocation2 + $0x64] ss:$8 sps:$4 sm:$0xff]   ;;  %v5925_v26 = vld [vmem:[#allocation2 + $0x60] ss:$8 sps:$4 sm:$0xff]  }
  0xf4   :  { %v5923_v25 = vld [vmem:[#allocation2 + $0x764] ss:$8 sps:$4 sm:$0xff]   ;;  %v5926_v27 = vld [vmem:[#allocation2 + $0x760] ss:$8 sps:$4 sm:$0xff]   ;;  %v5927_v28 = vld [vmem:[#allocation2 + $0x74] ss:$8 sps:$4 sm:$0xff]  }
  0xf5   :  { %3393 = vmatpush1.bf16.msra.mxu1 %v5901_v10  ;;  %v5929_v29 = vld [vmem:[#allocation2 + $0x774] ss:$8 sps:$4 sm:$0xff]   ;;  %v5931_v30 = vld [vmem:[#allocation2 + $0x70] ss:$8 sps:$4 sm:$0xff]   ;;  %v5933_v32 = vld [vmem:[#allocation2 + $0x84] ss:$8 sps:$4 sm:$0xff]  }
  0xf6   :  { %3694 = vmatpush1.bf16.msra.mxu0 %v5902_v11  ;;  %3394 = vmatprep.subr.bf16.mxu1 %v5903_v12  ;;  %v5932_v31 = vld [vmem:[#allocation2 + $0x770] ss:$8 sps:$4 sm:$0xff]   ;;  %v5935_v33 = vld [vmem:[#allocation2 + $0x784] ss:$8 sps:$4 sm:$0xff]   ;;  %v5937_v34 = vld [vmem:[#allocation2 + $0x80] ss:$8 sps:$4 sm:$0xff]  }
  0xf7   :  { %3695 = vmatprep.subr.bf16.mxu0 %v5905_v13  ;;  %v5938_v35 = vld [vmem:[#allocation2 + $0x780] ss:$8 sps:$4 sm:$0xff]   ;;  %v5939_v36 = vld [vmem:[#allocation2 + $0x94] ss:$8 sps:$4 sm:$0xff]   ;;  %v5943_v38 = vld [vmem:[#allocation2 + $0x90] ss:$8 sps:$4 sm:$0xff]  }
  0xf8   :  { %v5941_v37 = vld [vmem:[#allocation2 + $0x794] ss:$8 sps:$4 sm:$0xff]   ;;  %v5944_v39 = vld [vmem:[#allocation2 + $0x790] ss:$8 sps:$4 sm:$0xff]   ;;  %v5945_v40 = vld [vmem:[#allocation2 + $0xa4] ss:$8 sps:$4 sm:$0xff]  }
  0xf9   :  { %3395 = vmatpush1.bf16.msra.mxu1 %v5907_v14  ;;  %v5947_v41 = vld [vmem:[#allocation2 + $0x7a4] ss:$8 sps:$4 sm:$0xff]   ;;  %v5949_v42 = vld [vmem:[#allocation2 + $0xa0] ss:$8 sps:$4 sm:$0xff]   ;;  %v5951_v44 = vld [vmem:[#allocation2 + $0xb4] ss:$8 sps:$4 sm:$0xff]  }
  0xfa   :  { %3696 = vmatpush1.bf16.msra.mxu0 %v5908_v15  ;;  %3396 = vmatprep.subr.bf16.mxu1 %v5909_v16  ;;  %v5950_v43 = vld [vmem:[#allocation2 + $0x7a0] ss:$8 sps:$4 sm:$0xff]   ;;  %v5953_v45 = vld [vmem:[#allocation2 + $0x7b4] ss:$8 sps:$4 sm:$0xff]   ;;  %v5955_v46 = vld [vmem:[#allocation2 + $0xb0] ss:$8 sps:$4 sm:$0xff]  }
  0xfb   :  { %3697 = vmatprep.subr.bf16.mxu0 %v5911_v17  ;;  %v5956_v47 = vld [vmem:[#allocation2 + $0x7b0] ss:$8 sps:$4 sm:$0xff]   ;;  %s7708_s29 = sld [smem:[#allocation28_spill]]  ;;  %v5957_v50 = vld [vmem:[#allocation2 + $0xc4] ss:$8 sps:$4 sm:$0xff]   ;;  %vm7085_vm0 = vmmov 0  }
  0xfc   :  { %v5959_v51 = vld [vmem:[#allocation2 + $0x7c4] ss:$8 sps:$4 sm:$0xff]   ;;  %v5961_v56 = vld [vmem:[#allocation2 + $0xc0] ss:$8 sps:$4 sm:$0xff]   ;;  %v5963_v58 = vld [vmem:[#allocation2 + $0xd4] ss:$8 sps:$4 sm:$0xff]  }
  0xfd   :  { %3397 = vmatpush1.bf16.msra.mxu1 %v5913_v18  ;;  %v5962_v57 = vld [vmem:[#allocation2 + $0x7c0] ss:$8 sps:$4 sm:$0xff]   ;;  %v5965_v59 = vld [vmem:[#allocation2 + $0x7d4] ss:$8 sps:$4 sm:$0xff]   ;;  %v5967_v60 = vld [vmem:[#allocation2 + $0xd0] ss:$8 sps:$4 sm:$0xff]  }
  0xfe   :  { %3698 = vmatpush1.bf16.msra.mxu0 %v5914_v19  ;;  %3398 = vmatprep.subr.bf16.mxu1 %v5915_v20  ;;  %v5968_v61 = vld [vmem:[#allocation2 + $0x7d0] ss:$8 sps:$4 sm:$0xff]   ;;  %v5969_v62 = vld [vmem:[#allocation2 + $0xe4] ss:$8 sps:$4 sm:$0xff]   ;;  %v5973_v0 = vld [vmem:[#allocation2 + $0xe0] ss:$8 sps:$4 sm:$0xff]  }
  0xff   :  { %3699 = vmatprep.subr.bf16.mxu0 %v5917_v21  ;;  %v5971_v63 = vld [vmem:[#allocation2 + $0x7e4] ss:$8 sps:$4 sm:$0xff]   ;;  %v5974_v1 = vld [vmem:[#allocation2 + $0x7e0] ss:$8 sps:$4 sm:$0xff]   ;;  %v5975_v2 = vld [vmem:[#allocation2 + $0xf4] ss:$8 sps:$4 sm:$0xff]  }
 0x100   :  { %v5977_v3 = vld [vmem:[#allocation2 + $0x7f4] ss:$8 sps:$4 sm:$0xff]   ;;  %v5979_v4 = vld [vmem:[#allocation2 + $0xf0] ss:$8 sps:$4 sm:$0xff]   ;;  %v5983_v7 = vld [vmem:[#allocation2 + $0x104] ss:$8 sps:$4 sm:$0xff]  }
 0x101   :  { %3399 = vmatpush1.bf16.msra.mxu1 %v5919_v22  ;;  %v209_v48 = vld [vmem:[%s7708_s29 + $0x8] sm:$0xff]  ;;  %v223_v53 = vld [vmem:[%s7708_s29 + $0x78] sm:$0xff]  ;;  %v208_v6 = vld [vmem:[%s7708_s29] sm:$0xff]  ;;  %vm4284_vm1 = vcmask 261120   ;;  %vm4371_vm2 = vcmask 523264   ;;  %s7709_s8 = sld [smem:[#allocation31_spill]] }
 0x102   :  { %3700 = vmatpush1.bf16.msra.mxu0 %v5920_v23  ;;  %3400 = vmatprep.subr.bf16.mxu1 %v5921_v24  ;;  %v241_v49 = vld [vmem:[%s7708_s29 + $0x108] sm:$0xff]  ;;  %v255_v54 = vld [vmem:[%s7708_s29 + $0x178] sm:$0xff]  ;;  %v240_v8 = vld [vmem:[%s7708_s29 + $0x100] sm:$0xff] }
 0x103   :  { %3701 = vmatprep.subr.bf16.mxu0 %v5923_v25  ;;  %v273_v52 = vpack.c.bf16 %v241_v49, %v209_v48  ;;  %v287_v55 = vpack.c.bf16 %v255_v54, %v223_v53  ;;  %v5980_v5 = vld [vmem:[#allocation2 + $0x7f0] ss:$8 sps:$4 sm:$0xff]   ;;  %v5986_v11 = vld [vmem:[#allocation2 + $0x804] ss:$8 sps:$4 sm:$0xff]   ;;  %v5981_v12 = vld [vmem:[#allocation2 + $0x100] ss:$8 sps:$4 sm:$0xff]   ;;  %v272_v14 = vpack.c.bf16 %v240_v8, %v208_v6 }
 0x104   :  { %v222_v9 = vld [vmem:[%s7708_s29 + $0x70] sm:$0xff]  ;;  %v5984_v13 = vld [vmem:[#allocation2 + $0x800] ss:$8 sps:$4 sm:$0xff]   ;;  %v5995_v20 = vld [vmem:[#allocation2 + $0x124] ss:$8 sps:$4 sm:$0xff]  }
 0x105   :  { %3401 = vmatpush1.bf16.msra.mxu1 %v5925_v26  ;;  %3420 = vmatprep.mubr.bf16.mxu1 %v273_v52  ;;  %v254_v10 = vld [vmem:[%s7708_s29 + $0x170] sm:$0xff]  ;;  %v5998_v21 = vld [vmem:[#allocation2 + $0x824] ss:$8 sps:$4 sm:$0xff]   ;;  %v5993_v22 = vld [vmem:[#allocation2 + $0x120] ss:$8 sps:$4 sm:$0xff]  }
 0x106   :  { %3702 = vmatpush1.bf16.msra.mxu0 %v5926_v27  ;;  %3402 = vmatprep.subr.bf16.mxu1 %v5927_v28  ;;  %v286_v15 = vpack.c.bf16 %v254_v10, %v222_v9  ;;  %v5989_v16 = vld [vmem:[#allocation2 + $0x114] ss:$8 sps:$4 sm:$0xff]   ;;  %v5987_v18 = vld [vmem:[#allocation2 + $0x110] ss:$8 sps:$4 sm:$0xff]   ;;  %v5996_v23 = vld [vmem:[#allocation2 + $0x820] ss:$8 sps:$4 sm:$0xff]  }
 0x107   :  { %3703 = vmatprep.subr.bf16.mxu0 %v5929_v29  ;;  %3721 = vmatprep.mubr.bf16.mxu0 %v287_v55  ;;  %v5992_v17 = vld [vmem:[#allocation2 + $0x814] ss:$8 sps:$4 sm:$0xff]   ;;  %v5990_v19 = vld [vmem:[#allocation2 + $0x810] ss:$8 sps:$4 sm:$0xff]   ;;  %v6007_v28 = vld [vmem:[#allocation2 + $0x144] ss:$8 sps:$4 sm:$0xff]  }
 0x108   :  { %v6001_v24 = vld [vmem:[#allocation2 + $0x134] ss:$8 sps:$4 sm:$0xff]   ;;  %v5999_v26 = vld [vmem:[#allocation2 + $0x130] ss:$8 sps:$4 sm:$0xff]   ;;  %v6010_v29 = vld [vmem:[#allocation2 + $0x844] ss:$8 sps:$4 sm:$0xff]  }
 0x109   :  { %3403 = vmatpush1.bf16.msra.mxu1 %v5931_v30  ;;  %v6004_v25 = vld [vmem:[#allocation2 + $0x834] ss:$8 sps:$4 sm:$0xff]   ;;  %v6002_v27 = vld [vmem:[#allocation2 + $0x830] ss:$8 sps:$4 sm:$0xff]   ;;  %v6005_v30 = vld [vmem:[#allocation2 + $0x140] ss:$8 sps:$4 sm:$0xff]  }
 0x10a   :  { %3704 = vmatpush1.bf16.msra.mxu0 %v5932_v31  ;;  %3404 = vmatprep.subr.bf16.mxu1 %v5933_v32  ;;  %v6008_v31 = vld [vmem:[#allocation2 + $0x840] ss:$8 sps:$4 sm:$0xff]   ;;  %v6013_v32 = vld [vmem:[#allocation2 + $0x154] ss:$8 sps:$4 sm:$0xff]   ;;  %v6023_v48 = vld [vmem:[#allocation2 + $0x170] ss:$8 sps:$4 sm:$0xff]  }
 0x10b   :  { %3705 = vmatprep.subr.bf16.mxu0 %v5935_v33  ;;  %v6016_v33 = vld [vmem:[#allocation2 + $0x854] ss:$8 sps:$4 sm:$0xff]   ;;  %v6026_v49 = vld [vmem:[#allocation2 + $0x870] ss:$8 sps:$4 sm:$0xff]   ;;  %v6029_v52 = vld [vmem:[#allocation2 + $0x180] ss:$8 sps:$4 sm:$0xff]  }
 0x10c   :  { %v6032_v53 = vld [vmem:[#allocation2 + $0x880] ss:$8 sps:$4 sm:$0xff]   ;;  %v6037_v54 = vld [vmem:[#allocation2 + $0x194] ss:$8 sps:$4 sm:$0xff]   ;;  %v6059_v8 = vld [vmem:[#allocation2 + $0x1d0] ss:$8 sps:$4 sm:$0xff]  }
 0x10d   :  { %3405 = vmatpush1.bf16.msra.mxu1 %v5937_v34  ;;  %v6011_v34 = vld [vmem:[#allocation2 + $0x150] ss:$8 sps:$4 sm:$0xff]   ;;  %v6040_v55 = vld [vmem:[#allocation2 + $0x894] ss:$8 sps:$4 sm:$0xff]   ;;  %v6067_v10 = vld [vmem:[#allocation2 + $0x1e4] ss:$8 sps:$4 sm:$0xff]  }
 0x10e   :  { %3706 = vmatpush1.bf16.msra.mxu0 %v5938_v35  ;;  %3406 = vmatprep.subr.bf16.mxu1 %v5939_v36  ;;  %v6014_v35 = vld [vmem:[#allocation2 + $0x850] ss:$8 sps:$4 sm:$0xff]   ;;  %v6019_v36 = vld [vmem:[#allocation2 + $0x164] ss:$8 sps:$4 sm:$0xff]   ;;  %v6061_v6 = vld [vmem:[#allocation2 + $0x1d4] ss:$8 sps:$4 sm:$0xff]  }
 0x10f   :  { %3707 = vmatprep.subr.bf16.mxu0 %v5941_v37  ;;  %v6022_v37 = vld [vmem:[#allocation2 + $0x864] ss:$8 sps:$4 sm:$0xff]   ;;  %v6062_v9 = vld [vmem:[#allocation2 + $0x8d0] ss:$8 sps:$4 sm:$0xff]  }
 0x111   :  { %3407 = vmatpush1.bf16.msra.mxu1 %v5943_v38  ;;  %v6017_v38 = vld [vmem:[#allocation2 + $0x160] ss:$8 sps:$4 sm:$0xff]  }
 0x112   :  { %3708 = vmatpush1.bf16.msra.mxu0 %v5944_v39  ;;  %3408 = vmatprep.subr.bf16.mxu1 %v5945_v40  ;;  %v6020_v39 = vld [vmem:[#allocation2 + $0x860] ss:$8 sps:$4 sm:$0xff]   ;;  %v211_v40 = vld [vmem:[%s7708_s29 + $0x18] sm:$0xff] }
 0x113   :  { %3709 = vmatprep.subr.bf16.mxu0 %v5947_v41  ;;  %v243_v41 = vld [vmem:[%s7708_s29 + $0x118] sm:$0xff] }
 0x115   :  { %3409 = vmatpush1.bf16.msra.mxu1 %v5949_v42  ;;  %v6025_v42 = vld [vmem:[#allocation2 + $0x174] ss:$8 sps:$4 sm:$0xff]  }
 0x116   :  { %3710 = vmatpush1.bf16.msra.mxu0 %v5950_v43  ;;  %3410 = vmatprep.subr.bf16.mxu1 %v5951_v44  ;;  %v6028_v43 = vld [vmem:[#allocation2 + $0x874] ss:$8 sps:$4 sm:$0xff]   ;;  %v275_v44 = vpack.c.bf16 %v243_v41, %v211_v40  ;;  %v6092_v40 = vld [vmem:[#allocation2 + $0x920] ss:$8 sps:$4 sm:$0xff]  }
 0x117   :  { %3711 = vmatprep.subr.bf16.mxu0 %v5953_v45  ;;  %v225_v45 = vld [vmem:[%s7708_s29 + $0x88] sm:$0xff] }
 0x119   :  { %3411 = vmatpush1.bf16.msra.mxu1 %v5955_v46  ;;  %v257_v46 = vld [vmem:[%s7708_s29 + $0x188] sm:$0xff] }
 0x11a   :  { %3712 = vmatpush1.bf16.msra.mxu0 %v5956_v47  ;;  %3412 = vmatprep.subr.bf16.mxu1 %v5957_v50  ;;  %v289_v47 = vpack.c.bf16 %v257_v46, %v225_v45  ;;  %v6031_v50 = vld [vmem:[#allocation2 + $0x184] ss:$8 sps:$4 sm:$0xff]   ;;  %v6098_v45 = vld [vmem:[#allocation2 + $0x930] ss:$8 sps:$4 sm:$0xff]  }
 0x11b   :  { %3713 = vmatprep.subr.bf16.mxu0 %v5959_v51  ;;  %v6034_v51 = vld [vmem:[#allocation2 + $0x884] ss:$8 sps:$4 sm:$0xff]  }
 0x11c   :  { %v6103_v46 = vld [vmem:[#allocation2 + $0x244] ss:$8 sps:$4 sm:$0xff]  }
 0x11d   :  { %3413 = vmatpush1.bf16.msra.mxu1 %v5961_v56  ;;  %v6035_v56 = vld [vmem:[#allocation2 + $0x190] ss:$8 sps:$4 sm:$0xff]  }
 0x11e   :  { %3714 = vmatpush1.bf16.msra.mxu0 %v5962_v57  ;;  %3414 = vmatprep.subr.bf16.mxu1 %v5963_v58  ;;  %v6038_v57 = vld [vmem:[#allocation2 + $0x890] ss:$8 sps:$4 sm:$0xff]   ;;  %v6043_v58 = vld [vmem:[#allocation2 + $0x1a4] ss:$8 sps:$4 sm:$0xff]  }
 0x11f   :  { %3715 = vmatprep.subr.bf16.mxu0 %v5965_v59  ;;  %v6046_v59 = vld [vmem:[#allocation2 + $0x8a4] ss:$8 sps:$4 sm:$0xff]  }
 0x121   :  { %3415 = vmatpush1.bf16.msra.mxu1 %v5967_v60  ;;  %v6041_v60 = vld [vmem:[#allocation2 + $0x1a0] ss:$8 sps:$4 sm:$0xff]  }
 0x122   :  { %3716 = vmatpush1.bf16.msra.mxu0 %v5968_v61  ;;  %3416 = vmatprep.subr.bf16.mxu1 %v5969_v62  ;;  %v6044_v61 = vld [vmem:[#allocation2 + $0x8a0] ss:$8 sps:$4 sm:$0xff]   ;;  %v6049_v62 = vld [vmem:[#allocation2 + $0x1b4] ss:$8 sps:$4 sm:$0xff]  }
 0x123   :  { %3717 = vmatprep.subr.bf16.mxu0 %v5971_v63  ;;  %v6052_v63 = vld [vmem:[#allocation2 + $0x8b4] ss:$8 sps:$4 sm:$0xff]  }
 0x125   :  { %3417 = vmatpush1.bf16.msra.mxu1 %v5973_v0  ;;  %v6047_v0 = vld [vmem:[#allocation2 + $0x1b0] ss:$8 sps:$4 sm:$0xff]  }
 0x126   :  { %3718 = vmatpush1.bf16.msra.mxu0 %v5974_v1  ;;  %3418 = vmatprep.subr.bf16.mxu1 %v5975_v2  ;;  %v6050_v1 = vld [vmem:[#allocation2 + $0x8b0] ss:$8 sps:$4 sm:$0xff]   ;;  %v6055_v2 = vld [vmem:[#allocation2 + $0x1c4] ss:$8 sps:$4 sm:$0xff]  }
 0x127   :  { %3719 = vmatprep.subr.bf16.mxu0 %v5977_v3  ;;  %v6058_v3 = vld [vmem:[#allocation2 + $0x8c4] ss:$8 sps:$4 sm:$0xff]  }
 0x129   :  { %3419 = vmatpush1.bf16.msra.mxu1 %v5979_v4  ;;  %v6053_v4 = vld [vmem:[#allocation2 + $0x1c0] ss:$8 sps:$4 sm:$0xff]  }
 0x12a   :  { %3720 = vmatpush1.bf16.msra.mxu0 %v5980_v5  ;;  %3431 = vmatprep.subr.bf16.mxu1 %v5983_v7  ;;  %v6056_v5 = vld [vmem:[#allocation2 + $0x8c0] ss:$8 sps:$4 sm:$0xff]   ;;  %v6064_v7 = vld [vmem:[#allocation2 + $0x8d4] ss:$8 sps:$4 sm:$0xff]  }
 0x12b   :  { %3732 = vmatprep.subr.bf16.mxu0 %v5986_v11  ;;  %v6070_v11 = vld [vmem:[#allocation2 + $0x8e4] ss:$8 sps:$4 sm:$0xff]  }
 0x12c   :  { %3421 = vmatmul.mubr.bf16.vlgmr.msra.gmra.mrb[0].mxu1 %v272_v14  ;;  %v6073_v14 = vld [vmem:[#allocation2 + $0x1f4] ss:$8 sps:$4 sm:$0xff]  }
 0x12d   :  { %3722 = vmatmul.mubr.bf16.vlgmr.msra.gmra.mrb[0].mxu0 %v286_v15  ;;  %3432 = vmatpush1.bf16.msra.mxu1 %v5981_v12  ;;  %v6065_v12 = vld [vmem:[#allocation2 + $0x1e0] ss:$8 sps:$4 sm:$0xff]   ;;  %v6076_v15 = vld [vmem:[#allocation2 + $0x8f4] ss:$8 sps:$4 sm:$0xff]  }
 0x12e   :  { %3733 = vmatpush1.bf16.msra.mxu0 %v5984_v13  ;;  %3433 = vmatprep.subr.bf16.mxu1 %v5989_v16  ;;  %v6068_v13 = vld [vmem:[#allocation2 + $0x8e0] ss:$8 sps:$4 sm:$0xff]   ;;  %v6071_v16 = vld [vmem:[#allocation2 + $0x1f0] ss:$8 sps:$4 sm:$0xff]  }
 0x12f   :  { %3734 = vmatprep.subr.bf16.mxu0 %v5992_v17  ;;  %3463 = vmatprep.mubr.bf16.mxu1 %v275_v44  ;;  %v6074_v17 = vld [vmem:[#allocation2 + $0x8f0] ss:$8 sps:$4 sm:$0xff]  }
 0x130   :  { %3764 = vmatprep.mubr.bf16.mxu0 %v289_v47  ;;  %v6095_v44 = vld [vmem:[#allocation2 + $0x230] ss:$8 sps:$4 sm:$0xff]   ;;  %v6106_v47 = vld [vmem:[#allocation2 + $0x944] ss:$8 sps:$4 sm:$0xff]  }
 0x131   :  { %3434 = vmatpush1.bf16.msra.mxu1 %v5987_v18  ;;  %v210_v18 = vld [vmem:[%s7708_s29 + $0x10] sm:$0xff] }
 0x132   :  { %3735 = vmatpush1.bf16.msra.mxu0 %v5990_v19  ;;  %3435 = vmatprep.subr.bf16.mxu1 %v5995_v20  ;;  %v6079_v19 = vld [vmem:[#allocation2 + $0x204] ss:$8 sps:$4 sm:$0xff]   ;;  %v242_v20 = vld [vmem:[%s7708_s29 + $0x110] sm:$0xff] }
 0x133   :  { %3736 = vmatprep.subr.bf16.mxu0 %v5998_v21  ;;  %v224_v21 = vld [vmem:[%s7708_s29 + $0x80] sm:$0xff] }
 0x135   :  { %3436 = vmatpush1.bf16.msra.mxu1 %v5993_v22  ;;  %v256_v22 = vld [vmem:[%s7708_s29 + $0x180] sm:$0xff] }
 0x136   :  { %3737 = vmatpush1.bf16.msra.mxu0 %v5996_v23  ;;  %3437 = vmatprep.subr.bf16.mxu1 %v6001_v24  ;;  %v6082_v23 = vld [vmem:[#allocation2 + $0x904] ss:$8 sps:$4 sm:$0xff]   ;;  %v6077_v24 = vld [vmem:[#allocation2 + $0x200] ss:$8 sps:$4 sm:$0xff]  }
 0x137   :  { %3738 = vmatprep.subr.bf16.mxu0 %v6004_v25  ;;  %v6080_v25 = vld [vmem:[#allocation2 + $0x900] ss:$8 sps:$4 sm:$0xff]  }
 0x139   :  { %3438 = vmatpush1.bf16.msra.mxu1 %v5999_v26  ;;  %v274_v26 = vpack.c.bf16 %v242_v20, %v210_v18  ;;  %v6157_v18 = vld [vmem:[#allocation2 + $0x2d4] ss:$8 sps:$4 sm:$0xff]   ;;  %v6155_v20 = vld [vmem:[#allocation2 + $0x2d0] ss:$8 sps:$4 sm:$0xff]  }
 0x13a   :  { %3739 = vmatpush1.bf16.msra.mxu0 %v6002_v27  ;;  %3439 = vmatprep.subr.bf16.mxu1 %v6007_v28  ;;  %v288_v27 = vpack.c.bf16 %v256_v22, %v224_v21  ;;  %v6085_v28 = vld [vmem:[#allocation2 + $0x214] ss:$8 sps:$4 sm:$0xff]   ;;  %v6158_v21 = vld [vmem:[#allocation2 + $0x9d0] ss:$8 sps:$4 sm:$0xff]   ;;  %v6163_v22 = vld [vmem:[#allocation2 + $0x2e4] ss:$8 sps:$4 sm:$0xff]  }
 0x13b   :  { %3740 = vmatprep.subr.bf16.mxu0 %v6010_v29  ;;  %v6088_v29 = vld [vmem:[#allocation2 + $0x914] ss:$8 sps:$4 sm:$0xff]  }
 0x13d   :  { %3440 = vmatpush1.bf16.msra.mxu1 %v6005_v30  ;;  %v6083_v30 = vld [vmem:[#allocation2 + $0x210] ss:$8 sps:$4 sm:$0xff]  }
 0x13e   :  { %3741 = vmatpush1.bf16.msra.mxu0 %v6008_v31  ;;  %3441 = vmatprep.subr.bf16.mxu1 %v6013_v32  ;;  %v6086_v31 = vld [vmem:[#allocation2 + $0x910] ss:$8 sps:$4 sm:$0xff]   ;;  %v6091_v32 = vld [vmem:[#allocation2 + $0x224] ss:$8 sps:$4 sm:$0xff]  }
 0x13f   :  { %3742 = vmatprep.subr.bf16.mxu0 %v6016_v33  ;;  %v6094_v33 = vld [vmem:[#allocation2 + $0x924] ss:$8 sps:$4 sm:$0xff]  }
 0x141   :  { %3442 = vmatpush1.bf16.msra.mxu1 %v6011_v34  ;;  %v213_v34 = vld [vmem:[%s7708_s29 + $0x28] sm:$0xff] }
 0x142   :  { %3743 = vmatpush1.bf16.msra.mxu0 %v6014_v35  ;;  %3443 = vmatprep.subr.bf16.mxu1 %v6019_v36  ;;  %v245_v35 = vld [vmem:[%s7708_s29 + $0x128] sm:$0xff] }
 0x143   :  { %3744 = vmatprep.subr.bf16.mxu0 %v6022_v37  ;;  %v277_v36 = vpack.c.bf16 %v245_v35, %v213_v34  ;;  %v6089_v37 = vld [vmem:[#allocation2 + $0x220] ss:$8 sps:$4 sm:$0xff]   ;;  %v258_v34 = vld [vmem:[%s7708_s29 + $0x190] sm:$0xff]  ;;  %v6178_v35 = vld [vmem:[#allocation2 + $0xa04] ss:$8 sps:$4 sm:$0xff]  }
 0x145   :  { %3444 = vmatpush1.bf16.msra.mxu1 %v6017_v38  ;;  %v227_v38 = vld [vmem:[%s7708_s29 + $0x98] sm:$0xff] }
 0x146   :  { %3745 = vmatpush1.bf16.msra.mxu0 %v6020_v39  ;;  %3445 = vmatprep.subr.bf16.mxu1 %v6025_v42  ;;  %v259_v39 = vld [vmem:[%s7708_s29 + $0x198] sm:$0xff] }
 0x147   :  { %3746 = vmatprep.subr.bf16.mxu0 %v6028_v43  ;;  %v291_v41 = vpack.c.bf16 %v259_v39, %v227_v38  ;;  %v6097_v42 = vld [vmem:[#allocation2 + $0x234] ss:$8 sps:$4 sm:$0xff]  }
 0x148   :  { %v6100_v43 = vld [vmem:[#allocation2 + $0x934] ss:$8 sps:$4 sm:$0xff]  }
 0x149   :  { %3446 = vmatpush1.bf16.msra.mxu1 %v6023_v48  ;;  %v6101_v48 = vld [vmem:[#allocation2 + $0x240] ss:$8 sps:$4 sm:$0xff]   ;;  %v215_v38 = vld [vmem:[%s7708_s29 + $0x38] sm:$0xff] }
 0x14a   :  { %3747 = vmatpush1.bf16.msra.mxu0 %v6026_v49  ;;  %3447 = vmatprep.subr.bf16.mxu1 %v6031_v50  ;;  %v6104_v49 = vld [vmem:[#allocation2 + $0x940] ss:$8 sps:$4 sm:$0xff]   ;;  %v6109_v50 = vld [vmem:[#allocation2 + $0x254] ss:$8 sps:$4 sm:$0xff]  }
 0x14b   :  { %3748 = vmatprep.subr.bf16.mxu0 %v6034_v51  ;;  %v6112_v51 = vld [vmem:[#allocation2 + $0x954] ss:$8 sps:$4 sm:$0xff]  }
 0x14c   :  { %v247_v39 = vld [vmem:[%s7708_s29 + $0x138] sm:$0xff] }
 0x14d   :  { %3448 = vmatpush1.bf16.msra.mxu1 %v6029_v52  ;;  %v6107_v52 = vld [vmem:[#allocation2 + $0x250] ss:$8 sps:$4 sm:$0xff]  }
 0x14e   :  { %3749 = vmatpush1.bf16.msra.mxu0 %v6032_v53  ;;  %3449 = vmatprep.subr.bf16.mxu1 %v6037_v54  ;;  %v6110_v53 = vld [vmem:[#allocation2 + $0x950] ss:$8 sps:$4 sm:$0xff]   ;;  %v6115_v54 = vld [vmem:[#allocation2 + $0x264] ss:$8 sps:$4 sm:$0xff]  }
 0x14f   :  { %3750 = vmatprep.subr.bf16.mxu0 %v6040_v55  ;;  %v6118_v55 = vld [vmem:[#allocation2 + $0x964] ss:$8 sps:$4 sm:$0xff]  }
 0x151   :  { %3450 = vmatpush1.bf16.msra.mxu1 %v6035_v56  ;;  %v6113_v56 = vld [vmem:[#allocation2 + $0x260] ss:$8 sps:$4 sm:$0xff]  }
 0x152   :  { %3751 = vmatpush1.bf16.msra.mxu0 %v6038_v57  ;;  %3451 = vmatprep.subr.bf16.mxu1 %v6043_v58  ;;  %v6116_v57 = vld [vmem:[#allocation2 + $0x960] ss:$8 sps:$4 sm:$0xff]   ;;  %v6121_v58 = vld [vmem:[#allocation2 + $0x274] ss:$8 sps:$4 sm:$0xff]  }
 0x153   :  { %3752 = vmatprep.subr.bf16.mxu0 %v6046_v59  ;;  %v6124_v59 = vld [vmem:[#allocation2 + $0x974] ss:$8 sps:$4 sm:$0xff]  }
 0x155   :  { %3452 = vmatpush1.bf16.msra.mxu1 %v6041_v60  ;;  %v6119_v60 = vld [vmem:[#allocation2 + $0x270] ss:$8 sps:$4 sm:$0xff]  }
 0x156   :  { %3753 = vmatpush1.bf16.msra.mxu0 %v6044_v61  ;;  %3453 = vmatprep.subr.bf16.mxu1 %v6049_v62  ;;  %v6122_v61 = vld [vmem:[#allocation2 + $0x970] ss:$8 sps:$4 sm:$0xff]   ;;  %v6127_v62 = vld [vmem:[#allocation2 + $0x284] ss:$8 sps:$4 sm:$0xff]  }
 0x157   :  { %3754 = vmatprep.subr.bf16.mxu0 %v6052_v63  ;;  %v6130_v63 = vld [vmem:[#allocation2 + $0x984] ss:$8 sps:$4 sm:$0xff]  }
 0x159   :  { %3454 = vmatpush1.bf16.msra.mxu1 %v6047_v0  ;;  %v6125_v0 = vld [vmem:[#allocation2 + $0x280] ss:$8 sps:$4 sm:$0xff]  }
 0x15a   :  { %3755 = vmatpush1.bf16.msra.mxu0 %v6050_v1  ;;  %3455 = vmatprep.subr.bf16.mxu1 %v6055_v2  ;;  %v6128_v1 = vld [vmem:[#allocation2 + $0x980] ss:$8 sps:$4 sm:$0xff]   ;;  %v6133_v2 = vld [vmem:[#allocation2 + $0x294] ss:$8 sps:$4 sm:$0xff]  }
 0x15b   :  { %3756 = vmatprep.subr.bf16.mxu0 %v6058_v3  ;;  %v6136_v3 = vld [vmem:[#allocation2 + $0x994] ss:$8 sps:$4 sm:$0xff]  }
 0x15d   :  { %3456 = vmatpush1.bf16.msra.mxu1 %v6053_v4  ;;  %v6131_v4 = vld [vmem:[#allocation2 + $0x290] ss:$8 sps:$4 sm:$0xff]  }
 0x15e   :  { %3757 = vmatpush1.bf16.msra.mxu0 %v6056_v5  ;;  %3457 = vmatprep.subr.bf16.mxu1 %v6061_v6  ;;  %v6134_v5 = vld [vmem:[#allocation2 + $0x990] ss:$8 sps:$4 sm:$0xff]   ;;  %v6139_v6 = vld [vmem:[#allocation2 + $0x2a4] ss:$8 sps:$4 sm:$0xff]  }
 0x15f   :  { %3758 = vmatprep.subr.bf16.mxu0 %v6064_v7  ;;  %v6142_v7 = vld [vmem:[#allocation2 + $0x9a4] ss:$8 sps:$4 sm:$0xff]  }
 0x161   :  { %3458 = vmatpush1.bf16.msra.mxu1 %v6059_v8  ;;  %v6137_v8 = vld [vmem:[#allocation2 + $0x2a0] ss:$8 sps:$4 sm:$0xff]  }
 0x162   :  { %3759 = vmatpush1.bf16.msra.mxu0 %v6062_v9  ;;  %3459 = vmatprep.subr.bf16.mxu1 %v6067_v10  ;;  %v6140_v9 = vld [vmem:[#allocation2 + $0x9a0] ss:$8 sps:$4 sm:$0xff]   ;;  %v6145_v10 = vld [vmem:[#allocation2 + $0x2b4] ss:$8 sps:$4 sm:$0xff]  }
 0x163   :  { %3760 = vmatprep.subr.bf16.mxu0 %v6070_v11  ;;  %v6148_v11 = vld [vmem:[#allocation2 + $0x9b4] ss:$8 sps:$4 sm:$0xff]  }
 0x165   :  { %3460 = vmatpush1.bf16.msra.mxu1 %v6065_v12  ;;  %v6143_v12 = vld [vmem:[#allocation2 + $0x2b0] ss:$8 sps:$4 sm:$0xff]  }
 0x166   :  { %3761 = vmatpush1.bf16.msra.mxu0 %v6068_v13  ;;  %3461 = vmatprep.subr.bf16.mxu1 %v6073_v14  ;;  %v6146_v13 = vld [vmem:[#allocation2 + $0x9b0] ss:$8 sps:$4 sm:$0xff]   ;;  %v6151_v14 = vld [vmem:[#allocation2 + $0x2c4] ss:$8 sps:$4 sm:$0xff]  }
 0x167   :  { %3762 = vmatprep.subr.bf16.mxu0 %v6076_v15  ;;  %v6154_v15 = vld [vmem:[#allocation2 + $0x9c4] ss:$8 sps:$4 sm:$0xff]  }
 0x169   :  { %3462 = vmatpush1.bf16.msra.mxu1 %v6071_v16  ;;  %v6149_v16 = vld [vmem:[#allocation2 + $0x2c0] ss:$8 sps:$4 sm:$0xff]  }
 0x16a   :  { %3763 = vmatpush1.bf16.msra.mxu0 %v6074_v17  ;;  %3474 = vmatprep.subr.bf16.mxu1 %v6079_v19  ;;  %v6152_v17 = vld [vmem:[#allocation2 + $0x9c0] ss:$8 sps:$4 sm:$0xff]   ;;  %v6160_v19 = vld [vmem:[#allocation2 + $0x9d4] ss:$8 sps:$4 sm:$0xff]  }
 0x16b   :  { %3775 = vmatprep.subr.bf16.mxu0 %v6082_v23  ;;  %v6166_v23 = vld [vmem:[#allocation2 + $0x9e4] ss:$8 sps:$4 sm:$0xff]  }
 0x16c   :  { %3464 = vmatmul.mubr.bf16.vlgmr.msra.gmra.mrb[0].mxu1 %v274_v26  ;;  %v6169_v26 = vld [vmem:[#allocation2 + $0x2f4] ss:$8 sps:$4 sm:$0xff]  }
 0x16d   :  { %3765 = vmatmul.mubr.bf16.vlgmr.msra.gmra.mrb[0].mxu0 %v288_v27  ;;  %3475 = vmatpush1.bf16.msra.mxu1 %v6077_v24  ;;  %v6161_v24 = vld [vmem:[#allocation2 + $0x2e0] ss:$8 sps:$4 sm:$0xff]   ;;  %v6172_v27 = vld [vmem:[#allocation2 + $0x9f4] ss:$8 sps:$4 sm:$0xff]  }
 0x16e   :  { %3776 = vmatpush1.bf16.msra.mxu0 %v6080_v25  ;;  %3476 = vmatprep.subr.bf16.mxu1 %v6085_v28  ;;  %v6164_v25 = vld [vmem:[#allocation2 + $0x9e0] ss:$8 sps:$4 sm:$0xff]   ;;  %v6167_v28 = vld [vmem:[#allocation2 + $0x2f0] ss:$8 sps:$4 sm:$0xff]  }
 0x16f   :  { %3777 = vmatprep.subr.bf16.mxu0 %v6088_v29  ;;  %3506 = vmatprep.mubr.bf16.mxu1 %v277_v36  ;;  %v6170_v29 = vld [vmem:[#allocation2 + $0x9f0] ss:$8 sps:$4 sm:$0xff]   ;;  %v6173_v36 = vld [vmem:[#allocation2 + $0x300] ss:$8 sps:$4 sm:$0xff]  }
 0x170   :  { %3807 = vmatprep.mubr.bf16.mxu0 %v291_v41 }
 0x171   :  { %3477 = vmatpush1.bf16.msra.mxu1 %v6083_v30  ;;  %v212_v30 = vld [vmem:[%s7708_s29 + $0x20] sm:$0xff] }
 0x172   :  { %3778 = vmatpush1.bf16.msra.mxu0 %v6086_v31  ;;  %3478 = vmatprep.subr.bf16.mxu1 %v6091_v32  ;;  %v6175_v31 = vld [vmem:[#allocation2 + $0x304] ss:$8 sps:$4 sm:$0xff]  }
 0x173   :  { %3779 = vmatprep.subr.bf16.mxu0 %v6094_v33  ;;  %v244_v32 = vld [vmem:[%s7708_s29 + $0x120] sm:$0xff]  ;;  %v226_v33 = vld [vmem:[%s7708_s29 + $0x90] sm:$0xff] }
 0x174   :  { %v290_v41 = vpack.c.bf16 %v258_v34, %v226_v33  ;;  %v6254_v33 = vld [vmem:[#allocation2 + $0xad0] ss:$8 sps:$4 sm:$0xff]   ;;  %v6259_v34 = vld [vmem:[#allocation2 + $0x3e4] ss:$8 sps:$4 sm:$0xff]  }
 0x175   :  { %3479 = vmatpush1.bf16.msra.mxu1 %v6089_v37  ;;  %v6176_v37 = vld [vmem:[#allocation2 + $0xa00] ss:$8 sps:$4 sm:$0xff]  }
 0x176   :  { %3780 = vmatpush1.bf16.msra.mxu0 %v6092_v40  ;;  %3480 = vmatprep.subr.bf16.mxu1 %v6097_v42  ;;  %v276_v40 = vpack.c.bf16 %v244_v32, %v212_v30  ;;  %v229_v42 = vld [vmem:[%s7708_s29 + $0xa8] sm:$0xff]  ;;  %v6253_v30 = vld [vmem:[#allocation2 + $0x3d4] ss:$8 sps:$4 sm:$0xff]   ;;  %v6251_v32 = vld [vmem:[#allocation2 + $0x3d0] ss:$8 sps:$4 sm:$0xff]  }
 0x177   :  { %3781 = vmatprep.subr.bf16.mxu0 %v6100_v43  ;;  %v261_v43 = vld [vmem:[%s7708_s29 + $0x1a8] sm:$0xff] }
 0x179   :  { %3481 = vmatpush1.bf16.msra.mxu1 %v6095_v44  ;;  %v6181_v44 = vld [vmem:[#allocation2 + $0x314] ss:$8 sps:$4 sm:$0xff]  }
 0x17a   :  { %3782 = vmatpush1.bf16.msra.mxu0 %v6098_v45  ;;  %3482 = vmatprep.subr.bf16.mxu1 %v6103_v46  ;;  %v6184_v45 = vld [vmem:[#allocation2 + $0xa14] ss:$8 sps:$4 sm:$0xff]   ;;  %v279_v46 = vpack.c.bf16 %v247_v39, %v215_v38 }
 0x17b   :  { %3783 = vmatprep.subr.bf16.mxu0 %v6106_v47  ;;  %v293_v47 = vpack.c.bf16 %v261_v43, %v229_v42  ;;  %v6265_v38 = vld [vmem:[#allocation2 + $0x3f4] ss:$8 sps:$4 sm:$0xff]   ;;  %v6271_v43 = vld [vmem:[#allocation2 + $0x404] ss:$8 sps:$4 sm:$0xff]  }
 0x17c   :  { %v6268_v39 = vld [vmem:[#allocation2 + $0xaf4] ss:$8 sps:$4 sm:$0xff]  }
 0x17d   :  { %3483 = vmatpush1.bf16.msra.mxu1 %v6101_v48  ;;  %v6179_v48 = vld [vmem:[#allocation2 + $0x310] ss:$8 sps:$4 sm:$0xff]  }
 0x17e   :  { %3784 = vmatpush1.bf16.msra.mxu0 %v6104_v49  ;;  %3484 = vmatprep.subr.bf16.mxu1 %v6109_v50  ;;  %v6182_v49 = vld [vmem:[#allocation2 + $0xa10] ss:$8 sps:$4 sm:$0xff]   ;;  %v6187_v50 = vld [vmem:[#allocation2 + $0x324] ss:$8 sps:$4 sm:$0xff]  }
 0x17f   :  { %3785 = vmatprep.subr.bf16.mxu0 %v6112_v51  ;;  %v6190_v51 = vld [vmem:[#allocation2 + $0xa24] ss:$8 sps:$4 sm:$0xff]   ;;  %v214_v42 = vld [vmem:[%s7708_s29 + $0x30] sm:$0xff] }
 0x181   :  { %3485 = vmatpush1.bf16.msra.mxu1 %v6107_v52  ;;  %v6185_v52 = vld [vmem:[#allocation2 + $0x320] ss:$8 sps:$4 sm:$0xff]  }
 0x182   :  { %3786 = vmatpush1.bf16.msra.mxu0 %v6110_v53  ;;  %3486 = vmatprep.subr.bf16.mxu1 %v6115_v54  ;;  %v6188_v53 = vld [vmem:[#allocation2 + $0xa20] ss:$8 sps:$4 sm:$0xff]   ;;  %v6193_v54 = vld [vmem:[#allocation2 + $0x334] ss:$8 sps:$4 sm:$0xff]  }
 0x183   :  { %3787 = vmatprep.subr.bf16.mxu0 %v6118_v55  ;;  %v6196_v55 = vld [vmem:[#allocation2 + $0xa34] ss:$8 sps:$4 sm:$0xff]  }
 0x185   :  { %3487 = vmatpush1.bf16.msra.mxu1 %v6113_v56  ;;  %v6191_v56 = vld [vmem:[#allocation2 + $0x330] ss:$8 sps:$4 sm:$0xff]  }
 0x186   :  { %3788 = vmatpush1.bf16.msra.mxu0 %v6116_v57  ;;  %3488 = vmatprep.subr.bf16.mxu1 %v6121_v58  ;;  %v6194_v57 = vld [vmem:[#allocation2 + $0xa30] ss:$8 sps:$4 sm:$0xff]   ;;  %v6199_v58 = vld [vmem:[#allocation2 + $0x344] ss:$8 sps:$4 sm:$0xff]  }
 0x187   :  { %3789 = vmatprep.subr.bf16.mxu0 %v6124_v59  ;;  %v6202_v59 = vld [vmem:[#allocation2 + $0xa44] ss:$8 sps:$4 sm:$0xff]  }
 0x189   :  { %3489 = vmatpush1.bf16.msra.mxu1 %v6119_v60  ;;  %v6197_v60 = vld [vmem:[#allocation2 + $0x340] ss:$8 sps:$4 sm:$0xff]  }
 0x18a   :  { %3790 = vmatpush1.bf16.msra.mxu0 %v6122_v61  ;;  %3490 = vmatprep.subr.bf16.mxu1 %v6127_v62  ;;  %v6200_v61 = vld [vmem:[#allocation2 + $0xa40] ss:$8 sps:$4 sm:$0xff]   ;;  %v6205_v62 = vld [vmem:[#allocation2 + $0x354] ss:$8 sps:$4 sm:$0xff]  }
 0x18b   :  { %3791 = vmatprep.subr.bf16.mxu0 %v6130_v63  ;;  %v6208_v63 = vld [vmem:[#allocation2 + $0xa54] ss:$8 sps:$4 sm:$0xff]  }
 0x18d   :  { %3491 = vmatpush1.bf16.msra.mxu1 %v6125_v0  ;;  %v6203_v0 = vld [vmem:[#allocation2 + $0x350] ss:$8 sps:$4 sm:$0xff]  }
 0x18e   :  { %3792 = vmatpush1.bf16.msra.mxu0 %v6128_v1  ;;  %3492 = vmatprep.subr.bf16.mxu1 %v6133_v2  ;;  %v6206_v1 = vld [vmem:[#allocation2 + $0xa50] ss:$8 sps:$4 sm:$0xff]   ;;  %v6211_v2 = vld [vmem:[#allocation2 + $0x364] ss:$8 sps:$4 sm:$0xff]  }
 0x18f   :  { %3793 = vmatprep.subr.bf16.mxu0 %v6136_v3  ;;  %v6214_v3 = vld [vmem:[#allocation2 + $0xa64] ss:$8 sps:$4 sm:$0xff]  }
 0x191   :  { %3493 = vmatpush1.bf16.msra.mxu1 %v6131_v4  ;;  %v6209_v4 = vld [vmem:[#allocation2 + $0x360] ss:$8 sps:$4 sm:$0xff]  }
 0x192   :  { %3794 = vmatpush1.bf16.msra.mxu0 %v6134_v5  ;;  %3494 = vmatprep.subr.bf16.mxu1 %v6139_v6  ;;  %v6212_v5 = vld [vmem:[#allocation2 + $0xa60] ss:$8 sps:$4 sm:$0xff]   ;;  %v6217_v6 = vld [vmem:[#allocation2 + $0x374] ss:$8 sps:$4 sm:$0xff]  }
 0x193   :  { %3795 = vmatprep.subr.bf16.mxu0 %v6142_v7  ;;  %v6220_v7 = vld [vmem:[#allocation2 + $0xa74] ss:$8 sps:$4 sm:$0xff]  }
 0x195   :  { %3495 = vmatpush1.bf16.msra.mxu1 %v6137_v8  ;;  %v6215_v8 = vld [vmem:[#allocation2 + $0x370] ss:$8 sps:$4 sm:$0xff]  }
 0x196   :  { %3796 = vmatpush1.bf16.msra.mxu0 %v6140_v9  ;;  %3496 = vmatprep.subr.bf16.mxu1 %v6145_v10  ;;  %v6218_v9 = vld [vmem:[#allocation2 + $0xa70] ss:$8 sps:$4 sm:$0xff]   ;;  %v6223_v10 = vld [vmem:[#allocation2 + $0x384] ss:$8 sps:$4 sm:$0xff]  }
 0x197   :  { %3797 = vmatprep.subr.bf16.mxu0 %v6148_v11  ;;  %v6226_v11 = vld [vmem:[#allocation2 + $0xa84] ss:$8 sps:$4 sm:$0xff]  }
 0x199   :  { %3497 = vmatpush1.bf16.msra.mxu1 %v6143_v12  ;;  %v6221_v12 = vld [vmem:[#allocation2 + $0x380] ss:$8 sps:$4 sm:$0xff]  }
 0x19a   :  { %3798 = vmatpush1.bf16.msra.mxu0 %v6146_v13  ;;  %3498 = vmatprep.subr.bf16.mxu1 %v6151_v14  ;;  %v6224_v13 = vld [vmem:[#allocation2 + $0xa80] ss:$8 sps:$4 sm:$0xff]   ;;  %v6229_v14 = vld [vmem:[#allocation2 + $0x394] ss:$8 sps:$4 sm:$0xff]  }
 0x19b   :  { %3799 = vmatprep.subr.bf16.mxu0 %v6154_v15  ;;  %v6232_v15 = vld [vmem:[#allocation2 + $0xa94] ss:$8 sps:$4 sm:$0xff]  }
 0x19d   :  { %3499 = vmatpush1.bf16.msra.mxu1 %v6149_v16  ;;  %v6227_v16 = vld [vmem:[#allocation2 + $0x390] ss:$8 sps:$4 sm:$0xff]  }
 0x19e   :  { %3800 = vmatpush1.bf16.msra.mxu0 %v6152_v17  ;;  %3500 = vmatprep.subr.bf16.mxu1 %v6157_v18  ;;  %v6230_v17 = vld [vmem:[#allocation2 + $0xa90] ss:$8 sps:$4 sm:$0xff]   ;;  %v6235_v18 = vld [vmem:[#allocation2 + $0x3a4] ss:$8 sps:$4 sm:$0xff]  }
 0x19f   :  { %3801 = vmatprep.subr.bf16.mxu0 %v6160_v19  ;;  %v6238_v19 = vld [vmem:[#allocation2 + $0xaa4] ss:$8 sps:$4 sm:$0xff]  }
 0x1a1   :  { %3501 = vmatpush1.bf16.msra.mxu1 %v6155_v20  ;;  %v6233_v20 = vld [vmem:[#allocation2 + $0x3a0] ss:$8 sps:$4 sm:$0xff]  }
 0x1a2   :  { %3802 = vmatpush1.bf16.msra.mxu0 %v6158_v21  ;;  %3502 = vmatprep.subr.bf16.mxu1 %v6163_v22  ;;  %v6236_v21 = vld [vmem:[#allocation2 + $0xaa0] ss:$8 sps:$4 sm:$0xff]   ;;  %v6241_v22 = vld [vmem:[#allocation2 + $0x3b4] ss:$8 sps:$4 sm:$0xff]  }
 0x1a3   :  { %3803 = vmatprep.subr.bf16.mxu0 %v6166_v23  ;;  %v6244_v23 = vld [vmem:[#allocation2 + $0xab4] ss:$8 sps:$4 sm:$0xff]  }
 0x1a5   :  { %3503 = vmatpush1.bf16.msra.mxu1 %v6161_v24  ;;  %v6239_v24 = vld [vmem:[#allocation2 + $0x3b0] ss:$8 sps:$4 sm:$0xff]  }
 0x1a6   :  { %3804 = vmatpush1.bf16.msra.mxu0 %v6164_v25  ;;  %3504 = vmatprep.subr.bf16.mxu1 %v6169_v26  ;;  %v6242_v25 = vld [vmem:[#allocation2 + $0xab0] ss:$8 sps:$4 sm:$0xff]   ;;  %v6247_v26 = vld [vmem:[#allocation2 + $0x3c4] ss:$8 sps:$4 sm:$0xff]  }
 0x1a7   :  { %3805 = vmatprep.subr.bf16.mxu0 %v6172_v27  ;;  %v6250_v27 = vld [vmem:[#allocation2 + $0xac4] ss:$8 sps:$4 sm:$0xff]  }
 0x1a9   :  { %3505 = vmatpush1.bf16.msra.mxu1 %v6167_v28  ;;  %v6245_v28 = vld [vmem:[#allocation2 + $0x3c0] ss:$8 sps:$4 sm:$0xff]  }
 0x1aa   :  { %3806 = vmatpush1.bf16.msra.mxu0 %v6170_v29  ;;  %3517 = vmatprep.subr.bf16.mxu1 %v6175_v31  ;;  %v6248_v29 = vld [vmem:[#allocation2 + $0xac0] ss:$8 sps:$4 sm:$0xff]   ;;  %v6256_v31 = vld [vmem:[#allocation2 + $0xad4] ss:$8 sps:$4 sm:$0xff]  }
 0x1ab   :  { %3818 = vmatprep.subr.bf16.mxu0 %v6178_v35  ;;  %v6262_v35 = vld [vmem:[#allocation2 + $0xae4] ss:$8 sps:$4 sm:$0xff]  }
 0x1ac   :  { %3507 = vmatmul.mubr.bf16.vlgmr.msra.gmra.mrb[0].mxu1 %v276_v40  ;;  %v6263_v40 = vld [vmem:[#allocation2 + $0x3f0] ss:$8 sps:$4 sm:$0xff]  }
 0x1ad   :  { %3808 = vmatmul.mubr.bf16.vlgmr.msra.gmra.mrb[0].mxu0 %v290_v41  ;;  %3518 = vmatpush1.bf16.msra.mxu1 %v6173_v36  ;;  %v6257_v36 = vld [vmem:[#allocation2 + $0x3e0] ss:$8 sps:$4 sm:$0xff]   ;;  %v6266_v41 = vld [vmem:[#allocation2 + $0xaf0] ss:$8 sps:$4 sm:$0xff]  }
 0x1ae   :  { %3819 = vmatpush1.bf16.msra.mxu0 %v6176_v37  ;;  %3519 = vmatprep.subr.bf16.mxu1 %v6181_v44  ;;  %v6260_v37 = vld [vmem:[#allocation2 + $0xae0] ss:$8 sps:$4 sm:$0xff]   ;;  %v246_v44 = vld [vmem:[%s7708_s29 + $0x130] sm:$0xff] }
 0x1af   :  { %3820 = vmatprep.subr.bf16.mxu0 %v6184_v45  ;;  %3549 = vmatprep.mubr.bf16.mxu1 %v279_v46  ;;  %v228_v45 = vld [vmem:[%s7708_s29 + $0xa0] sm:$0xff] }
 0x1b0   :  { %3850 = vmatprep.mubr.bf16.mxu0 %v293_v47  ;;  %v260_v46 = vld [vmem:[%s7708_s29 + $0x1a0] sm:$0xff] }
 0x1b1   :  { %3520 = vmatpush1.bf16.msra.mxu1 %v6179_v48  ;;  %v6274_v47 = vld [vmem:[#allocation2 + $0xb04] ss:$8 sps:$4 sm:$0xff]   ;;  %v6269_v48 = vld [vmem:[#allocation2 + $0x400] ss:$8 sps:$4 sm:$0xff]  }
 0x1b2   :  { %3821 = vmatpush1.bf16.msra.mxu0 %v6182_v49  ;;  %3521 = vmatprep.subr.bf16.mxu1 %v6187_v50  ;;  %v6272_v49 = vld [vmem:[#allocation2 + $0xb00] ss:$8 sps:$4 sm:$0xff]  }
 0x1b3   :  { %3822 = vmatprep.subr.bf16.mxu0 %v6190_v51  ;;  %v217_v50 = vld [vmem:[%s7708_s29 + $0x48] sm:$0xff] }
 0x1b4   :  { %v249_v51 = vld [vmem:[%s7708_s29 + $0x148] sm:$0xff] }
 0x1b5   :  { %3522 = vmatpush1.bf16.msra.mxu1 %v6185_v52  ;;  %v278_v52 = vpack.c.bf16 %v246_v44, %v214_v42  ;;  %v6349_v42 = vld [vmem:[#allocation2 + $0x4d4] ss:$8 sps:$4 sm:$0xff]   ;;  %v6347_v44 = vld [vmem:[#allocation2 + $0x4d0] ss:$8 sps:$4 sm:$0xff]  }
 0x1b6   :  { %3823 = vmatpush1.bf16.msra.mxu0 %v6188_v53  ;;  %3523 = vmatprep.subr.bf16.mxu1 %v6193_v54  ;;  %v292_v53 = vpack.c.bf16 %v260_v46, %v228_v45  ;;  %v231_v54 = vld [vmem:[%s7708_s29 + $0xb8] sm:$0xff]  ;;  %v6355_v46 = vld [vmem:[#allocation2 + $0x4e4] ss:$8 sps:$4 sm:$0xff]  }
 0x1b7   :  { %3824 = vmatprep.subr.bf16.mxu0 %v6196_v55  ;;  %v263_v55 = vld [vmem:[%s7708_s29 + $0x1b8] sm:$0xff] }
 0x1b8   :  { %v6350_v45 = vld [vmem:[#allocation2 + $0xbd0] ss:$8 sps:$4 sm:$0xff]  }
 0x1b9   :  { %3524 = vmatpush1.bf16.msra.mxu1 %v6191_v56  ;;  %v6277_v56 = vld [vmem:[#allocation2 + $0x414] ss:$8 sps:$4 sm:$0xff]  }
 0x1ba   :  { %3825 = vmatpush1.bf16.msra.mxu0 %v6194_v57  ;;  %3525 = vmatprep.subr.bf16.mxu1 %v6199_v58  ;;  %v6280_v57 = vld [vmem:[#allocation2 + $0xb14] ss:$8 sps:$4 sm:$0xff]   ;;  %v281_v58 = vpack.c.bf16 %v249_v51, %v217_v50 }
 0x1bb   :  { %3826 = vmatprep.subr.bf16.mxu0 %v6202_v59  ;;  %v295_v59 = vpack.c.bf16 %v263_v55, %v231_v54  ;;  %v6361_v50 = vld [vmem:[#allocation2 + $0x4f4] ss:$8 sps:$4 sm:$0xff]   ;;  %v216_v54 = vld [vmem:[%s7708_s29 + $0x40] sm:$0xff] }
 0x1bc   :  { %v6364_v51 = vld [vmem:[#allocation2 + $0xbf4] ss:$8 sps:$4 sm:$0xff]   ;;  %v248_v55 = vld [vmem:[%s7708_s29 + $0x140] sm:$0xff] }
 0x1bd   :  { %3526 = vmatpush1.bf16.msra.mxu1 %v6197_v60  ;;  %v6275_v60 = vld [vmem:[#allocation2 + $0x410] ss:$8 sps:$4 sm:$0xff]  }
 0x1be   :  { %3827 = vmatpush1.bf16.msra.mxu0 %v6200_v61  ;;  %3527 = vmatprep.subr.bf16.mxu1 %v6205_v62  ;;  %v6278_v61 = vld [vmem:[#allocation2 + $0xb10] ss:$8 sps:$4 sm:$0xff]   ;;  %v6283_v62 = vld [vmem:[#allocation2 + $0x424] ss:$8 sps:$4 sm:$0xff]  }
 0x1bf   :  { %3828 = vmatprep.subr.bf16.mxu0 %v6208_v63  ;;  %v6286_v63 = vld [vmem:[#allocation2 + $0xb24] ss:$8 sps:$4 sm:$0xff]  }
 0x1c1   :  { %3528 = vmatpush1.bf16.msra.mxu1 %v6203_v0  ;;  %v6281_v0 = vld [vmem:[#allocation2 + $0x420] ss:$8 sps:$4 sm:$0xff]  }
 0x1c2   :  { %3829 = vmatpush1.bf16.msra.mxu0 %v6206_v1  ;;  %3529 = vmatprep.subr.bf16.mxu1 %v6211_v2  ;;  %v6284_v1 = vld [vmem:[#allocation2 + $0xb20] ss:$8 sps:$4 sm:$0xff]   ;;  %v6289_v2 = vld [vmem:[#allocation2 + $0x434] ss:$8 sps:$4 sm:$0xff]  }
 0x1c3   :  { %3830 = vmatprep.subr.bf16.mxu0 %v6214_v3  ;;  %v6292_v3 = vld [vmem:[#allocation2 + $0xb34] ss:$8 sps:$4 sm:$0xff]  }
 0x1c5   :  { %3530 = vmatpush1.bf16.msra.mxu1 %v6209_v4  ;;  %v6287_v4 = vld [vmem:[#allocation2 + $0x430] ss:$8 sps:$4 sm:$0xff]  }
 0x1c6   :  { %3831 = vmatpush1.bf16.msra.mxu0 %v6212_v5  ;;  %3531 = vmatprep.subr.bf16.mxu1 %v6217_v6  ;;  %v6290_v5 = vld [vmem:[#allocation2 + $0xb30] ss:$8 sps:$4 sm:$0xff]   ;;  %v6295_v6 = vld [vmem:[#allocation2 + $0x444] ss:$8 sps:$4 sm:$0xff]  }
 0x1c7   :  { %3832 = vmatprep.subr.bf16.mxu0 %v6220_v7  ;;  %v6298_v7 = vld [vmem:[#allocation2 + $0xb44] ss:$8 sps:$4 sm:$0xff]  }
 0x1c9   :  { %3532 = vmatpush1.bf16.msra.mxu1 %v6215_v8  ;;  %v6293_v8 = vld [vmem:[#allocation2 + $0x440] ss:$8 sps:$4 sm:$0xff]  }
 0x1ca   :  { %3833 = vmatpush1.bf16.msra.mxu0 %v6218_v9  ;;  %3533 = vmatprep.subr.bf16.mxu1 %v6223_v10  ;;  %v6296_v9 = vld [vmem:[#allocation2 + $0xb40] ss:$8 sps:$4 sm:$0xff]   ;;  %v6301_v10 = vld [vmem:[#allocation2 + $0x454] ss:$8 sps:$4 sm:$0xff]  }
 0x1cb   :  { %3834 = vmatprep.subr.bf16.mxu0 %v6226_v11  ;;  %v6304_v11 = vld [vmem:[#allocation2 + $0xb54] ss:$8 sps:$4 sm:$0xff]  }
 0x1cd   :  { %3534 = vmatpush1.bf16.msra.mxu1 %v6221_v12  ;;  %v6299_v12 = vld [vmem:[#allocation2 + $0x450] ss:$8 sps:$4 sm:$0xff]  }
 0x1ce   :  { %3835 = vmatpush1.bf16.msra.mxu0 %v6224_v13  ;;  %3535 = vmatprep.subr.bf16.mxu1 %v6229_v14  ;;  %v6302_v13 = vld [vmem:[#allocation2 + $0xb50] ss:$8 sps:$4 sm:$0xff]   ;;  %v6307_v14 = vld [vmem:[#allocation2 + $0x464] ss:$8 sps:$4 sm:$0xff]  }
 0x1cf   :  { %3836 = vmatprep.subr.bf16.mxu0 %v6232_v15  ;;  %v6310_v15 = vld [vmem:[#allocation2 + $0xb64] ss:$8 sps:$4 sm:$0xff]  }
 0x1d1   :  { %3536 = vmatpush1.bf16.msra.mxu1 %v6227_v16  ;;  %v6305_v16 = vld [vmem:[#allocation2 + $0x460] ss:$8 sps:$4 sm:$0xff]  }
 0x1d2   :  { %3837 = vmatpush1.bf16.msra.mxu0 %v6230_v17  ;;  %3537 = vmatprep.subr.bf16.mxu1 %v6235_v18  ;;  %v6308_v17 = vld [vmem:[#allocation2 + $0xb60] ss:$8 sps:$4 sm:$0xff]   ;;  %v6313_v18 = vld [vmem:[#allocation2 + $0x474] ss:$8 sps:$4 sm:$0xff]  }
 0x1d3   :  { %3838 = vmatprep.subr.bf16.mxu0 %v6238_v19  ;;  %v6316_v19 = vld [vmem:[#allocation2 + $0xb74] ss:$8 sps:$4 sm:$0xff]  }
 0x1d5   :  { %3538 = vmatpush1.bf16.msra.mxu1 %v6233_v20  ;;  %v6311_v20 = vld [vmem:[#allocation2 + $0x470] ss:$8 sps:$4 sm:$0xff]  }
 0x1d6   :  { %3839 = vmatpush1.bf16.msra.mxu0 %v6236_v21  ;;  %3539 = vmatprep.subr.bf16.mxu1 %v6241_v22  ;;  %v6314_v21 = vld [vmem:[#allocation2 + $0xb70] ss:$8 sps:$4 sm:$0xff]   ;;  %v6319_v22 = vld [vmem:[#allocation2 + $0x484] ss:$8 sps:$4 sm:$0xff]  }
 0x1d7   :  { %3840 = vmatprep.subr.bf16.mxu0 %v6244_v23  ;;  %v6322_v23 = vld [vmem:[#allocation2 + $0xb84] ss:$8 sps:$4 sm:$0xff]  }
 0x1d9   :  { %3540 = vmatpush1.bf16.msra.mxu1 %v6239_v24  ;;  %v6317_v24 = vld [vmem:[#allocation2 + $0x480] ss:$8 sps:$4 sm:$0xff]  }
 0x1da   :  { %3841 = vmatpush1.bf16.msra.mxu0 %v6242_v25  ;;  %3541 = vmatprep.subr.bf16.mxu1 %v6247_v26  ;;  %v6320_v25 = vld [vmem:[#allocation2 + $0xb80] ss:$8 sps:$4 sm:$0xff]   ;;  %v6325_v26 = vld [vmem:[#allocation2 + $0x494] ss:$8 sps:$4 sm:$0xff]  }
 0x1db   :  { %3842 = vmatprep.subr.bf16.mxu0 %v6250_v27  ;;  %v6328_v27 = vld [vmem:[#allocation2 + $0xb94] ss:$8 sps:$4 sm:$0xff]  }
 0x1dd   :  { %3542 = vmatpush1.bf16.msra.mxu1 %v6245_v28  ;;  %v6323_v28 = vld [vmem:[#allocation2 + $0x490] ss:$8 sps:$4 sm:$0xff]  }
 0x1de   :  { %3843 = vmatpush1.bf16.msra.mxu0 %v6248_v29  ;;  %3543 = vmatprep.subr.bf16.mxu1 %v6253_v30  ;;  %v6326_v29 = vld [vmem:[#allocation2 + $0xb90] ss:$8 sps:$4 sm:$0xff]   ;;  %v6331_v30 = vld [vmem:[#allocation2 + $0x4a4] ss:$8 sps:$4 sm:$0xff]  }
 0x1df   :  { %3844 = vmatprep.subr.bf16.mxu0 %v6256_v31  ;;  %v6334_v31 = vld [vmem:[#allocation2 + $0xba4] ss:$8 sps:$4 sm:$0xff]  }
 0x1e1   :  { %3544 = vmatpush1.bf16.msra.mxu1 %v6251_v32  ;;  %v6329_v32 = vld [vmem:[#allocation2 + $0x4a0] ss:$8 sps:$4 sm:$0xff]  }
 0x1e2   :  { %3845 = vmatpush1.bf16.msra.mxu0 %v6254_v33  ;;  %3545 = vmatprep.subr.bf16.mxu1 %v6259_v34  ;;  %v6332_v33 = vld [vmem:[#allocation2 + $0xba0] ss:$8 sps:$4 sm:$0xff]   ;;  %v6337_v34 = vld [vmem:[#allocation2 + $0x4b4] ss:$8 sps:$4 sm:$0xff]  }
 0x1e3   :  { %3846 = vmatprep.subr.bf16.mxu0 %v6262_v35  ;;  %v6340_v35 = vld [vmem:[#allocation2 + $0xbb4] ss:$8 sps:$4 sm:$0xff]  }
 0x1e5   :  { %3546 = vmatpush1.bf16.msra.mxu1 %v6257_v36  ;;  %v6335_v36 = vld [vmem:[#allocation2 + $0x4b0] ss:$8 sps:$4 sm:$0xff]  }
 0x1e6   :  { %3847 = vmatpush1.bf16.msra.mxu0 %v6260_v37  ;;  %3547 = vmatprep.subr.bf16.mxu1 %v6265_v38  ;;  %v6338_v37 = vld [vmem:[#allocation2 + $0xbb0] ss:$8 sps:$4 sm:$0xff]   ;;  %v6343_v38 = vld [vmem:[#allocation2 + $0x4c4] ss:$8 sps:$4 sm:$0xff]  }
 0x1e7   :  { %3848 = vmatprep.subr.bf16.mxu0 %v6268_v39  ;;  %v6346_v39 = vld [vmem:[#allocation2 + $0xbc4] ss:$8 sps:$4 sm:$0xff]  }
 0x1e9   :  { %3548 = vmatpush1.bf16.msra.mxu1 %v6263_v40  ;;  %v6341_v40 = vld [vmem:[#allocation2 + $0x4c0] ss:$8 sps:$4 sm:$0xff]  }
 0x1ea   :  { %3849 = vmatpush1.bf16.msra.mxu0 %v6266_v41  ;;  %3560 = vmatprep.subr.bf16.mxu1 %v6271_v43  ;;  %v6344_v41 = vld [vmem:[#allocation2 + $0xbc0] ss:$8 sps:$4 sm:$0xff]   ;;  %v6352_v43 = vld [vmem:[#allocation2 + $0xbd4] ss:$8 sps:$4 sm:$0xff]  }
 0x1eb   :  { %3861 = vmatprep.subr.bf16.mxu0 %v6274_v47  ;;  %v6358_v47 = vld [vmem:[#allocation2 + $0xbe4] ss:$8 sps:$4 sm:$0xff]  }
 0x1ec   :  { %3550 = vmatmul.mubr.bf16.vlgmr.msra.gmra.mrb[0].mxu1 %v278_v52  ;;  %v6359_v52 = vld [vmem:[#allocation2 + $0x4f0] ss:$8 sps:$4 sm:$0xff]  }
 0x1ed   :  { %3851 = vmatmul.mubr.bf16.vlgmr.msra.gmra.mrb[0].mxu0 %v292_v53  ;;  %3561 = vmatpush1.bf16.msra.mxu1 %v6269_v48  ;;  %v6353_v48 = vld [vmem:[#allocation2 + $0x4e0] ss:$8 sps:$4 sm:$0xff]   ;;  %v6362_v53 = vld [vmem:[#allocation2 + $0xbf0] ss:$8 sps:$4 sm:$0xff]  }
 0x1ee   :  { %3862 = vmatpush1.bf16.msra.mxu0 %v6272_v49  ;;  %3562 = vmatprep.subr.bf16.mxu1 %v6277_v56  ;;  %v6356_v49 = vld [vmem:[#allocation2 + $0xbe0] ss:$8 sps:$4 sm:$0xff]   ;;  %v6367_v56 = vld [vmem:[#allocation2 + $0x504] ss:$8 sps:$4 sm:$0xff]  }
 0x1ef   :  { %3863 = vmatprep.subr.bf16.mxu0 %v6280_v57  ;;  %3592 = vmatprep.mubr.bf16.mxu1 %v281_v58  ;;  %v6370_v57 = vld [vmem:[#allocation2 + $0xc04] ss:$8 sps:$4 sm:$0xff]   ;;  %v230_v58 = vld [vmem:[%s7708_s29 + $0xb0] sm:$0xff] }
 0x1f0   :  { %3893 = vmatprep.mubr.bf16.mxu0 %v295_v59  ;;  %v262_v59 = vld [vmem:[%s7708_s29 + $0x1b0] sm:$0xff] }
 0x1f1   :  { %3563 = vmatpush1.bf16.msra.mxu1 %v6275_v60  ;;  %v219_v60 = vld [vmem:[%s7708_s29 + $0x58] sm:$0xff] }
 0x1f2   :  { %3864 = vmatpush1.bf16.msra.mxu0 %v6278_v61  ;;  %3564 = vmatprep.subr.bf16.mxu1 %v6283_v62  ;;  %v251_v61 = vld [vmem:[%s7708_s29 + $0x158] sm:$0xff]  ;;  %v280_v62 = vpack.c.bf16 %v248_v55, %v216_v54 }
 0x1f3   :  { %3865 = vmatprep.subr.bf16.mxu0 %v6286_v63  ;;  %v294_v63 = vpack.c.bf16 %v262_v59, %v230_v58  ;;  %v6445_v54 = vld [vmem:[#allocation2 + $0x5d4] ss:$8 sps:$4 sm:$0xff]   ;;  %v6451_v58 = vld [vmem:[#allocation2 + $0x5e4] ss:$8 sps:$4 sm:$0xff]  }
 0x1f4   :  { %v6448_v55 = vld [vmem:[#allocation2 + $0xcd4] ss:$8 sps:$4 sm:$0xff]   ;;  %v6454_v59 = vld [vmem:[#allocation2 + $0xce4] ss:$8 sps:$4 sm:$0xff]  }
 0x1f5   :  { %3565 = vmatpush1.bf16.msra.mxu1 %v6281_v0  ;;  %v233_v0 = vld [vmem:[%s7708_s29 + $0xc8] sm:$0xff] }
 0x1f6   :  { %3866 = vmatpush1.bf16.msra.mxu0 %v6284_v1  ;;  %3566 = vmatprep.subr.bf16.mxu1 %v6289_v2  ;;  %v265_v1 = vld [vmem:[%s7708_s29 + $0x1c8] sm:$0xff] }
 0x1f7   :  { %3867 = vmatprep.subr.bf16.mxu0 %v6292_v3  ;;  %v6365_v2 = vld [vmem:[#allocation2 + $0x500] ss:$8 sps:$4 sm:$0xff]  }
 0x1f8   :  { %v6368_v3 = vld [vmem:[#allocation2 + $0xc00] ss:$8 sps:$4 sm:$0xff]  }
 0x1f9   :  { %3567 = vmatpush1.bf16.msra.mxu1 %v6287_v4  ;;  %v6373_v4 = vld [vmem:[#allocation2 + $0x514] ss:$8 sps:$4 sm:$0xff]  }
 0x1fa   :  { %3868 = vmatpush1.bf16.msra.mxu0 %v6290_v5  ;;  %3568 = vmatprep.subr.bf16.mxu1 %v6295_v6  ;;  %v6376_v5 = vld [vmem:[#allocation2 + $0xc14] ss:$8 sps:$4 sm:$0xff]   ;;  %v6371_v6 = vld [vmem:[#allocation2 + $0x510] ss:$8 sps:$4 sm:$0xff]  }
 0x1fb   :  { %3869 = vmatprep.subr.bf16.mxu0 %v6298_v7  ;;  %v6374_v7 = vld [vmem:[#allocation2 + $0xc10] ss:$8 sps:$4 sm:$0xff]  }
 0x1fd   :  { %3569 = vmatpush1.bf16.msra.mxu1 %v6293_v8  ;;  %v283_v8 = vpack.c.bf16 %v251_v61, %v219_v60  ;;  %v6449_v60 = vld [vmem:[#allocation2 + $0x5e0] ss:$8 sps:$4 sm:$0xff]  }
 0x1fe   :  { %3870 = vmatpush1.bf16.msra.mxu0 %v6296_v9  ;;  %3570 = vmatprep.subr.bf16.mxu1 %v6301_v10  ;;  %v297_v9 = vpack.c.bf16 %v265_v1, %v233_v0  ;;  %v6379_v10 = vld [vmem:[#allocation2 + $0x524] ss:$8 sps:$4 sm:$0xff]   ;;  %v6452_v61 = vld [vmem:[#allocation2 + $0xce0] ss:$8 sps:$4 sm:$0xff]   ;;  %v6455_v0 = vld [vmem:[#allocation2 + $0x5f0] ss:$8 sps:$4 sm:$0xff]  }
 0x1ff   :  { %3871 = vmatprep.subr.bf16.mxu0 %v6304_v11  ;;  %v6382_v11 = vld [vmem:[#allocation2 + $0xc24] ss:$8 sps:$4 sm:$0xff]   ;;  %v6458_v1 = vld [vmem:[#allocation2 + $0xcf0] ss:$8 sps:$4 sm:$0xff]  }
 0x201   :  { %3571 = vmatpush1.bf16.msra.mxu1 %v6299_v12  ;;  %v6377_v12 = vld [vmem:[#allocation2 + $0x520] ss:$8 sps:$4 sm:$0xff]  }
 0x202   :  { %3872 = vmatpush1.bf16.msra.mxu0 %v6302_v13  ;;  %3572 = vmatprep.subr.bf16.mxu1 %v6307_v14  ;;  %v6380_v13 = vld [vmem:[#allocation2 + $0xc20] ss:$8 sps:$4 sm:$0xff]   ;;  %v6385_v14 = vld [vmem:[#allocation2 + $0x534] ss:$8 sps:$4 sm:$0xff]  }
 0x203   :  { %3873 = vmatprep.subr.bf16.mxu0 %v6310_v15  ;;  %v6388_v15 = vld [vmem:[#allocation2 + $0xc34] ss:$8 sps:$4 sm:$0xff]  }
 0x205   :  { %3573 = vmatpush1.bf16.msra.mxu1 %v6305_v16  ;;  %v6383_v16 = vld [vmem:[#allocation2 + $0x530] ss:$8 sps:$4 sm:$0xff]  }
 0x206   :  { %3874 = vmatpush1.bf16.msra.mxu0 %v6308_v17  ;;  %3574 = vmatprep.subr.bf16.mxu1 %v6313_v18  ;;  %v6386_v17 = vld [vmem:[#allocation2 + $0xc30] ss:$8 sps:$4 sm:$0xff]   ;;  %v6391_v18 = vld [vmem:[#allocation2 + $0x544] ss:$8 sps:$4 sm:$0xff]  }
 0x207   :  { %3875 = vmatprep.subr.bf16.mxu0 %v6316_v19  ;;  %v6394_v19 = vld [vmem:[#allocation2 + $0xc44] ss:$8 sps:$4 sm:$0xff]  }
 0x209   :  { %3575 = vmatpush1.bf16.msra.mxu1 %v6311_v20  ;;  %v6389_v20 = vld [vmem:[#allocation2 + $0x540] ss:$8 sps:$4 sm:$0xff]  }
 0x20a   :  { %3876 = vmatpush1.bf16.msra.mxu0 %v6314_v21  ;;  %3576 = vmatprep.subr.bf16.mxu1 %v6319_v22  ;;  %v6392_v21 = vld [vmem:[#allocation2 + $0xc40] ss:$8 sps:$4 sm:$0xff]   ;;  %v6397_v22 = vld [vmem:[#allocation2 + $0x554] ss:$8 sps:$4 sm:$0xff]  }
 0x20b   :  { %3877 = vmatprep.subr.bf16.mxu0 %v6322_v23  ;;  %v6400_v23 = vld [vmem:[#allocation2 + $0xc54] ss:$8 sps:$4 sm:$0xff]  }
 0x20d   :  { %3577 = vmatpush1.bf16.msra.mxu1 %v6317_v24  ;;  %v6395_v24 = vld [vmem:[#allocation2 + $0x550] ss:$8 sps:$4 sm:$0xff]  }
 0x20e   :  { %3878 = vmatpush1.bf16.msra.mxu0 %v6320_v25  ;;  %3578 = vmatprep.subr.bf16.mxu1 %v6325_v26  ;;  %v6398_v25 = vld [vmem:[#allocation2 + $0xc50] ss:$8 sps:$4 sm:$0xff]   ;;  %v6403_v26 = vld [vmem:[#allocation2 + $0x564] ss:$8 sps:$4 sm:$0xff]  }
 0x20f   :  { %3879 = vmatprep.subr.bf16.mxu0 %v6328_v27  ;;  %v6406_v27 = vld [vmem:[#allocation2 + $0xc64] ss:$8 sps:$4 sm:$0xff]  }
 0x211   :  { %3579 = vmatpush1.bf16.msra.mxu1 %v6323_v28  ;;  %v6401_v28 = vld [vmem:[#allocation2 + $0x560] ss:$8 sps:$4 sm:$0xff]  }
 0x212   :  { %3880 = vmatpush1.bf16.msra.mxu0 %v6326_v29  ;;  %3580 = vmatprep.subr.bf16.mxu1 %v6331_v30  ;;  %v6404_v29 = vld [vmem:[#allocation2 + $0xc60] ss:$8 sps:$4 sm:$0xff]   ;;  %v6409_v30 = vld [vmem:[#allocation2 + $0x574] ss:$8 sps:$4 sm:$0xff]  }
 0x213   :  { %3881 = vmatprep.subr.bf16.mxu0 %v6334_v31  ;;  %v6412_v31 = vld [vmem:[#allocation2 + $0xc74] ss:$8 sps:$4 sm:$0xff]  }
 0x215   :  { %3581 = vmatpush1.bf16.msra.mxu1 %v6329_v32  ;;  %v6407_v32 = vld [vmem:[#allocation2 + $0x570] ss:$8 sps:$4 sm:$0xff]  }
 0x216   :  { %3882 = vmatpush1.bf16.msra.mxu0 %v6332_v33  ;;  %3582 = vmatprep.subr.bf16.mxu1 %v6337_v34  ;;  %v6410_v33 = vld [vmem:[#allocation2 + $0xc70] ss:$8 sps:$4 sm:$0xff]   ;;  %v6415_v34 = vld [vmem:[#allocation2 + $0x584] ss:$8 sps:$4 sm:$0xff]  }
 0x217   :  { %3883 = vmatprep.subr.bf16.mxu0 %v6340_v35  ;;  %v6418_v35 = vld [vmem:[#allocation2 + $0xc84] ss:$8 sps:$4 sm:$0xff]  }
 0x219   :  { %3583 = vmatpush1.bf16.msra.mxu1 %v6335_v36  ;;  %v6413_v36 = vld [vmem:[#allocation2 + $0x580] ss:$8 sps:$4 sm:$0xff]  }
 0x21a   :  { %3884 = vmatpush1.bf16.msra.mxu0 %v6338_v37  ;;  %3584 = vmatprep.subr.bf16.mxu1 %v6343_v38  ;;  %v6416_v37 = vld [vmem:[#allocation2 + $0xc80] ss:$8 sps:$4 sm:$0xff]   ;;  %v6421_v38 = vld [vmem:[#allocation2 + $0x594] ss:$8 sps:$4 sm:$0xff]  }
 0x21b   :  { %3885 = vmatprep.subr.bf16.mxu0 %v6346_v39  ;;  %v6424_v39 = vld [vmem:[#allocation2 + $0xc94] ss:$8 sps:$4 sm:$0xff]  }
 0x21d   :  { %3585 = vmatpush1.bf16.msra.mxu1 %v6341_v40  ;;  %v6419_v40 = vld [vmem:[#allocation2 + $0x590] ss:$8 sps:$4 sm:$0xff]  }
 0x21e   :  { %3886 = vmatpush1.bf16.msra.mxu0 %v6344_v41  ;;  %3586 = vmatprep.subr.bf16.mxu1 %v6349_v42  ;;  %v6422_v41 = vld [vmem:[#allocation2 + $0xc90] ss:$8 sps:$4 sm:$0xff]   ;;  %v6427_v42 = vld [vmem:[#allocation2 + $0x5a4] ss:$8 sps:$4 sm:$0xff]  }
 0x21f   :  { %3887 = vmatprep.subr.bf16.mxu0 %v6352_v43  ;;  %v6430_v43 = vld [vmem:[#allocation2 + $0xca4] ss:$8 sps:$4 sm:$0xff]  }
 0x221   :  { %3587 = vmatpush1.bf16.msra.mxu1 %v6347_v44  ;;  %v6425_v44 = vld [vmem:[#allocation2 + $0x5a0] ss:$8 sps:$4 sm:$0xff]  }
 0x222   :  { %3888 = vmatpush1.bf16.msra.mxu0 %v6350_v45  ;;  %3588 = vmatprep.subr.bf16.mxu1 %v6355_v46  ;;  %v6428_v45 = vld [vmem:[#allocation2 + $0xca0] ss:$8 sps:$4 sm:$0xff]   ;;  %v6433_v46 = vld [vmem:[#allocation2 + $0x5b4] ss:$8 sps:$4 sm:$0xff]  }
 0x223   :  { %3889 = vmatprep.subr.bf16.mxu0 %v6358_v47  ;;  %v6436_v47 = vld [vmem:[#allocation2 + $0xcb4] ss:$8 sps:$4 sm:$0xff]  }
 0x225   :  { %3589 = vmatpush1.bf16.msra.mxu1 %v6353_v48  ;;  %v6431_v48 = vld [vmem:[#allocation2 + $0x5b0] ss:$8 sps:$4 sm:$0xff]  }
 0x226   :  { %3890 = vmatpush1.bf16.msra.mxu0 %v6356_v49  ;;  %3590 = vmatprep.subr.bf16.mxu1 %v6361_v50  ;;  %v6434_v49 = vld [vmem:[#allocation2 + $0xcb0] ss:$8 sps:$4 sm:$0xff]   ;;  %v6439_v50 = vld [vmem:[#allocation2 + $0x5c4] ss:$8 sps:$4 sm:$0xff]  }
 0x227   :  { %3891 = vmatprep.subr.bf16.mxu0 %v6364_v51  ;;  %v6442_v51 = vld [vmem:[#allocation2 + $0xcc4] ss:$8 sps:$4 sm:$0xff]  }
 0x229   :  { %3591 = vmatpush1.bf16.msra.mxu1 %v6359_v52  ;;  %v6437_v52 = vld [vmem:[#allocation2 + $0x5c0] ss:$8 sps:$4 sm:$0xff]  }
 0x22a   :  { %3892 = vmatpush1.bf16.msra.mxu0 %v6362_v53  ;;  %3603 = vmatprep.subr.bf16.mxu1 %v6367_v56  ;;  %v6440_v53 = vld [vmem:[#allocation2 + $0xcc0] ss:$8 sps:$4 sm:$0xff]   ;;  %v6443_v56 = vld [vmem:[#allocation2 + $0x5d0] ss:$8 sps:$4 sm:$0xff]  }
 0x22b   :  { %3904 = vmatprep.subr.bf16.mxu0 %v6370_v57  ;;  %v6446_v57 = vld [vmem:[#allocation2 + $0xcd0] ss:$8 sps:$4 sm:$0xff]  }
 0x22c   :  { %3593 = vmatmul.mubr.bf16.vlgmr.msra.gmra.mrb[0].mxu1 %v280_v62  ;;  %v6457_v62 = vld [vmem:[#allocation2 + $0x5f4] ss:$8 sps:$4 sm:$0xff]  }
 0x22d   :  { %3894 = vmatmul.mubr.bf16.vlgmr.msra.gmra.mrb[0].mxu0 %v294_v63  ;;  %3604 = vmatpush1.bf16.msra.mxu1 %v6365_v2  ;;  %v6460_v63 = vld [vmem:[#allocation2 + $0xcf4] ss:$8 sps:$4 sm:$0xff]  }
 0x22e   :  { %3905 = vmatpush1.bf16.msra.mxu0 %v6368_v3  ;;  %3605 = vmatprep.subr.bf16.mxu1 %v6373_v4  ;;  %v218_v2 = vld [vmem:[%s7708_s29 + $0x50] sm:$0xff]  ;;  %v6463_v4 = vld [vmem:[#allocation2 + $0x604] ss:$8 sps:$4 sm:$0xff]  }
 0x22f   :  { %3906 = vmatprep.subr.bf16.mxu0 %v6376_v5  ;;  %3635 = vmatprep.mubr.bf16.mxu1 %v283_v8  ;;  %v250_v3 = vld [vmem:[%s7708_s29 + $0x150] sm:$0xff]  ;;  %v6466_v5 = vld [vmem:[#allocation2 + $0xd04] ss:$8 sps:$4 sm:$0xff]  }
 0x230   :  { %3936 = vmatprep.mubr.bf16.mxu0 %v297_v9  ;;  %v221_v8 = vld [vmem:[%s7708_s29 + $0x68] sm:$0xff] }
 0x231   :  { %3606 = vmatpush1.bf16.msra.mxu1 %v6371_v6  ;;  %v232_v6 = vld [vmem:[%s7708_s29 + $0xc0] sm:$0xff]  ;;  %v253_v9 = vld [vmem:[%s7708_s29 + $0x168] sm:$0xff] }
 0x232   :  { %3907 = vmatpush1.bf16.msra.mxu0 %v6374_v7  ;;  %3607 = vmatprep.subr.bf16.mxu1 %v6379_v10  ;;  %v264_v7 = vld [vmem:[%s7708_s29 + $0x1c0] sm:$0xff]  ;;  %v235_v10 = vld [vmem:[%s7708_s29 + $0xd8] sm:$0xff] }
 0x233   :  { %3908 = vmatprep.subr.bf16.mxu0 %v6382_v11  ;;  %v267_v11 = vld [vmem:[%s7708_s29 + $0x1d8] sm:$0xff] }
 0x235   :  { %3608 = vmatpush1.bf16.msra.mxu1 %v6377_v12  ;;  %v282_v12 = vpack.c.bf16 %v250_v3, %v218_v2  ;;  %v6541_v2 = vld [vmem:[#allocation2 + $0x6d4] ss:$8 sps:$4 sm:$0xff]  }
 0x236   :  { %3909 = vmatpush1.bf16.msra.mxu0 %v6380_v13  ;;  %3609 = vmatprep.subr.bf16.mxu1 %v6385_v14  ;;  %v296_v13 = vpack.c.bf16 %v264_v7, %v232_v6  ;;  %v6461_v14 = vld [vmem:[#allocation2 + $0x600] ss:$8 sps:$4 sm:$0xff]   ;;  %v6544_v3 = vld [vmem:[#allocation2 + $0xdd4] ss:$8 sps:$4 sm:$0xff]   ;;  %v6547_v6 = vld [vmem:[#allocation2 + $0x6e4] ss:$8 sps:$4 sm:$0xff]  }
 0x237   :  { %3910 = vmatprep.subr.bf16.mxu0 %v6388_v15  ;;  %v6464_v15 = vld [vmem:[#allocation2 + $0xd00] ss:$8 sps:$4 sm:$0xff]   ;;  %v6550_v7 = vld [vmem:[#allocation2 + $0xde4] ss:$8 sps:$4 sm:$0xff]  }
 0x239   :  { %3610 = vmatpush1.bf16.msra.mxu1 %v6383_v16  ;;  %v6469_v16 = vld [vmem:[#allocation2 + $0x614] ss:$8 sps:$4 sm:$0xff]  }
 0x23a   :  { %3911 = vmatpush1.bf16.msra.mxu0 %v6386_v17  ;;  %3611 = vmatprep.subr.bf16.mxu1 %v6391_v18  ;;  %v6472_v17 = vld [vmem:[#allocation2 + $0xd14] ss:$8 sps:$4 sm:$0xff]   ;;  %v285_v18 = vpack.c.bf16 %v253_v9, %v221_v8  ;;  %v6545_v8 = vld [vmem:[#allocation2 + $0x6e0] ss:$8 sps:$4 sm:$0xff]  }
 0x23b   :  { %3912 = vmatprep.subr.bf16.mxu0 %v6394_v19  ;;  %v299_v19 = vpack.c.bf16 %v267_v11, %v235_v10  ;;  %v6548_v9 = vld [vmem:[#allocation2 + $0xde0] ss:$8 sps:$4 sm:$0xff]   ;;  %v6553_v10 = vld [vmem:[#allocation2 + $0x6f4] ss:$8 sps:$4 sm:$0xff]  }
 0x23c   :  { %v6556_v11 = vld [vmem:[#allocation2 + $0xdf4] ss:$8 sps:$4 sm:$0xff]  }
 0x23d   :  { %3612 = vmatpush1.bf16.msra.mxu1 %v6389_v20  ;;  %v6467_v20 = vld [vmem:[#allocation2 + $0x610] ss:$8 sps:$4 sm:$0xff]  }
 0x23e   :  { %3913 = vmatpush1.bf16.msra.mxu0 %v6392_v21  ;;  %3613 = vmatprep.subr.bf16.mxu1 %v6397_v22  ;;  %v6470_v21 = vld [vmem:[#allocation2 + $0xd10] ss:$8 sps:$4 sm:$0xff]   ;;  %v6475_v22 = vld [vmem:[#allocation2 + $0x624] ss:$8 sps:$4 sm:$0xff]  }
 0x23f   :  { %3914 = vmatprep.subr.bf16.mxu0 %v6400_v23  ;;  %v6478_v23 = vld [vmem:[#allocation2 + $0xd24] ss:$8 sps:$4 sm:$0xff]  }
 0x241   :  { %3614 = vmatpush1.bf16.msra.mxu1 %v6395_v24  ;;  %v6473_v24 = vld [vmem:[#allocation2 + $0x620] ss:$8 sps:$4 sm:$0xff]  }
 0x242   :  { %3915 = vmatpush1.bf16.msra.mxu0 %v6398_v25  ;;  %3615 = vmatprep.subr.bf16.mxu1 %v6403_v26  ;;  %v6476_v25 = vld [vmem:[#allocation2 + $0xd20] ss:$8 sps:$4 sm:$0xff]   ;;  %v6481_v26 = vld [vmem:[#allocation2 + $0x634] ss:$8 sps:$4 sm:$0xff]  }
 0x243   :  { %3916 = vmatprep.subr.bf16.mxu0 %v6406_v27  ;;  %v6484_v27 = vld [vmem:[#allocation2 + $0xd34] ss:$8 sps:$4 sm:$0xff]  }
 0x245   :  { %3616 = vmatpush1.bf16.msra.mxu1 %v6401_v28  ;;  %v6479_v28 = vld [vmem:[#allocation2 + $0x630] ss:$8 sps:$4 sm:$0xff]  }
 0x246   :  { %3917 = vmatpush1.bf16.msra.mxu0 %v6404_v29  ;;  %3617 = vmatprep.subr.bf16.mxu1 %v6409_v30  ;;  %v6482_v29 = vld [vmem:[#allocation2 + $0xd30] ss:$8 sps:$4 sm:$0xff]   ;;  %v6487_v30 = vld [vmem:[#allocation2 + $0x644] ss:$8 sps:$4 sm:$0xff]  }
 0x247   :  { %3918 = vmatprep.subr.bf16.mxu0 %v6412_v31  ;;  %v6490_v31 = vld [vmem:[#allocation2 + $0xd44] ss:$8 sps:$4 sm:$0xff]  }
 0x249   :  { %3618 = vmatpush1.bf16.msra.mxu1 %v6407_v32  ;;  %v6485_v32 = vld [vmem:[#allocation2 + $0x640] ss:$8 sps:$4 sm:$0xff]  }
 0x24a   :  { %3919 = vmatpush1.bf16.msra.mxu0 %v6410_v33  ;;  %3619 = vmatprep.subr.bf16.mxu1 %v6415_v34  ;;  %v6488_v33 = vld [vmem:[#allocation2 + $0xd40] ss:$8 sps:$4 sm:$0xff]   ;;  %v6493_v34 = vld [vmem:[#allocation2 + $0x654] ss:$8 sps:$4 sm:$0xff]  }
 0x24b   :  { %3920 = vmatprep.subr.bf16.mxu0 %v6418_v35  ;;  %v6496_v35 = vld [vmem:[#allocation2 + $0xd54] ss:$8 sps:$4 sm:$0xff]  }
 0x24d   :  { %3620 = vmatpush1.bf16.msra.mxu1 %v6413_v36  ;;  %v6491_v36 = vld [vmem:[#allocation2 + $0x650] ss:$8 sps:$4 sm:$0xff]  }
 0x24e   :  { %3921 = vmatpush1.bf16.msra.mxu0 %v6416_v37  ;;  %3621 = vmatprep.subr.bf16.mxu1 %v6421_v38  ;;  %v6494_v37 = vld [vmem:[#allocation2 + $0xd50] ss:$8 sps:$4 sm:$0xff]   ;;  %v6499_v38 = vld [vmem:[#allocation2 + $0x664] ss:$8 sps:$4 sm:$0xff]  }
 0x24f   :  { %3922 = vmatprep.subr.bf16.mxu0 %v6424_v39  ;;  %v6502_v39 = vld [vmem:[#allocation2 + $0xd64] ss:$8 sps:$4 sm:$0xff]  }
 0x251   :  { %3622 = vmatpush1.bf16.msra.mxu1 %v6419_v40  ;;  %v6497_v40 = vld [vmem:[#allocation2 + $0x660] ss:$8 sps:$4 sm:$0xff]  }
 0x252   :  { %3923 = vmatpush1.bf16.msra.mxu0 %v6422_v41  ;;  %3623 = vmatprep.subr.bf16.mxu1 %v6427_v42  ;;  %v6500_v41 = vld [vmem:[#allocation2 + $0xd60] ss:$8 sps:$4 sm:$0xff]   ;;  %v6505_v42 = vld [vmem:[#allocation2 + $0x674] ss:$8 sps:$4 sm:$0xff]  }
 0x253   :  { %3924 = vmatprep.subr.bf16.mxu0 %v6430_v43  ;;  %v6508_v43 = vld [vmem:[#allocation2 + $0xd74] ss:$8 sps:$4 sm:$0xff]  }
 0x255   :  { %3624 = vmatpush1.bf16.msra.mxu1 %v6425_v44  ;;  %v6503_v44 = vld [vmem:[#allocation2 + $0x670] ss:$8 sps:$4 sm:$0xff]  }
 0x256   :  { %3925 = vmatpush1.bf16.msra.mxu0 %v6428_v45  ;;  %3625 = vmatprep.subr.bf16.mxu1 %v6433_v46  ;;  %v6506_v45 = vld [vmem:[#allocation2 + $0xd70] ss:$8 sps:$4 sm:$0xff]   ;;  %v6511_v46 = vld [vmem:[#allocation2 + $0x684] ss:$8 sps:$4 sm:$0xff]  }
 0x257   :  { %3926 = vmatprep.subr.bf16.mxu0 %v6436_v47  ;;  %v6514_v47 = vld [vmem:[#allocation2 + $0xd84] ss:$8 sps:$4 sm:$0xff]  }
 0x259   :  { %3626 = vmatpush1.bf16.msra.mxu1 %v6431_v48  ;;  %v6509_v48 = vld [vmem:[#allocation2 + $0x680] ss:$8 sps:$4 sm:$0xff]  }
 0x25a   :  { %3927 = vmatpush1.bf16.msra.mxu0 %v6434_v49  ;;  %3627 = vmatprep.subr.bf16.mxu1 %v6439_v50  ;;  %v6512_v49 = vld [vmem:[#allocation2 + $0xd80] ss:$8 sps:$4 sm:$0xff]   ;;  %v6517_v50 = vld [vmem:[#allocation2 + $0x694] ss:$8 sps:$4 sm:$0xff]  }
 0x25b   :  { %3928 = vmatprep.subr.bf16.mxu0 %v6442_v51  ;;  %v6520_v51 = vld [vmem:[#allocation2 + $0xd94] ss:$8 sps:$4 sm:$0xff]  }
 0x25d   :  { %3628 = vmatpush1.bf16.msra.mxu1 %v6437_v52  ;;  %v6515_v52 = vld [vmem:[#allocation2 + $0x690] ss:$8 sps:$4 sm:$0xff]  }
 0x25e   :  { %3929 = vmatpush1.bf16.msra.mxu0 %v6440_v53  ;;  %3629 = vmatprep.subr.bf16.mxu1 %v6445_v54  ;;  %v6518_v53 = vld [vmem:[#allocation2 + $0xd90] ss:$8 sps:$4 sm:$0xff]   ;;  %v6523_v54 = vld [vmem:[#allocation2 + $0x6a4] ss:$8 sps:$4 sm:$0xff]  }
 0x25f   :  { %3930 = vmatprep.subr.bf16.mxu0 %v6448_v55  ;;  %v6526_v55 = vld [vmem:[#allocation2 + $0xda4] ss:$8 sps:$4 sm:$0xff]  }
 0x261   :  { %3630 = vmatpush1.bf16.msra.mxu1 %v6443_v56  ;;  %v6521_v56 = vld [vmem:[#allocation2 + $0x6a0] ss:$8 sps:$4 sm:$0xff]  }
 0x262   :  { %3931 = vmatpush1.bf16.msra.mxu0 %v6446_v57  ;;  %3631 = vmatprep.subr.bf16.mxu1 %v6451_v58  ;;  %v6524_v57 = vld [vmem:[#allocation2 + $0xda0] ss:$8 sps:$4 sm:$0xff]   ;;  %v6529_v58 = vld [vmem:[#allocation2 + $0x6b4] ss:$8 sps:$4 sm:$0xff]  }
 0x263   :  { %3932 = vmatprep.subr.bf16.mxu0 %v6454_v59  ;;  %v6532_v59 = vld [vmem:[#allocation2 + $0xdb4] ss:$8 sps:$4 sm:$0xff]  }
 0x265   :  { %3632 = vmatpush1.bf16.msra.mxu1 %v6449_v60  ;;  %v6527_v60 = vld [vmem:[#allocation2 + $0x6b0] ss:$8 sps:$4 sm:$0xff]  }
 0x266   :  { %3933 = vmatpush1.bf16.msra.mxu0 %v6452_v61  ;;  %3633 = vmatprep.subr.bf16.mxu1 %v6457_v62  ;;  %v6530_v61 = vld [vmem:[#allocation2 + $0xdb0] ss:$8 sps:$4 sm:$0xff]   ;;  %v6535_v62 = vld [vmem:[#allocation2 + $0x6c4] ss:$8 sps:$4 sm:$0xff]  }
 0x267   :  { %3934 = vmatprep.subr.bf16.mxu0 %v6460_v63  ;;  %v6538_v63 = vld [vmem:[#allocation2 + $0xdc4] ss:$8 sps:$4 sm:$0xff]  }
 0x269   :  { %3634 = vmatpush1.bf16.msra.mxu1 %v6455_v0  ;;  %v6533_v0 = vld [vmem:[#allocation2 + $0x6c0] ss:$8 sps:$4 sm:$0xff]  }
 0x26a   :  { %3935 = vmatpush1.bf16.msra.mxu0 %v6458_v1  ;;  %3646 = vmatprep.subr.bf16.mxu1 %v6463_v4  ;;  %v6536_v1 = vld [vmem:[#allocation2 + $0xdc0] ss:$8 sps:$4 sm:$0xff]   ;;  %v6539_v4 = vld [vmem:[#allocation2 + $0x6d0] ss:$8 sps:$4 sm:$0xff]  }
 0x26b   :  { %3947 = vmatprep.subr.bf16.mxu0 %v6466_v5  ;;  %v6542_v5 = vld [vmem:[#allocation2 + $0xdd0] ss:$8 sps:$4 sm:$0xff]  }
 0x26c   :  { %3636 = vmatmul.mubr.bf16.vlgmr.msra.gmra.mrb[0].mxu1 %v282_v12  ;;  %v6551_v12 = vld [vmem:[#allocation2 + $0x6f0] ss:$8 sps:$4 sm:$0xff]  }
 0x26d   :  { %3937 = vmatmul.mubr.bf16.vlgmr.msra.gmra.mrb[0].mxu0 %v296_v13  ;;  %3647 = vmatpush1.bf16.msra.mxu1 %v6461_v14  ;;  %v6554_v13 = vld [vmem:[#allocation2 + $0xdf0] ss:$8 sps:$4 sm:$0xff]   ;;  %v220_v14 = vld [vmem:[%s7708_s29 + $0x60] sm:$0xff] }
 0x26e   :  { %3948 = vmatpush1.bf16.msra.mxu0 %v6464_v15  ;;  %3648 = vmatprep.subr.bf16.mxu1 %v6469_v16  ;;  %v252_v15 = vld [vmem:[%s7708_s29 + $0x160] sm:$0xff]  ;;  %v234_v16 = vld [vmem:[%s7708_s29 + $0xd0] sm:$0xff] }
 0x26f   :  { %3949 = vmatprep.subr.bf16.mxu0 %v6472_v17  ;;  %3678 = vmatprep.mubr.bf16.mxu1 %v285_v18  ;;  %v266_v17 = vld [vmem:[%s7708_s29 + $0x1d0] sm:$0xff]  ;;  %v6559_v18 = vld [vmem:[#allocation2 + $0xe04] ss:$8 sps:$4 sm:$0xff]  }
 0x270   :  { %3979 = vmatprep.mubr.bf16.mxu0 %v299_v19  ;;  %v237_v19 = vld [vmem:[%s7708_s29 + $0xe8] sm:$0xff] }
 0x271   :  { %3649 = vmatpush1.bf16.msra.mxu1 %v6467_v20  ;;  %v269_v20 = vld [vmem:[%s7708_s29 + $0x1e8] sm:$0xff] }
 0x272   :  { %3950 = vmatpush1.bf16.msra.mxu0 %v6470_v21  ;;  %3650 = vmatprep.subr.bf16.mxu1 %v6475_v22  ;;  %v284_v21 = vpack.c.bf16 %v252_v15, %v220_v14  ;;  %v298_v22 = vpack.c.bf16 %v266_v17, %v234_v16  ;;  %v6629_v14 = vld [vmem:[#allocation2 + $0xf80] ss:$8 sps:$4 sm:$0xff]   ;;  %v6634_v15 = vld [vmem:[#allocation2 + $0xf94] ss:$8 sps:$4 sm:$0xff]   ;;  %v6632_v16 = vld [vmem:[#allocation2 + $0xf90] ss:$8 sps:$4 sm:$0xff]  }
 0x273   :  { %3951 = vmatprep.subr.bf16.mxu0 %v6478_v23  ;;  %v6557_v23 = vld [vmem:[#allocation2 + $0xe00] ss:$8 sps:$4 sm:$0xff]   ;;  %v6637_v17 = vld [vmem:[#allocation2 + $0xfa4] ss:$8 sps:$4 sm:$0xff]  }
 0x275   :  { %3651 = vmatpush1.bf16.msra.mxu1 %v6473_v24  ;;  %v301_v24 = vpack.c.bf16 %v269_v20, %v237_v19  ;;  %v6640_v19 = vld [vmem:[#allocation2 + $0xfb4] ss:$8 sps:$4 sm:$0xff]   ;;  %v6638_v20 = vld [vmem:[#allocation2 + $0xfb0] ss:$8 sps:$4 sm:$0xff]  }
 0x276   :  { %3952 = vmatpush1.bf16.msra.mxu0 %v6476_v25  ;;  %3652 = vmatprep.subr.bf16.mxu1 %v6481_v26  ;;  %v6562_v25 = vld [vmem:[#allocation2 + $0xe14] ss:$8 sps:$4 sm:$0xff]   ;;  %v6560_v26 = vld [vmem:[#allocation2 + $0xe10] ss:$8 sps:$4 sm:$0xff]  }
 0x277   :  { %3953 = vmatprep.subr.bf16.mxu0 %v6484_v27  ;;  %v6565_v27 = vld [vmem:[#allocation2 + $0xe24] ss:$8 sps:$4 sm:$0xff]  }
 0x279   :  { %3653 = vmatpush1.bf16.msra.mxu1 %v6479_v28  ;;  %v6563_v28 = vld [vmem:[#allocation2 + $0xe20] ss:$8 sps:$4 sm:$0xff]  }
 0x27a   :  { %3954 = vmatpush1.bf16.msra.mxu0 %v6482_v29  ;;  %3654 = vmatprep.subr.bf16.mxu1 %v6487_v30  ;;  %v6568_v29 = vld [vmem:[#allocation2 + $0xe34] ss:$8 sps:$4 sm:$0xff]   ;;  %v6566_v30 = vld [vmem:[#allocation2 + $0xe30] ss:$8 sps:$4 sm:$0xff]  }
 0x27b   :  { %3955 = vmatprep.subr.bf16.mxu0 %v6490_v31  ;;  %v6571_v31 = vld [vmem:[#allocation2 + $0xe44] ss:$8 sps:$4 sm:$0xff]  }
 0x27d   :  { %3655 = vmatpush1.bf16.msra.mxu1 %v6485_v32  ;;  %v6569_v32 = vld [vmem:[#allocation2 + $0xe40] ss:$8 sps:$4 sm:$0xff]  }
 0x27e   :  { %3956 = vmatpush1.bf16.msra.mxu0 %v6488_v33  ;;  %3656 = vmatprep.subr.bf16.mxu1 %v6493_v34  ;;  %v6574_v33 = vld [vmem:[#allocation2 + $0xe54] ss:$8 sps:$4 sm:$0xff]   ;;  %v6572_v34 = vld [vmem:[#allocation2 + $0xe50] ss:$8 sps:$4 sm:$0xff]  }
 0x27f   :  { %3957 = vmatprep.subr.bf16.mxu0 %v6496_v35  ;;  %v6577_v35 = vld [vmem:[#allocation2 + $0xe64] ss:$8 sps:$4 sm:$0xff]  }
 0x281   :  { %3657 = vmatpush1.bf16.msra.mxu1 %v6491_v36  ;;  %v6575_v36 = vld [vmem:[#allocation2 + $0xe60] ss:$8 sps:$4 sm:$0xff]  }
 0x282   :  { %3958 = vmatpush1.bf16.msra.mxu0 %v6494_v37  ;;  %3658 = vmatprep.subr.bf16.mxu1 %v6499_v38  ;;  %v6580_v37 = vld [vmem:[#allocation2 + $0xe74] ss:$8 sps:$4 sm:$0xff]   ;;  %v6578_v38 = vld [vmem:[#allocation2 + $0xe70] ss:$8 sps:$4 sm:$0xff]  }
 0x283   :  { %3959 = vmatprep.subr.bf16.mxu0 %v6502_v39  ;;  %v6583_v39 = vld [vmem:[#allocation2 + $0xe84] ss:$8 sps:$4 sm:$0xff]  }
 0x285   :  { %3659 = vmatpush1.bf16.msra.mxu1 %v6497_v40  ;;  %v6581_v40 = vld [vmem:[#allocation2 + $0xe80] ss:$8 sps:$4 sm:$0xff]  }
 0x286   :  { %3960 = vmatpush1.bf16.msra.mxu0 %v6500_v41  ;;  %3660 = vmatprep.subr.bf16.mxu1 %v6505_v42  ;;  %v6586_v41 = vld [vmem:[#allocation2 + $0xe94] ss:$8 sps:$4 sm:$0xff]   ;;  %v6584_v42 = vld [vmem:[#allocation2 + $0xe90] ss:$8 sps:$4 sm:$0xff]  }
 0x287   :  { %3961 = vmatprep.subr.bf16.mxu0 %v6508_v43  ;;  %v6589_v43 = vld [vmem:[#allocation2 + $0xea4] ss:$8 sps:$4 sm:$0xff]  }
 0x289   :  { %3661 = vmatpush1.bf16.msra.mxu1 %v6503_v44  ;;  %v6587_v44 = vld [vmem:[#allocation2 + $0xea0] ss:$8 sps:$4 sm:$0xff]  }
 0x28a   :  { %3962 = vmatpush1.bf16.msra.mxu0 %v6506_v45  ;;  %3662 = vmatprep.subr.bf16.mxu1 %v6511_v46  ;;  %v6592_v45 = vld [vmem:[#allocation2 + $0xeb4] ss:$8 sps:$4 sm:$0xff]   ;;  %v6590_v46 = vld [vmem:[#allocation2 + $0xeb0] ss:$8 sps:$4 sm:$0xff]  }
 0x28b   :  { %3963 = vmatprep.subr.bf16.mxu0 %v6514_v47  ;;  %v6595_v47 = vld [vmem:[#allocation2 + $0xec4] ss:$8 sps:$4 sm:$0xff]  }
 0x28d   :  { %3663 = vmatpush1.bf16.msra.mxu1 %v6509_v48  ;;  %v6593_v48 = vld [vmem:[#allocation2 + $0xec0] ss:$8 sps:$4 sm:$0xff]  }
 0x28e   :  { %3964 = vmatpush1.bf16.msra.mxu0 %v6512_v49  ;;  %3664 = vmatprep.subr.bf16.mxu1 %v6517_v50  ;;  %v6598_v49 = vld [vmem:[#allocation2 + $0xed4] ss:$8 sps:$4 sm:$0xff]   ;;  %v6596_v50 = vld [vmem:[#allocation2 + $0xed0] ss:$8 sps:$4 sm:$0xff]  }
 0x28f   :  { %3965 = vmatprep.subr.bf16.mxu0 %v6520_v51  ;;  %v6601_v51 = vld [vmem:[#allocation2 + $0xee4] ss:$8 sps:$4 sm:$0xff]  }
 0x291   :  { %3665 = vmatpush1.bf16.msra.mxu1 %v6515_v52  ;;  %v6599_v52 = vld [vmem:[#allocation2 + $0xee0] ss:$8 sps:$4 sm:$0xff]  }
 0x292   :  { %3966 = vmatpush1.bf16.msra.mxu0 %v6518_v53  ;;  %3666 = vmatprep.subr.bf16.mxu1 %v6523_v54  ;;  %v6604_v53 = vld [vmem:[#allocation2 + $0xef4] ss:$8 sps:$4 sm:$0xff]   ;;  %v6602_v54 = vld [vmem:[#allocation2 + $0xef0] ss:$8 sps:$4 sm:$0xff]  }
 0x293   :  { %3967 = vmatprep.subr.bf16.mxu0 %v6526_v55  ;;  %v236_v55 = vld [vmem:[%s7708_s29 + $0xe0] sm:$0xff] }
 0x295   :  { %3667 = vmatpush1.bf16.msra.mxu1 %v6521_v56  ;;  %v268_v56 = vld [vmem:[%s7708_s29 + $0x1e0] sm:$0xff] }
 0x296   :  { %3968 = vmatpush1.bf16.msra.mxu0 %v6524_v57  ;;  %3668 = vmatprep.subr.bf16.mxu1 %v6529_v58  ;;  %v6607_v57 = vld [vmem:[#allocation2 + $0xf04] ss:$8 sps:$4 sm:$0xff]   ;;  %v239_v58 = vld [vmem:[%s7708_s29 + $0xf8] sm:$0xff] }
 0x297   :  { %3969 = vmatprep.subr.bf16.mxu0 %v6532_v59  ;;  %v271_v59 = vld [vmem:[%s7708_s29 + $0x1f8] sm:$0xff] }
 0x299   :  { %3669 = vmatpush1.bf16.msra.mxu1 %v6527_v60  ;;  %v300_v60 = vpack.c.bf16 %v268_v56, %v236_v55  ;;  %v816_v55 = vld [vmem:[#allocation4] sm:$0x3] }
 0x29a   :  { %3970 = vmatpush1.bf16.msra.mxu0 %v6530_v61  ;;  %3670 = vmatprep.subr.bf16.mxu1 %v6535_v62  ;;  %v6605_v61 = vld [vmem:[#allocation2 + $0xf00] ss:$8 sps:$4 sm:$0xff]   ;;  %v303_v62 = vpack.c.bf16 %v271_v59, %v239_v58 }
 0x29b   :  { %3971 = vmatprep.subr.bf16.mxu0 %v6538_v63  ;;  %v6610_v63 = vld [vmem:[#allocation2 + $0xf14] ss:$8 sps:$4 sm:$0xff]  }
 0x29d   :  { %3671 = vmatpush1.bf16.msra.mxu1 %v6533_v0  ;;  %v6608_v0 = vld [vmem:[#allocation2 + $0xf10] ss:$8 sps:$4 sm:$0xff]  }
 0x29e   :  { %3972 = vmatpush1.bf16.msra.mxu0 %v6536_v1  ;;  %3672 = vmatprep.subr.bf16.mxu1 %v6541_v2  ;;  %v6613_v1 = vld [vmem:[#allocation2 + $0xf24] ss:$8 sps:$4 sm:$0xff]   ;;  %v6611_v2 = vld [vmem:[#allocation2 + $0xf20] ss:$8 sps:$4 sm:$0xff]  }
 0x29f   :  { %3973 = vmatprep.subr.bf16.mxu0 %v6544_v3  ;;  %v6616_v3 = vld [vmem:[#allocation2 + $0xf34] ss:$8 sps:$4 sm:$0xff]  }
 0x2a1   :  { %3673 = vmatpush1.bf16.msra.mxu1 %v6539_v4  ;;  %v6614_v4 = vld [vmem:[#allocation2 + $0xf30] ss:$8 sps:$4 sm:$0xff]  }
 0x2a2   :  { %3974 = vmatpush1.bf16.msra.mxu0 %v6542_v5  ;;  %3674 = vmatprep.subr.bf16.mxu1 %v6547_v6  ;;  %v6619_v5 = vld [vmem:[#allocation2 + $0xf44] ss:$8 sps:$4 sm:$0xff]   ;;  %v6617_v6 = vld [vmem:[#allocation2 + $0xf40] ss:$8 sps:$4 sm:$0xff]  }
 0x2a3   :  { %3975 = vmatprep.subr.bf16.mxu0 %v6550_v7  ;;  %v6622_v7 = vld [vmem:[#allocation2 + $0xf54] ss:$8 sps:$4 sm:$0xff]  }
 0x2a5   :  { %3675 = vmatpush1.bf16.msra.mxu1 %v6545_v8  ;;  %v6620_v8 = vld [vmem:[#allocation2 + $0xf50] ss:$8 sps:$4 sm:$0xff]  }
 0x2a6   :  { %3976 = vmatpush1.bf16.msra.mxu0 %v6548_v9  ;;  %3676 = vmatprep.subr.bf16.mxu1 %v6553_v10  ;;  %v6625_v9 = vld [vmem:[#allocation2 + $0xf64] ss:$8 sps:$4 sm:$0xff]   ;;  %v6623_v10 = vld [vmem:[#allocation2 + $0xf60] ss:$8 sps:$4 sm:$0xff]  }
 0x2a7   :  { %3977 = vmatprep.subr.bf16.mxu0 %v6556_v11  ;;  %v6628_v11 = vld [vmem:[#allocation2 + $0xf74] ss:$8 sps:$4 sm:$0xff]  }
 0x2a9   :  { %3677 = vmatpush1.bf16.msra.mxu1 %v6551_v12  ;;  %v6626_v12 = vld [vmem:[#allocation2 + $0xf70] ss:$8 sps:$4 sm:$0xff]  }
 0x2aa   :  { %3978 = vmatpush1.bf16.msra.mxu0 %v6554_v13  ;;  %v6631_v13 = vld [vmem:[#allocation2 + $0xf84] ss:$8 sps:$4 sm:$0xff]  }
 0x2ab   :  { %3990 = vmatprep.subr.bf16.mxu0 %v6559_v18  ;;  %v6635_v18 = vld [vmem:[#allocation2 + $0xfa0] ss:$8 sps:$4 sm:$0xff]  }
 0x2ac   :  { %3679 = vmatmul.mubr.bf16.vlgmr.msra.gmra.mrb[0].mxu1 %v284_v21  ;;  %v6643_v21 = vld [vmem:[#allocation2 + $0xfc4] ss:$8 sps:$4 sm:$0xff]  }
 0x2ad   :  { %3980 = vmatmul.mubr.bf16.vlgmr.msra.gmra.mrb[0].mxu0 %v298_v22  ;;  %v6641_v22 = vld [vmem:[#allocation2 + $0xfc0] ss:$8 sps:$4 sm:$0xff]  }
 0x2ae   :  { %3991 = vmatpush1.bf16.msra.mxu0 %v6557_v23  ;;  %4022 = vmatprep.mubr.bf16.mxu0 %v301_v24  ;;  %v6646_v23 = vld [vmem:[#allocation2 + $0xfd4] ss:$8 sps:$4 sm:$0xff]   ;;  %v6644_v24 = vld [vmem:[#allocation2 + $0xfd0] ss:$8 sps:$4 sm:$0xff]  }
 0x2af   :  { %3992 = vmatprep.subr.bf16.mxu0 %v6562_v25  ;;  %v6649_v25 = vld [vmem:[#allocation2 + $0xfe4] ss:$8 sps:$4 sm:$0xff]  }
 0x2b2   :  { %3993 = vmatpush1.bf16.msra.mxu0 %v6560_v26  ;;  %v6647_v26 = vld [vmem:[#allocation2 + $0xfe0] ss:$8 sps:$4 sm:$0xff]  }
 0x2b3   :  { %3994 = vmatprep.subr.bf16.mxu0 %v6565_v27  ;;  %v6652_v27 = vld [vmem:[#allocation2 + $0xff4] ss:$8 sps:$4 sm:$0xff]  }
 0x2b6   :  { %3995 = vmatpush1.bf16.msra.mxu0 %v6563_v28  ;;  %v6650_v28 = vld [vmem:[#allocation2 + $0xff0] ss:$8 sps:$4 sm:$0xff]  }
 0x2b7   :  { %3996 = vmatprep.subr.bf16.mxu0 %v6568_v29  ;;  %v238_v29 = vld [vmem:[%s7708_s29 + $0xf0] sm:$0xff] }
 0x2ba   :  { %3997 = vmatpush1.bf16.msra.mxu0 %v6566_v30  ;;  %v270_v30 = vld [vmem:[%s7708_s29 + $0x1f0] sm:$0xff] }
 0x2bb   :  { %3998 = vmatprep.subr.bf16.mxu0 %v6571_v31  ;;  %v6653_v31 = vld [vmem:[%s7680_s3 + $0x40] sm:$0xff]  }
 0x2be   :  { %3999 = vmatpush1.bf16.msra.mxu0 %v6569_v32  ;;  %v302_v32 = vpack.c.bf16 %v270_v30, %v238_v29  ;;  %v6672_v29 = vld [vmem:[#allocation10 + $0x8] sm:$0xff]   ;;  %v6673_v30 = vld [vmem:[#allocation10 + $0x10] sm:$0xff]  }
 0x2bf   :  { %4000 = vmatprep.subr.bf16.mxu0 %v6574_v33  ;;  %v6654_v33 = vld [vmem:[%s7680_s3] sm:$0xff]  }
 0x2c2   :  { %4001 = vmatpush1.bf16.msra.mxu0 %v6572_v34  ;;  %v6655_v34 = vld [vmem:[%s7680_s3 + $0x48] sm:$0xff]  }
 0x2c3   :  { %4002 = vmatprep.subr.bf16.mxu0 %v6577_v35  ;;  %v6656_v35 = vld [vmem:[%s7680_s3 + $0x8] sm:$0xff]  }
 0x2c6   :  { %4003 = vmatpush1.bf16.msra.mxu0 %v6575_v36  ;;  %v6657_v36 = vld [vmem:[%s7680_s3 + $0x50] sm:$0xff]  }
 0x2c7   :  { %4004 = vmatprep.subr.bf16.mxu0 %v6580_v37  ;;  %v6658_v37 = vld [vmem:[%s7680_s3 + $0x10] sm:$0xff]  }
 0x2ca   :  { %4005 = vmatpush1.bf16.msra.mxu0 %v6578_v38  ;;  %v6659_v38 = vld [vmem:[%s7680_s3 + $0x58] sm:$0xff]  }
 0x2cb   :  { %4006 = vmatprep.subr.bf16.mxu0 %v6583_v39  ;;  %v6660_v39 = vld [vmem:[%s7680_s3 + $0x18] sm:$0xff]  }
 0x2ce   :  { %4007 = vmatpush1.bf16.msra.mxu0 %v6581_v40  ;;  %v6661_v40 = vld [vmem:[%s7680_s3 + $0x60] sm:$0xff]  }
 0x2cf   :  { %4008 = vmatprep.subr.bf16.mxu0 %v6586_v41  ;;  %v6662_v41 = vld [vmem:[%s7680_s3 + $0x20] sm:$0xff]  }
 0x2d2   :  { %4009 = vmatpush1.bf16.msra.mxu0 %v6584_v42  ;;  %v6663_v42 = vld [vmem:[%s7680_s3 + $0x68] sm:$0xff]  }
 0x2d3   :  { %4010 = vmatprep.subr.bf16.mxu0 %v6589_v43  ;;  %v6664_v43 = vld [vmem:[%s7680_s3 + $0x28] sm:$0xff]  }
 0x2d6   :  { %4011 = vmatpush1.bf16.msra.mxu0 %v6587_v44 }
 0x2d7   :  { %4012 = vmatprep.subr.bf16.mxu0 %v6592_v45 }
 0x2da   :  { %4013 = vmatpush1.bf16.msra.mxu0 %v6590_v46  ;;  %v6665_v46 = vld [vmem:[%s7680_s3 + $0x70] sm:$0xff]  }
 0x2db   :  { %4014 = vmatprep.subr.bf16.mxu0 %v6595_v47 }
 0x2de   :  { %4015 = vmatpush1.bf16.msra.mxu0 %v6593_v48  ;;  %v6666_v48 = vld [vmem:[%s7680_s3 + $0x30] sm:$0xff]  }
 0x2df   :  { %4016 = vmatprep.subr.bf16.mxu0 %v6598_v49 }
 0x2e2   :  { %4017 = vmatpush1.bf16.msra.mxu0 %v6596_v50  ;;  %v6667_v50 = vld [vmem:[%s7680_s3 + $0x78] sm:$0xff]  }
 0x2e3   :  { %4018 = vmatprep.subr.bf16.mxu0 %v6601_v51  ;;  %v6668_v51 = vld [vmem:[%s7680_s3 + $0x38] sm:$0xff]  }
 0x2e6   :  { %4019 = vmatpush1.bf16.msra.mxu0 %v6599_v52  ;;  %v818_v52 = vlaneseq }
 0x2e7   :  { %4020 = vmatprep.subr.bf16.mxu0 %v6604_v53 }
 0x2e8   :  { %v7609_v53 = vshrl.u32 %v818_v52, 7  ;;  %v6687_v52 = vld [vmem:[#allocation15 + $0x80] ss:$16 sps:$4 sm:$0xff]  }
 0x2ea   :  { %4021 = vmatpush1.bf16.msra.mxu0 %v6602_v54  ;;  %v820_v54 = vsub.s32 0, %v7609_v53  ;;  %v824_v56 = vsub.s32 1, %v7609_v53 }
 0x2eb   :  { %4033 = vmatprep.subr.bf16.mxu0 %v6607_v57 }
 0x2ec   :  { %v821_v57 = vrot.slane %v816_v55, %v820_v54  ;;  %v825_v58 = vrot.slane %v816_v55, %v824_v56  ;;  %v6692_v55 = vld [vmem:[#allocation15 + $0xa4] ss:$16 sps:$4 sm:$0xff]  }
 0x2ed   :  { %4023 = vmatmul.mubr.bf16.vlgmr.msra.gmra.mrb[0].mxu0 %v300_v60 }
 0x2ee   :  { %4034 = vmatpush1.bf16.msra.mxu0 %v6605_v61  ;;  %4065 = vmatprep.mubr.bf16.mxu0 %v303_v62 }
 0x2ef   :  { %4035 = vmatprep.subr.bf16.mxu0 %v6610_v63 }
 0x2f2   :  { %4036 = vmatpush1.bf16.msra.mxu0 %v6608_v0 }
 0x2f3   :  { %4037 = vmatprep.subr.bf16.mxu0 %v6613_v1 }
 0x2f6   :  { %4038 = vmatpush1.bf16.msra.mxu0 %v6611_v2 }
 0x2f7   :  { %4039 = vmatprep.subr.bf16.mxu0 %v6616_v3 }
 0x2fa   :  { %4040 = vmatpush1.bf16.msra.mxu0 %v6614_v4 }
 0x2fb   :  { %4041 = vmatprep.subr.bf16.mxu0 %v6619_v5 }
 0x2fe   :  { %4042 = vmatpush1.bf16.msra.mxu0 %v6617_v6 }
 0x2ff   :  { %4043 = vmatprep.subr.bf16.mxu0 %v6622_v7 }
 0x302   :  { %4044 = vmatpush1.bf16.msra.mxu0 %v6620_v8 }
 0x303   :  { %4045 = vmatprep.subr.bf16.mxu0 %v6625_v9 }
 0x306   :  { %4046 = vmatpush1.bf16.msra.mxu0 %v6623_v10 }
 0x307   :  { %4047 = vmatprep.subr.bf16.mxu0 %v6628_v11 }
 0x30a   :  { %4048 = vmatpush1.bf16.msra.mxu0 %v6626_v12 }
 0x30b   :  { %4049 = vmatprep.subr.bf16.mxu0 %v6631_v13  ;;  %v6669_v13 = vld [vmem:[#allocation7] sm:$0xff]  }
 0x30e   :  { %4050 = vmatpush1.bf16.msra.mxu0 %v6629_v14  ;;  %v7084_v14 = vmov 0.0  }
 0x30f   :  { %4051 = vmatprep.subr.bf16.mxu0 %v6634_v15  ;;  %5752 = vmatprep.subr.bf16.mxu1 %v7084_v14  ;;  %v6670_v15 = vld [vmem:[#allocation7 + $0x8] sm:$0xff]  }
 0x310   :  { %5753 = vmatpush3.bf16.msra.mxu1 %v6669_v13  ;;  %5756 = vmatprep.mubr.msk.bf16.mxu1 %vm7085_vm0, %v7084_v14  ;;  %v6723_v13 = vld [vmem:[#allocation15 + $0xec] ss:$16 sps:$4 sm:$0xff]  }
 0x311   :  { %5754 = vmatprep.subr.bf16.mxu1 %v7084_v14 }
 0x312   :  { %4052 = vmatpush1.bf16.msra.mxu0 %v6632_v16 }
 0x313   :  { %4053 = vmatprep.subr.bf16.mxu0 %v6637_v17  ;;  %v5620_v17 = vld [vmem:[#allocation6] ss:$0 sm:$0xff] }
 0x314   :  { %5755 = vmatpush3.bf16.msra.mxu1 %v6670_v15  ;;  %v6721_v15 = vld [vmem:[#allocation15 + $0xe8] ss:$16 sps:$4 sm:$0xff]  }
 0x315   :  { %5760 = vmatprep.subr.bf16.mxu1 %v7084_v14 }
 0x316   :  { %4054 = vmatpush1.bf16.msra.mxu0 %v6635_v18 }
 0x317   :  { %4055 = vmatprep.subr.bf16.mxu0 %v6640_v19 }
 0x31a   :  { %4056 = vmatpush1.bf16.msra.mxu0 %v6638_v20 }
 0x31b   :  { %4057 = vmatprep.subr.bf16.mxu0 %v6643_v21 }
 0x31e   :  { %4058 = vmatpush1.bf16.msra.mxu0 %v6641_v22 }
 0x31f   :  { %4059 = vmatprep.subr.bf16.mxu0 %v6646_v23 }
 0x322   :  { %4060 = vmatpush1.bf16.msra.mxu0 %v6644_v24 }
 0x323   :  { %4061 = vmatprep.subr.bf16.mxu0 %v6649_v25 }
 0x326   :  { %4062 = vmatpush1.bf16.msra.mxu0 %v6647_v26 }
 0x327   :  { %4063 = vmatprep.subr.bf16.mxu0 %v6652_v27  ;;  %v6671_v27 = vld [vmem:[#allocation10] sm:$0xff]  }
 0x32a   :  { %4064 = vmatpush1.bf16.msra.mxu0 %v6650_v28 }
 0x32b   :  { %5713 = vmatprep.subr.bf16.mxu0 %v6653_v31  ;;  %v6674_v31 = vld [vmem:[#allocation10 + $0x18] sm:$0xff]  }
 0x32d   :  { %4066 = vmatmul.mubr.bf16.vlgmr.msra.gmra.mrb[0].mxu0 %v302_v32  ;;  %v6677_v32 = vld [vmem:[#allocation15 + $0x4] ss:$16 sps:$4 sm:$0xff]  }
 0x32e   :  { %5714 = vmatpush3.bf16.msra.mxu0 %v6654_v33  ;;  %v5637_v33 = vld [vmem:[#allocation9] ss:$0 sm:$0xff] }
 0x32f   :  { %5715 = vmatprep.subr.bf16.mxu0 %v6655_v34 }
 0x332   :  { %5716 = vmatpush3.bf16.msra.mxu0 %v6656_v35 }
 0x333   :  { %5717 = vmatprep.subr.bf16.mxu0 %v6657_v36 }
 0x336   :  { %5718 = vmatpush3.bf16.msra.mxu0 %v6658_v37 }
 0x337   :  { %5719 = vmatprep.subr.bf16.mxu0 %v6659_v38 }
 0x33a   :  { %5720 = vmatpush3.bf16.msra.mxu0 %v6660_v39 }
 0x33b   :  { %5721 = vmatprep.subr.bf16.mxu0 %v6661_v40 }
 0x33e   :  { %5722 = vmatpush3.bf16.msra.mxu0 %v6662_v41 }
 0x33f   :  { %5723 = vmatprep.subr.bf16.mxu0 %v6663_v42  ;;  %v6675_v42 = vld [vmem:[#allocation15] ss:$16 sps:$4 sm:$0xff]  }
 0x342   :  { %5724 = vmatpush3.bf16.msra.mxu0 %v6664_v43 }
 0x343   :  { %5725 = vmatprep.subr.bf16.mxu0 %v6665_v46  ;;  %v7086_v46 = vmov 0  }
 0x346   :  { %5726 = vmatpush3.bf16.msra.mxu0 %v6666_v48  ;;  %v6681_v48 = vld [vmem:[#allocation15 + $0x40] ss:$16 sps:$4 sm:$0xff]  }
 0x347   :  { %5727 = vmatprep.subr.bf16.mxu0 %v6667_v50  ;;  %v6684_v50 = vld [vmem:[#allocation15 + $0x60] ss:$16 sps:$4 sm:$0xff]  }
 0x34a   :  { %5728 = vmatpush3.bf16.msra.mxu0 %v6668_v51  ;;  %v6689_v51 = vld [vmem:[#allocation15 + $0x84] ss:$16 sps:$4 sm:$0xff]  }
 0x37f   :  { %v3680_v44 = vpop.f32.mrb[0].mxu1 }
 0x380   :  { %v3682_v45 = vpop.f32.mrb[1].mxu1  ;;  %v5792_v59 = vadd.f32 %v3680_v44, %v821_v57  ;;  %v6680_v44 = vld [vmem:[#allocation15 + $0x24] ss:$16 sps:$4 sm:$0xff]  }
 0x381   :  { %v3684_v47 = vpop.f32.mrb[2].mxu1  ;;  %v5794_v60 = vadd.f32 %v3682_v45, %v825_v58  ;;  %v6678_v45 = vld [vmem:[#allocation15 + $0x20] ss:$16 sps:$4 sm:$0xff]  }
 0x382   :  { %v3686_v49 = vpop.f32.mrb[3].mxu1  ;;  %v5796_v62 = vadd.f32 %v3684_v47, %v821_v57  ;;  %v6683_v47 = vld [vmem:[#allocation15 + $0x44] ss:$16 sps:$4 sm:$0xff]   ;;  %v6690_v57 = vld [vmem:[#allocation15 + $0xa0] ss:$16 sps:$4 sm:$0xff]  }
 0x383   :  { %v5798_v1 = vadd.f32 %v3686_v49, %v825_v58  ;;  %v6686_v49 = vld [vmem:[#allocation15 + $0x64] ss:$16 sps:$4 sm:$0xff]  }
 0x384   :  { %v6695_v58 = vld [vmem:[#allocation15 + $0xc4] ss:$16 sps:$4 sm:$0xff]  }
 0x400   :  { %v4067_v61 = vpop.f32.mrb[0].mxu0 }
 0x401   :  { %v5793_v63 = vadd.f32 %v5792_v59, %v4067_v61  ;;  %v4069_v0 = vpop.f32.mrb[1].mxu0  ;;  %v6693_v59 = vld [vmem:[#allocation15 + $0xc0] ss:$16 sps:$4 sm:$0xff]  }
 0x402   :  { %v5795_v2 = vadd.f32 %v5794_v60, %v4069_v0  ;;  %v4071_v3 = vpop.f32.mrb[2].mxu0  ;;  %v6698_v60 = vld [vmem:[#allocation15 + $0xe4] ss:$16 sps:$4 sm:$0xff]   ;;  %v6696_v61 = vld [vmem:[#allocation15 + $0xe0] ss:$16 sps:$4 sm:$0xff]  }
 0x403   :  { %v5797_v4 = vadd.f32 %v5796_v62, %v4071_v3  ;;  %v4073_v5 = vpop.f32.mrb[3].mxu0  ;;  %v4076_v7 = vmax.f32 %v5793_v63, 0.0  ;;  %v6701_v62 = vld [vmem:[#allocation15 + $0xc] ss:$16 sps:$4 sm:$0xff]   ;;  %v6699_v0 = vld [vmem:[#allocation15 + $0x8] ss:$16 sps:$4 sm:$0xff]  }
 0x404   :  { %v5799_v6 = vadd.f32 %v5798_v1, %v4073_v5  ;;  %v4077_v9 = vmax.f32 %v5795_v2, 0.0  ;;  %v6702_v63 = vld [vmem:[%s7691_s14] sm:$0xff]  }
 0x405   :  { %v4078_v8 = vmax.f32 %v5797_v4, 0.0  ;;  %v6705_v1 = vld [vmem:[#allocation15 + $0x2c] ss:$16 sps:$4 sm:$0xff]   ;;  %v6703_v2 = vld [vmem:[#allocation15 + $0x28] ss:$16 sps:$4 sm:$0xff]  }
 0x406   :  { %v4079_v10 = vmax.f32 %v5799_v6, 0.0  ;;  %v6708_v3 = vld [vmem:[#allocation15 + $0x4c] ss:$16 sps:$4 sm:$0xff]   ;;  %v6706_v4 = vld [vmem:[#allocation15 + $0x48] ss:$16 sps:$4 sm:$0xff]  }
 0x407   :  { %v4080_v11 = vpack.c.bf16 %v4078_v8, %v4076_v7  ;;  %v6711_v5 = vld [vmem:[#allocation15 + $0x6c] ss:$16 sps:$4 sm:$0xff]   ;;  %v6709_v6 = vld [vmem:[#allocation15 + $0x68] ss:$16 sps:$4 sm:$0xff]  }
 0x408   :  { %v4081_v12 = vpack.c.bf16 %v4079_v10, %v4077_v9  ;;  %v6714_v7 = vld [vmem:[#allocation15 + $0x8c] ss:$16 sps:$4 sm:$0xff]   ;;  %v6712_v8 = vld [vmem:[#allocation15 + $0x88] ss:$16 sps:$4 sm:$0xff]  }
 0x409   :  { %v6717_v9 = vld [vmem:[#allocation15 + $0xac] ss:$16 sps:$4 sm:$0xff]   ;;  %v6715_v10 = vld [vmem:[#allocation15 + $0xa8] ss:$16 sps:$4 sm:$0xff]  }
 0x40a   :  { %4249 = vmatprep.mubr.bf16.mxu0 %v4081_v12  ;;  %v6718_v12 = vld [vmem:[#allocation15 + $0xc8] ss:$16 sps:$4 sm:$0xff]  }
 0x40b   :  { %4250 = vmatmul.mubr.bf16.vlgmr.msra.gmra.mrb[4].mxu0 %v4080_v11  ;;  %v6720_v11 = vld [vmem:[#allocation15 + $0xcc] ss:$16 sps:$4 sm:$0xff]  }
 0x4de   :  { %v5729_v16 = vpop.f32.mrb[4].mxu0 }
 0x4df   :  { %v5730_v18 = vpop.f32.mrb[5].mxu0 }
 0x4e0   :  { %v5731_v19 = vadd.f32 %v5730_v18, %v5729_v16  ;;  %v5732_v20 = vpop.f32.mrb[6].mxu0  ;;  %v6726_v16 = vld [vmem:[#allocation13 + $0x4] ss:$16 sps:$4 sm:$0xff]  }
 0x4e1   :  { %v5733_v21 = vpop.f32.mrb[7].mxu0  ;;  %v6729_v18 = vld [vmem:[#allocation13 + $0x24] ss:$16 sps:$4 sm:$0xff]  }
 0x4e2   :  { %v4252_v22 = vadd.f32 %v5731_v19, %v5620_v17  ;;  %v5734_v23 = vadd.f32 %v5733_v21, %v5732_v20  ;;  %v6727_v19 = vld [vmem:[#allocation13 + $0x20] ss:$16 sps:$4 sm:$0xff]   ;;  %v6732_v20 = vld [vmem:[#allocation13 + $0x44] ss:$16 sps:$4 sm:$0xff]  }
 0x4e3   :  { %v6730_v21 = vld [vmem:[#allocation13 + $0x40] ss:$16 sps:$4 sm:$0xff]  }
 0x4e4   :  { %v4255_v24 = vadd.f32 %v5734_v23, %v5620_v17  ;;  %v4258_v25 = vmax.f32 %v4252_v22, 0.0  ;;  %v6724_v17 = vld [vmem:[#allocation13] ss:$16 sps:$4 sm:$0xff]   ;;  %v6735_v22 = vld [vmem:[#allocation13 + $0x64] ss:$16 sps:$4 sm:$0xff]  }
 0x4e5   :  { %v6733_v23 = vld [vmem:[#allocation13 + $0x60] ss:$16 sps:$4 sm:$0xff]  }
 0x4e6   :  { %v4259_v26 = vmax.f32 %v4255_v24, 0.0  ;;  %v6738_v24 = vld [vmem:[#allocation13 + $0xc] ss:$16 sps:$4 sm:$0xff]  }
 0x4e8   :  { %v4260_v28 = vpack.c.bf16 %v4259_v26, %v4258_v25  ;;  %v5641_v25 = vld [vmem:[#allocation12] ss:$0 sm:$0xff] }
 0x4ea   :  { %5757 = vmatmul.mubr.msk.bf16.vlgmr.msra.gmra.mrb[4].mxu1 %vm4284_vm1, %v4260_v28 }
 0x4eb   :  { %5761 = vmatpush3.bf16.msra.mxu1 %v6671_v27  ;;  %5768 = vmatprep.mubr.msk.bf16.mxu1 %vm7085_vm0, %v7084_v14 }
 0x4ec   :  { %5762 = vmatprep.subr.bf16.mxu1 %v7084_v14 }
 0x4ef   :  { %5763 = vmatpush3.bf16.msra.mxu1 %v6672_v29 }
 0x4f0   :  { %5764 = vmatprep.subr.bf16.mxu1 %v7084_v14 }
 0x4f3   :  { %5765 = vmatpush3.bf16.msra.mxu1 %v6673_v30 }
 0x4f4   :  { %5766 = vmatprep.subr.bf16.mxu1 %v7084_v14 }
 0x4f7   :  { %5767 = vmatpush3.bf16.msra.mxu1 %v6674_v31 }
 0x4f8   :  { %4635 = vmatprep.subr.bf16.mxu1 %v6677_v32 }
 0x5bd   :  { %v4322_v34 = vpop.f32.mrb[4].mxu1 }
 0x5be   :  { %v4323_v35 = vadd.f32 %v5637_v33, %v4322_v34  ;;  %v5758_v36 = vpop.f32.mrb[5].mxu1  ;;  %v6736_v34 = vld [vmem:[#allocation13 + $0x8] ss:$16 sps:$4 sm:$0xff]  }
 0x5bf   :  { %v4325_v37 = vpop.f32.mrb[6].mxu1  ;;  %v6741_v36 = vld [vmem:[#allocation13 + $0x2c] ss:$16 sps:$4 sm:$0xff]  }
 0x5c0   :  { %v4326_v38 = vadd.f32 %v5637_v33, %v4325_v37  ;;  %v5759_v39 = vpop.f32.mrb[7].mxu1  ;;  %v4329_v40 = vmax.f32 %v4323_v35, 0.0  ;;  %v6739_v37 = vld [vmem:[#allocation13 + $0x28] ss:$16 sps:$4 sm:$0xff]  }
 0x5c1   :  { %v6742_v39 = vld [vmem:[#allocation13 + $0x48] ss:$16 sps:$4 sm:$0xff]  }
 0x5c2   :  { %v4330_v41 = vmax.f32 %v4326_v38, 0.0  ;;  %v6744_v38 = vld [vmem:[#allocation13 + $0x4c] ss:$16 sps:$4 sm:$0xff]  }
 0x5c4   :  { %v4331_v43 = vpack.c.bf16 %v4330_v41, %v4329_v40  ;;  %v6747_v40 = vld [vmem:[#allocation13 + $0x6c] ss:$16 sps:$4 sm:$0xff]   ;;  %v6745_v41 = vld [vmem:[#allocation13 + $0x68] ss:$16 sps:$4 sm:$0xff]  }
 0x5c6   :  { %5769 = vmatmul.mubr.msk.bf16.vlgmr.msra.gmra.mrb[8].mxu1 %vm4371_vm2, %v4331_v43  ;;  %v6749_v43 = vld [vmem:[#allocation18 + $0x8] sm:$0xff]  }
 0x5c7   :  { %4636 = vmatpush1.bf16.msra.mxu1 %v6675_v42  ;;  %4667 = vmatprep.mubr.bf16.mxu1 %v7086_v46  ;;  %v6748_v42 = vld [vmem:[#allocation18] sm:$0xff]  }
 0x5c8   :  { %4637 = vmatprep.subr.bf16.mxu1 %v6680_v44  ;;  %v6750_v44 = vld [vmem:[#allocation18 + $0x10] sm:$0xff]  }
 0x5cb   :  { %4638 = vmatpush1.bf16.msra.mxu1 %v6678_v45  ;;  %v6751_v45 = vld [vmem:[#allocation18 + $0x18] sm:$0xff]  }
 0x5cc   :  { %4639 = vmatprep.subr.bf16.mxu1 %v6683_v47  ;;  %v6753_v47 = vld [vmem:[#allocation18 + $0x28] sm:$0xff]  }
 0x5cf   :  { %4640 = vmatpush1.bf16.msra.mxu1 %v6681_v48  ;;  %v6754_v48 = vld [vmem:[#allocation18 + $0x30] sm:$0xff]  }
 0x5d0   :  { %4641 = vmatprep.subr.bf16.mxu1 %v6686_v49  ;;  %v6755_v49 = vld [vmem:[#allocation18 + $0x38] sm:$0xff]  }
 0x5d3   :  { %4642 = vmatpush1.bf16.msra.mxu1 %v6684_v50  ;;  %v4890_v50 = vld [vmem:[#allocation16] sm:$0xf] }
 0x5d4   :  { %4643 = vmatprep.subr.bf16.mxu1 %v6689_v51  ;;  %v4895_v51 = vrot.slane %v4890_v50, %v820_v54  ;;  %v4902_v54 = vsub.s32 2, %v7609_v53 }
 0x5d7   :  { %4644 = vmatpush1.bf16.msra.mxu1 %v6687_v52  ;;  %v4899_v52 = vrot.slane %v4890_v50, %v824_v56  ;;  %v4906_v56 = vsub.s32 3, %v7609_v53 }
 0x5d8   :  { %4645 = vmatprep.subr.bf16.mxu1 %v6692_v55 }
 0x5db   :  { %4646 = vmatpush1.bf16.msra.mxu1 %v6690_v57 }
 0x5dc   :  { %4647 = vmatprep.subr.bf16.mxu1 %v6695_v58 }
 0x5df   :  { %4648 = vmatpush1.bf16.msra.mxu1 %v6693_v59 }
 0x5e0   :  { %4649 = vmatprep.subr.bf16.mxu1 %v6698_v60 }
 0x5e3   :  { %4650 = vmatpush1.bf16.msra.mxu1 %v6696_v61 }
 0x5e4   :  { %4678 = vmatprep.subr.bf16.mxu1 %v6701_v62 }
 0x5e6   :  { %4668 = vmatmul.mubr.bf16.vlgmr.msra.gmra.mrb[12].mxu1 %v6702_v63 }
 0x5e7   :  { %4679 = vmatpush1.bf16.msra.mxu1 %v6699_v0  ;;  %4710 = vmatprep.mubr.bf16.mxu1 %v7086_v46 }
 0x5e8   :  { %4680 = vmatprep.subr.bf16.mxu1 %v6705_v1 }
 0x5eb   :  { %4681 = vmatpush1.bf16.msra.mxu1 %v6703_v2 }
 0x5ec   :  { %4682 = vmatprep.subr.bf16.mxu1 %v6708_v3  ;;  %v4903_v3 = vrot.slane %v4890_v50, %v4902_v54 }
 0x5ef   :  { %4683 = vmatpush1.bf16.msra.mxu1 %v6706_v4  ;;  %v4907_v4 = vrot.slane %v4890_v50, %v4906_v56 }
 0x5f0   :  { %4684 = vmatprep.subr.bf16.mxu1 %v6711_v5 }
 0x5f3   :  { %4685 = vmatpush1.bf16.msra.mxu1 %v6709_v6 }
 0x5f4   :  { %4686 = vmatprep.subr.bf16.mxu1 %v6714_v7 }
 0x5f7   :  { %4687 = vmatpush1.bf16.msra.mxu1 %v6712_v8 }
 0x5f8   :  { %4688 = vmatprep.subr.bf16.mxu1 %v6717_v9 }
 0x5fb   :  { %4689 = vmatpush1.bf16.msra.mxu1 %v6715_v10 }
 0x5fc   :  { %4690 = vmatprep.subr.bf16.mxu1 %v6720_v11 }
 0x5ff   :  { %4691 = vmatpush1.bf16.msra.mxu1 %v6718_v12 }
 0x600   :  { %4692 = vmatprep.subr.bf16.mxu1 %v6723_v13 }
 0x603   :  { %4693 = vmatpush1.bf16.msra.mxu1 %v6721_v15 }
 0x604   :  { %4804 = vmatprep.subr.bf16.mxu1 %v6726_v16 }
 0x606   :  { %4711 = vmatmul.mubr.bf16.vlgmr.msra.gmra.mrb[16].mxu1 %v6702_v63 }
 0x607   :  { %4805 = vmatpush1.bf16.msra.mxu1 %v6724_v17  ;;  %4836 = vmatprep.mubr.bf16.mxu1 %v7086_v46 }
 0x608   :  { %4806 = vmatprep.subr.bf16.mxu1 %v6729_v18 }
 0x60b   :  { %4807 = vmatpush1.bf16.msra.mxu1 %v6727_v19 }
 0x60c   :  { %4808 = vmatprep.subr.bf16.mxu1 %v6732_v20 }
 0x60f   :  { %4809 = vmatpush1.bf16.msra.mxu1 %v6730_v21 }
 0x610   :  { %4810 = vmatprep.subr.bf16.mxu1 %v6735_v22 }
 0x613   :  { %4811 = vmatpush1.bf16.msra.mxu1 %v6733_v23 }
 0x614   :  { %4847 = vmatprep.subr.bf16.mxu1 %v6738_v24  ;;  %v4958_v24 = vld [vmem:[%s7692_s15] sm:$0xff] }
 0x699   :  { %v4409_v26 = vpop.f32.mrb[8].mxu1 }
 0x69a   :  { %v4410_v27 = vadd.f32 %v5641_v25, %v4409_v26  ;;  %v5770_v28 = vpop.f32.mrb[9].mxu1 }
 0x69b   :  { %v4412_v29 = vpop.f32.mrb[10].mxu1 }
 0x69c   :  { %v4413_v30 = vadd.f32 %v5641_v25, %v4412_v29  ;;  %v5771_v31 = vpop.f32.mrb[11].mxu1  ;;  %v4416_v32 = vmax.f32 %v4410_v27, 0.0  ;;  %v4959_v27 = vld [vmem:[%s7692_s15 + $0x8] sm:$0xff] }
 0x69e   :  { %v4417_v33 = vmax.f32 %v4413_v30, 0.0 }
 0x6a0   :  { %v4418_v35 = vpack.c.bf16 %v4417_v33, %v4416_v32 }
 0x6a2   :  { %5696 = vmatmul.mubr.msk.bf16.vlgmr.msra.gmra.mrb[12].mxu1 %vm4371_vm2, %v4418_v35 }
 0x6a3   :  { %4848 = vmatpush1.bf16.msra.mxu1 %v6736_v34  ;;  %4879 = vmatprep.mubr.bf16.mxu1 %v7086_v46  ;;  %v6752_v46 = vld [vmem:[#allocation18 + $0x20] sm:$0xff]  }
 0x6a4   :  { %4849 = vmatprep.subr.bf16.mxu1 %v6741_v36 }
 0x6a7   :  { %4850 = vmatpush1.bf16.msra.mxu1 %v6739_v37 }
 0x6a8   :  { %4851 = vmatprep.subr.bf16.mxu1 %v6744_v38 }
 0x6ab   :  { %4852 = vmatpush1.bf16.msra.mxu1 %v6742_v39 }
 0x6ac   :  { %4853 = vmatprep.subr.bf16.mxu1 %v6747_v40 }
 0x6af   :  { %4854 = vmatpush1.bf16.msra.mxu1 %v6745_v41 }
 0x6b0   :  { %5772 = vmatprep.subr.bf16.mxu1 %v7084_v14 }
 0x6b2   :  { %5697 = vmatmul.mubr.msk.bf16.vlgmr.msra.gmra.mrb[16].mxu1 %vm4371_vm2, %v4418_v35 }
 0x6b3   :  { %5788 = vmatprep.mubr.msk.bf16.mxu1 %vm7085_vm0, %v7084_v14  ;;  %5773 = vmatpush3.bf16.msra.mxu1 %v6748_v42 }
 0x6b4   :  { %5774 = vmatprep.subr.bf16.mxu1 %v7084_v14 }
 0x6b7   :  { %5775 = vmatpush3.bf16.msra.mxu1 %v6749_v43 }
 0x6b8   :  { %5776 = vmatprep.subr.bf16.mxu1 %v7084_v14 }
 0x6bb   :  { %5777 = vmatpush3.bf16.msra.mxu1 %v6750_v44 }
 0x6bc   :  { %5778 = vmatprep.subr.bf16.mxu1 %v7084_v14 }
 0x6bf   :  { %5779 = vmatpush3.bf16.msra.mxu1 %v6751_v45 }
 0x6c0   :  { %5780 = vmatprep.subr.bf16.mxu1 %v7084_v14 }
 0x6c3   :  { %5781 = vmatpush3.bf16.msra.mxu1 %v6752_v46 }
 0x6c4   :  { %5782 = vmatprep.subr.bf16.mxu1 %v7084_v14 }
 0x6c7   :  { %5783 = vmatpush3.bf16.msra.mxu1 %v6753_v47 }
 0x6c8   :  { %5784 = vmatprep.subr.bf16.mxu1 %v7084_v14 }
 0x6cb   :  { %5785 = vmatpush3.bf16.msra.mxu1 %v6754_v48  ;;  %v5704_v48 = vld [vmem:[#allocation19] ss:$0 sm:$0xff] }
 0x6cc   :  { %5786 = vmatprep.subr.bf16.mxu1 %v7084_v14 }
 0x6cf   :  { %5787 = vmatpush3.bf16.msra.mxu1 %v6755_v49 }
 0x775   :  { %v4838_v55 = vpop.f32.mrb[12].mxu1 }
 0x776   :  { %v4912_v57 = vadd.f32 %v4895_v51, %v4838_v55  ;;  %v4840_v58 = vpop.f32.mrb[13].mxu1 }
 0x777   :  { %v4913_v59 = vadd.f32 %v4899_v52, %v4840_v58  ;;  %v4842_v60 = vpop.f32.mrb[14].mxu1 }
 0x778   :  { %v5698_v61 = vmul.f32 -1.442695, %v4912_v57  ;;  %v4916_v62 = vadd.f32 %v4895_v51, %v4842_v60  ;;  %v4844_v63 = vpop.f32.mrb[15].mxu1 }
 0x779   :  { %v5700_v0 = vmul.f32 -1.442695, %v4913_v59  ;;  %v4917_v1 = vadd.f32 %v4899_v52, %v4844_v63 }
 0x77a   :  { %6756 = vpow2.f32 %v5698_v61  ;;  %v5699_v14 = vmul.f32 -1.442695, %v4916_v62 }
 0x77b   :  { %6758 = vpow2.f32 %v5700_v0  ;;  %v5701_v2 = vmul.f32 -1.442695, %v4917_v1 }
 0x77c   :  { %6760 = vpow2.f32 %v5699_v14 }
 0x77d   :  { %6762 = vpow2.f32 %v5701_v2 }
 0x784   :  { %v6757_v5 = vpop.eup %6756 }
 0x785   :  { %v6759_v6 = vpop.eup %6758  ;;  %v4926_v7 = vadd.f32 1.0, %v6757_v5  ;;  %v4881_v8 = vpop.f32.mrb[16].mxu1 }
 0x786   :  { %v6761_v9 = vpop.eup %6760  ;;  %v4938_v10 = vadd.f32 1.0, %v6759_v6  ;;  %v4883_v11 = vpop.f32.mrb[17].mxu1  ;;  %v4914_v15 = vadd.f32 %v4903_v3, %v4881_v8 }
 0x787   :  { %v6763_v12 = vpop.eup %6762  ;;  %6764 = vrcp.f32 %v4926_v7  ;;  %v4927_v13 = vadd.f32 1.0, %v6761_v9  ;;  %v4915_v16 = vadd.f32 %v4907_v4, %v4883_v11  ;;  %v4885_v17 = vpop.f32.mrb[18].mxu1 }
 0x788   :  { %6766 = vrcp.f32 %v4938_v10  ;;  %v4939_v18 = vadd.f32 1.0, %v6763_v12  ;;  %v4887_v19 = vpop.f32.mrb[19].mxu1  ;;  %v4918_v20 = vadd.f32 %v4903_v3, %v4885_v17 }
 0x789   :  { %6768 = vrcp.f32 %v4927_v13  ;;  %v5702_v53 = vmul.f32 -1.442695, %v4915_v16  ;;  %v4919_v21 = vadd.f32 %v4907_v4, %v4887_v19 }
 0x78a   :  { %6770 = vrcp.f32 %v4939_v18 }
 0x78b   :  { %6772 = vtanh.f32 %v4914_v15  ;;  %v5703_v22 = vmul.f32 -1.442695, %v4919_v21 }
 0x78c   :  { %6774 = vpow2.f32 %v5702_v53 }
 0x78d   :  { %6776 = vtanh.f32 %v4918_v20 }
 0x78e   :  { %6778 = vpow2.f32 %v5703_v22 }
 0x791   :  { %v6765_v23 = vpop.eup %6764 }
 0x792   :  { %v6767_v25 = vpop.eup %6766 }
 0x793   :  { %v6769_v26 = vpop.eup %6768  ;;  %v4960_v29 = vmul.f32 %v6767_v25, %v4958_v24 }
 0x794   :  { %v6771_v28 = vpop.eup %6770 }
 0x795   :  { %v6773_v30 = vpop.eup %6772  ;;  %v4961_v32 = vmul.f32 %v6771_v28, %v4959_v27 }
 0x796   :  { %v6775_v31 = vpop.eup %6774  ;;  %v4962_v33 = vmul.f32 %v6773_v30, %v6765_v23 }
 0x797   :  { %v6777_v34 = vpop.eup %6776  ;;  %v4952_v35 = vadd.f32 1.0, %v6775_v31 }
 0x798   :  { %v6779_v36 = vpop.eup %6778  ;;  %v4964_v37 = vadd.f32 %v4962_v33, %v4960_v29  ;;  %v4963_v38 = vmul.f32 %v6777_v34, %v6769_v26 }
 0x799   :  { %6780 = vrcp.f32 %v4952_v35  ;;  %v4953_v39 = vadd.f32 1.0, %v6779_v36 }
 0x79a   :  { %6782 = vtanh.f32 %v4964_v37  ;;  %4970 = vst [vmem:[%s7695_s18] sm:$0xff] %v4964_v37  ;;  %v4965_v40 = vadd.f32 %v4963_v38, %v4961_v32 }
 0x79b   :  { %6784 = vrcp.f32 %v4953_v39 }
 0x79c   :  { %6786 = vtanh.f32 %v4965_v40  ;;  %4971 = vst [vmem:[%s7695_s18 + $0x8] sm:$0xff] %v4965_v40 }
 0x7a3   :  { %v6781_v41 = vpop.eup %6780 }
 0x7a4   :  { %v6783_v42 = vpop.eup %6782 }
 0x7a5   :  { %v6785_v43 = vpop.eup %6784  ;;  %v4968_v44 = vmul.f32 %v6783_v42, %v6781_v41 }
 0x7a6   :  { %v6787_v45 = vpop.eup %6786 }
 0x7a7   :  { %v4969_v46 = vmul.f32 %v6787_v45, %v6785_v43  ;;  %4972 = vst [vmem:[%s7694_s17] sm:$0xff] %v4968_v44 }
 0x7a9   :  { %4973 = vst [vmem:[%s7694_s17 + $0x8] sm:$0xff] %v4969_v46  ;;  %v4974_v47 = vpack.c.bf16 %v4969_v46, %v4968_v44 }
 0x7ab   :  { %5789 = vmatmul.mubr.bf16.vlgmr.msra.gmra.mrb[20].mxu1 %v4974_v47 }
 0x87e   :  { %v5080_v49 = vpop.f32.mrb[20].mxu1 }
 0x87f   :  { %v5081_v50 = vadd.f32 %v5704_v48, %v5080_v49  ;;  %v5790_v51 = vpop.f32.mrb[21].mxu1 }
 0x880   :  { %v5083_v52 = vpop.f32.mrb[22].mxu1 }
 0x881   :  { %5087 = vst [vmem:[%s7709_s8] sm:$0xff] %v5081_v50  ;;  %v5084_v55 = vadd.f32 %v5704_v48, %v5083_v52  ;;  %v5791_v57 = vpop.f32.mrb[23].mxu1 }
 0x883   :  { %5088 = vst [vmem:[%s7709_s8 + $0x8] sm:$0xff] %v5084_v55 }
 0x884   :  { %5101 = vsyncpa [#allocation3], 1 }
 0x885   :  { %5102 = vsyncpa [#allocation5], 1 }
 0x886   :  { %5103 = vsyncpa [#allocation8], 1 }
 0x887   :  { %5104 = vsyncpa [#allocation11], 1 }
 0x888   :  { %5105 = vsyncpa [#allocation14], 1 }
 0x889   :  { %5106 = vsyncpa [#allocation17], 1 }
 0x88a   :  { %5107 = vsyncpa [#allocation20], 1 }

</bundles_post_ra>
